<compile_context>
chip_gen: v7x
topology: tpu7x:2x2x1
jax: 0.10.0
libtpu: 0.0.40
codegen_flags: <defaults>
</compile_context>

<pallas_src>
import functools

import jax
import jax.numpy as jnp
from jax.experimental import pallas as pl
from jax.experimental.pallas import tpu as pltpu


OUT_DIM = 784          # 28 * 28
OUT_PAD = 896          # 7 * 128  -> lane-dense output writeback
NUM_CLASSES = 10


def _round_up(x, m):
    return ((x + m - 1) // m) * m


def _leaky_relu(h, slope=0.2):
    return jnp.where(h > 0, h, slope * h)


def _choose_tiling(batch, batch_tile):
    """Pick (tile, padded_batch) with minimal padding and >=2 grid steps when useful."""
    batch_tile = max(8, (int(batch_tile) // 8) * 8)      # legal sublane multiple
    rows = _round_up(batch, 8)
    steps = max(1, -(-rows // batch_tile))                # ceil division
    # Prefer >= 2 grid steps when there is enough work so the "parallel" batch
    # axis can shard across both TensorCores on v7x (otherwise one TC idles).
    if steps == 1 and rows >= 16:
        steps = 2
    tile = _round_up(-(-rows // steps), 8)
    return tile, steps * tile


# --------------------------------------------------------------------------
# Kernel: one batch tile per grid step, all weights VMEM-resident.
# --------------------------------------------------------------------------
def generator_kernel(x_ref, c_ref, w1x_ref,
                     w2_ref, b2_ref, w3_ref, b3_ref, w4_ref, b4_ref,
                     o_ref):
    mm = w2_ref.dtype  # matmul input dtype (bf16 on the fast path, f32 otherwise)

    # Layer 1: x @ W1[:in] + (embed[cond] @ W1[in:] + b1), the latter pre-gathered
    # in the wrapper as an exact-f32 row tile (c_ref).
    h = jnp.dot(x_ref[...].astype(mm), w1x_ref[...],
                preferred_element_type=jnp.float32) + c_ref[...]
    h = _leaky_relu(h)

    # Layer 2: Linear(256, 512) + LeakyReLU
    h = jnp.dot(h.astype(mm), w2_ref[...],
                preferred_element_type=jnp.float32) + b2_ref[...]
    h = _leaky_relu(h)

    # Layer 3: Linear(512, 1024) + LeakyReLU
    h = jnp.dot(h.astype(mm), w3_ref[...],
                preferred_element_type=jnp.float32) + b3_ref[...]
    h = _leaky_relu(h)

    # Layer 4: Linear(1024, 784 padded to 896) + Tanh
    h = jnp.dot(h.astype(mm), w4_ref[...],
                preferred_element_type=jnp.float32) + b4_ref[...]
    o_ref[...] = jnp.tanh(h).astype(o_ref.dtype)


# --------------------------------------------------------------------------
# One-time parameter preparation (split / fold / pad / cast).
# --------------------------------------------------------------------------
def prepare_params(params, *, input_dim, use_bf16=True):
    """use_bf16=True is the fast path on ALL generations (v5e/v6e/v7x MXUs are bf16)."""
    mm_dtype = jnp.bfloat16 if use_bf16 else jnp.float32

    w1 = params["w1"]                           # (input_dim + embed_dim, 256)
    w1x = w1[:input_dim]                        # (input_dim, 256)
    w1c = w1[input_dim:]                        # (embed_dim, 256)

    # Fold embedding, conditional half of W1, and b1 into one (10, 256) table.
    # Row-gathering this table reproduces emb[cond] @ W1c + b1 exactly (f32).
    t = (jnp.dot(params["embed"], w1c, precision=jax.lax.Precision.HIGHEST)
         + params["b1"]).astype(jnp.float32)

    # Pad layer 4 to a lane-dense 896-wide output (zero columns are inert).
    pad = OUT_PAD - params["w4"].shape[1]
    w4p = jnp.pad(params["w4"], ((0, 0), (0, pad)))
    b4p = jnp.pad(params["b4"], ((0, 0), (0, pad)))

    return {
        "t":   t,                                   # keep f32 (contains b1)
        "w1x": w1x.astype(mm_dtype),
        "w2":  params["w2"].astype(mm_dtype),
        "b2":  params["b2"].astype(jnp.float32),
        "w3":  params["w3"].astype(mm_dtype),
        "b3":  params["b3"].astype(jnp.float32),
        "w4":  w4p.astype(mm_dtype),
        "b4":  b4p.astype(jnp.float32),
    }


# --------------------------------------------------------------------------
# Wrapper: batch tiling + pallas_call.
# --------------------------------------------------------------------------
@functools.partial(jax.jit,
                   static_argnames=("input_dim", "batch_tile", "out_dtype"))
def generator_forward(x, cond, prepped, *, input_dim, batch_tile=512,
                      out_dtype=jnp.float32):
    """x: (B, input_dim) f32, cond: (B,) int32 in [0, 10).  Returns (B, 28, 28)."""
    B = x.shape[0]
    x = x.reshape(B, input_dim).astype(jnp.float32)

    # Exact-f32 row gather of the folded conditional table (replaces the
    # lane-sparse one-hot matmul inside the kernel).
    c_rows = jnp.take(prepped["t"], cond, axis=0)        # (B, 256) f32

    tb, Bp = _choose_tiling(B, batch_tile)
    if Bp != B:
        x = jnp.pad(x, ((0, Bp - B), (0, 0)))
        c_rows = jnp.pad(c_rows, ((0, Bp - B), (0, 0)))

    row = lambda i: (i, 0)       # batch-tiled operands
    const = lambda i: (0, 0)     # VMEM-resident weights / biases (fetched once)

    in_specs = [
        pl.BlockSpec((tb, input_dim), row),          # x
        pl.BlockSpec((tb, 256), row),                # T[cond] (= emb@W1c + b1 rows)
        pl.BlockSpec((input_dim, 256), const),       # W1x
        pl.BlockSpec((256, 512), const),             # W2
        pl.BlockSpec((1, 512), const),               # b2
        pl.BlockSpec((512, 1024), const),            # W3
        pl.BlockSpec((1, 1024), const),              # b3
        pl.BlockSpec((1024, OUT_PAD), const),        # W4 (padded)
        pl.BlockSpec((1, OUT_PAD), const),           # b4 (padded)
    ]
    out_specs = pl.BlockSpec((tb, OUT_PAD), row)

    out = pl.pallas_call(
        generator_kernel,
        out_shape=jax.ShapeDtypeStruct((Bp, OUT_PAD), out_dtype),
        grid=(Bp // tb,),
        in_specs=in_specs,
        out_specs=out_specs,
        compiler_params=pltpu.CompilerParams(
            dimension_semantics=("parallel",),
            vmem_limit_bytes=48 << 20,
        ),
    )(x, c_rows, prepped["w1x"],
      prepped["w2"], prepped["b2"], prepped["w3"], prepped["b3"],
      prepped["w4"], prepped["b4"])

    return out[:B, :OUT_DIM].reshape(B, 28, 28)


# --------------------------------------------------------------------------
# Synthetic parameters (PyTorch-like init) and pure-JAX reference.
# --------------------------------------------------------------------------
def init_params(key, input_dim, embed_dim):
    ks = jax.random.split(key, 9)

    def lin(kw, fan_in, fan_out):
        bound = 1.0 / jnp.sqrt(fan_in)
        return jax.random.uniform(kw, (fan_in, fan_out), jnp.float32, -bound, bound)

    d_in = input_dim + embed_dim
    return {
        "embed": jax.random.normal(ks[0], (NUM_CLASSES, embed_dim), jnp.float32),
        "w1": lin(ks[1], d_in, 256),
        "b1": jax.random.uniform(ks[2], (1, 256), jnp.float32,
                                 -1.0 / jnp.sqrt(d_in), 1.0 / jnp.sqrt(d_in)),
        "w2": lin(ks[3], 256, 512),
        "b2": jax.random.uniform(ks[4], (1, 512), jnp.float32, -1.0 / 16, 1.0 / 16),
        "w3": lin(ks[5], 512, 1024),
        "b3": jax.random.uniform(ks[6], (1, 1024), jnp.float32,
                                 -1.0 / jnp.sqrt(512.0), 1.0 / jnp.sqrt(512.0)),
        "w4": lin(ks[7], 1024, OUT_DIM),
        "b4": jax.random.uniform(ks[8], (1, OUT_DIM), jnp.float32, -1.0 / 32, 1.0 / 32),
    }


def reference_forward(x, cond, params, *, input_dim, embed_dim):
    B = x.shape[0]
    c = params["embed"][cond]
    h = jnp.concatenate([x.reshape(B, input_dim), c], axis=1)
    h = h @ params["w1"] + params["b1"]
    h = jnp.where(h > 0, h, 0.2 * h)
    h = h @ params["w2"] + params["b2"]
    h = jnp.where(h > 0, h, 0.2 * h)
    h = h @ params["w3"] + params["b3"]
    h = jnp.where(h > 0, h, 0.2 * h)
    h = h @ params["w4"] + params["b4"]
    return jnp.tanh(h).reshape(B, 28, 28)


if __name__ == "__main__":
    input_dim = 32
    embed_dim = 32

    key = jax.random.PRNGKey(0)
    kx, kc, kp = jax.random.split(key, 3)
    params = init_params(kp, input_dim, embed_dim)

    # ---- small batch (B=2): strict f32 check ---------------------------------
    B = 2
    x = jax.random.normal(kx, (B, input_dim), jnp.float32)
    cond = jax.random.randint(kc, (B,), 0, NUM_CLASSES, jnp.int32)
    ref = reference_forward(x, cond, params, input_dim=input_dim, embed_dim=embed_dim)

    p_f32 = prepare_params(params, input_dim=input_dim, use_bf16=False)
    out_f32 = jax.block_until_ready(
        generator_forward(x, cond, p_f32, input_dim=input_dim))
    assert out_f32.shape == (B, 28, 28)
    assert jnp.allclose(out_f32, ref, atol=1e-4, rtol=1e-4), "f32 kernel mismatch"

    # bf16 MXU fast path (default on v5e/v6e/v7x), bf16 output, f32 accumulation.
    p_bf16 = prepare_params(params, input_dim=input_dim, use_bf16=True)
    out_bf16 = jax.block_until_ready(
        generator_forward(x, cond, p_bf16, input_dim=input_dim,
                          out_dtype=jnp.bfloat16))
    assert out_bf16.shape == (B, 28, 28)
    assert jnp.allclose(out_bf16.astype(jnp.float32), ref,
                        atol=5e-2, rtol=5e-2), "bf16 kernel mismatch"

    # ---- awkward batch (B=200): exercises adaptive tiling, padding, 2-step grid
    B2 = 200
    kx2, kc2 = jax.random.split(jax.random.PRNGKey(1))
    x2 = jax.random.normal(kx2, (B2, input_dim), jnp.float32)
    cond2 = jax.random.randint(kc2, (B2,), 0, NUM_CLASSES, jnp.int32)
    ref2 = reference_forward(x2, cond2, params, input_dim=input_dim,
                             embed_dim=embed_dim)
    out2 = jax.block_until_ready(
        generator_forward(x2, cond2, p_bf16, input_dim=input_dim))
    assert out2.shape == (B2, 28, 28)
    assert jnp.allclose(out2, ref2, atol=5e-2, rtol=5e-2), "bf16 batch-200 mismatch"

    print("KERNEL_OK")
</pallas_src>

<mosaic_0001>
module attributes {stable_mosaic.version = 11 : i64} {
  func.func @generator_kernel(%arg0: i32, %arg1: memref<8x32xf32, #tpu.memory_space<vmem>>, %arg2: memref<8x256xf32, #tpu.memory_space<vmem>>, %arg3: memref<32x256xf32, #tpu.memory_space<vmem>>, %arg4: memref<256x512xf32, #tpu.memory_space<vmem>>, %arg5: memref<1x512xf32, #tpu.memory_space<vmem>>, %arg6: memref<512x1024xf32, #tpu.memory_space<vmem>>, %arg7: memref<1x1024xf32, #tpu.memory_space<vmem>>, %arg8: memref<1024x896xf32, #tpu.memory_space<vmem>>, %arg9: memref<1x896xf32, #tpu.memory_space<vmem>>, %arg10: memref<8x896xf32, #tpu.memory_space<vmem>>) attributes {dimension_semantics = [#tpu.dimension_semantics<parallel>], iteration_bounds = array<i64: 1>, scalar_prefetch = 0 : i64, scratch_operands = 0 : i64, tpu.core_type = #tpu.core_type<tc>, window_params = [{transform_indices = @transform_0, window_bounds = array<i64: 8, 32>}, {transform_indices = @transform_1, window_bounds = array<i64: 8, 256>}, {pipeline_mode = #tpu.pipeline_mode<synchronous>, transform_indices = @transform_2, window_bounds = array<i64: 32, 256>}, {pipeline_mode = #tpu.pipeline_mode<synchronous>, transform_indices = @transform_3, window_bounds = array<i64: 256, 512>}, {pipeline_mode = #tpu.pipeline_mode<synchronous>, transform_indices = @transform_4, window_bounds = array<i64: 1, 512>}, {pipeline_mode = #tpu.pipeline_mode<synchronous>, transform_indices = @transform_5, window_bounds = array<i64: 512, 1024>}, {pipeline_mode = #tpu.pipeline_mode<synchronous>, transform_indices = @transform_6, window_bounds = array<i64: 1, 1024>}, {pipeline_mode = #tpu.pipeline_mode<synchronous>, transform_indices = @transform_7, window_bounds = array<i64: 1024, 896>}, {pipeline_mode = #tpu.pipeline_mode<synchronous>, transform_indices = @transform_8, window_bounds = array<i64: 1, 896>}, {transform_indices = @transform_9, window_bounds = array<i64: 8, 896>}]} {
    %c0 = arith.constant 0 : index
    %c0_0 = arith.constant 0 : index
    %0 = vector.load %arg1[%c0, %c0_0] : memref<8x32xf32, #tpu.memory_space<vmem>>, vector<8x32xf32>
    %c0_1 = arith.constant 0 : index
    %c0_2 = arith.constant 0 : index
    %1 = vector.load %arg3[%c0_1, %c0_2] : memref<32x256xf32, #tpu.memory_space<vmem>>, vector<32x256xf32>
    %cst = arith.constant dense<0.000000e+00> : vector<8x256xf32>
    %2 = tpu.matmul %0, %1, %cst {dimension_numbers = #tpu.dot_dimension_numbers<[1], [0], [0], [1], [0, 0, 1, 1], [], []>} : vector<8x32xf32>, vector<32x256xf32>, vector<8x256xf32> -> vector<8x256xf32>
    %c0_3 = arith.constant 0 : index
    %c0_4 = arith.constant 0 : index
    %3 = vector.load %arg2[%c0_3, %c0_4] : memref<8x256xf32, #tpu.memory_space<vmem>>, vector<8x256xf32>
    %4 = arith.addf %2, %3 : vector<8x256xf32>
    %cst_5 = arith.constant 0.000000e+00 : f32
    %5 = vector.broadcast %cst_5 : f32 to vector<8x256xf32>
    %6 = arith.cmpf ogt, %4, %5 : vector<8x256xf32>
    %cst_6 = arith.constant 2.000000e-01 : f32
    %7 = vector.broadcast %cst_6 : f32 to vector<8x256xf32>
    %8 = arith.mulf %7, %4 : vector<8x256xf32>
    %9 = arith.select %6, %4, %8 : vector<8x256xi1>, vector<8x256xf32>
    %c0_7 = arith.constant 0 : index
    %c0_8 = arith.constant 0 : index
    %10 = vector.load %arg4[%c0_7, %c0_8] : memref<256x512xf32, #tpu.memory_space<vmem>>, vector<256x512xf32>
    %cst_9 = arith.constant dense<0.000000e+00> : vector<8x512xf32>
    %11 = tpu.matmul %9, %10, %cst_9 {dimension_numbers = #tpu.dot_dimension_numbers<[1], [0], [0], [1], [0, 0, 1, 1], [], []>} : vector<8x256xf32>, vector<256x512xf32>, vector<8x512xf32> -> vector<8x512xf32>
    %c0_10 = arith.constant 0 : index
    %c0_11 = arith.constant 0 : index
    %12 = vector.load %arg5[%c0_10, %c0_11] : memref<1x512xf32, #tpu.memory_space<vmem>>, vector<1x512xf32>
    %13 = vector.broadcast %12 : vector<1x512xf32> to vector<8x512xf32>
    %14 = arith.addf %11, %13 : vector<8x512xf32>
    %cst_12 = arith.constant 0.000000e+00 : f32
    %15 = vector.broadcast %cst_12 : f32 to vector<8x512xf32>
    %16 = arith.cmpf ogt, %14, %15 : vector<8x512xf32>
    %cst_13 = arith.constant 2.000000e-01 : f32
    %17 = vector.broadcast %cst_13 : f32 to vector<8x512xf32>
    %18 = arith.mulf %17, %14 : vector<8x512xf32>
    %19 = arith.select %16, %14, %18 : vector<8x512xi1>, vector<8x512xf32>
    %c0_14 = arith.constant 0 : index
    %c0_15 = arith.constant 0 : index
    %20 = vector.load %arg6[%c0_14, %c0_15] : memref<512x1024xf32, #tpu.memory_space<vmem>>, vector<512x1024xf32>
    %cst_16 = arith.constant dense<0.000000e+00> : vector<8x1024xf32>
    %21 = tpu.matmul %19, %20, %cst_16 {dimension_numbers = #tpu.dot_dimension_numbers<[1], [0], [0], [1], [0, 0, 1, 1], [], []>} : vector<8x512xf32>, vector<512x1024xf32>, vector<8x1024xf32> -> vector<8x1024xf32>
    %c0_17 = arith.constant 0 : index
    %c0_18 = arith.constant 0 : index
    %22 = vector.load %arg7[%c0_17, %c0_18] : memref<1x1024xf32, #tpu.memory_space<vmem>>, vector<1x1024xf32>
    %23 = vector.broadcast %22 : vector<1x1024xf32> to vector<8x1024xf32>
    %24 = arith.addf %21, %23 : vector<8x1024xf32>
    %cst_19 = arith.constant 0.000000e+00 : f32
    %25 = vector.broadcast %cst_19 : f32 to vector<8x1024xf32>
    %26 = arith.cmpf ogt, %24, %25 : vector<8x1024xf32>
    %cst_20 = arith.constant 2.000000e-01 : f32
    %27 = vector.broadcast %cst_20 : f32 to vector<8x1024xf32>
    %28 = arith.mulf %27, %24 : vector<8x1024xf32>
    %29 = arith.select %26, %24, %28 : vector<8x1024xi1>, vector<8x1024xf32>
    %c0_21 = arith.constant 0 : index
    %c0_22 = arith.constant 0 : index
    %30 = vector.load %arg8[%c0_21, %c0_22] : memref<1024x896xf32, #tpu.memory_space<vmem>>, vector<1024x896xf32>
    %cst_23 = arith.constant dense<0.000000e+00> : vector<8x896xf32>
    %31 = tpu.matmul %29, %30, %cst_23 {dimension_numbers = #tpu.dot_dimension_numbers<[1], [0], [0], [1], [0, 0, 1, 1], [], []>} : vector<8x1024xf32>, vector<1024x896xf32>, vector<8x896xf32> -> vector<8x896xf32>
    %c0_24 = arith.constant 0 : index
    %c0_25 = arith.constant 0 : index
    %32 = vector.load %arg9[%c0_24, %c0_25] : memref<1x896xf32, #tpu.memory_space<vmem>>, vector<1x896xf32>
    %33 = vector.broadcast %32 : vector<1x896xf32> to vector<8x896xf32>
    %34 = arith.addf %31, %33 : vector<8x896xf32>
    %35 = math.tanh %34 : vector<8x896xf32>
    %c0_26 = arith.constant 0 : index
    %c0_27 = arith.constant 0 : index
    %36 = vector.load %arg10[%c0_26, %c0_27] : memref<8x896xf32, #tpu.memory_space<vmem>>, vector<8x896xf32>
    tpu.vector_store %arg10[%c0_26, %c0_27], %35 {strides = array<i32>} : memref<8x896xf32, #tpu.memory_space<vmem>>, vector<8x896xf32>,
    return
  }
  func.func @transform_0(%arg0: i32) -> (i32, i32) {
    %c0_i32 = arith.constant 0 : i32
    %c0_i32_0 = arith.constant 0 : i32
    return %arg0, %c0_i32 : i32, i32
  }
  func.func @transform_1(%arg0: i32) -> (i32, i32) {
    %c0_i32 = arith.constant 0 : i32
    %c0_i32_0 = arith.constant 0 : i32
    return %arg0, %c0_i32 : i32, i32
  }
  func.func @transform_2(%arg0: i32) -> (i32, i32) {
    %c0_i32 = arith.constant 0 : i32
    %c0_i32_0 = arith.constant 0 : i32
    %c0_i32_1 = arith.constant 0 : i32
    return %c0_i32, %c0_i32_0 : i32, i32
  }
  func.func @transform_3(%arg0: i32) -> (i32, i32) {
    %c0_i32 = arith.constant 0 : i32
    %c0_i32_0 = arith.constant 0 : i32
    %c0_i32_1 = arith.constant 0 : i32
    return %c0_i32, %c0_i32_0 : i32, i32
  }
  func.func @transform_4(%arg0: i32) -> (i32, i32) {
    %c0_i32 = arith.constant 0 : i32
    %c0_i32_0 = arith.constant 0 : i32
    %c0_i32_1 = arith.constant 0 : i32
    return %c0_i32, %c0_i32_0 : i32, i32
  }
  func.func @transform_5(%arg0: i32) -> (i32, i32) {
    %c0_i32 = arith.constant 0 : i32
    %c0_i32_0 = arith.constant 0 : i32
    %c0_i32_1 = arith.constant 0 : i32
    return %c0_i32, %c0_i32_0 : i32, i32
  }
  func.func @transform_6(%arg0: i32) -> (i32, i32) {
    %c0_i32 = arith.constant 0 : i32
    %c0_i32_0 = arith.constant 0 : i32
    %c0_i32_1 = arith.constant 0 : i32
    return %c0_i32, %c0_i32_0 : i32, i32
  }
  func.func @transform_7(%arg0: i32) -> (i32, i32) {
    %c0_i32 = arith.constant 0 : i32
    %c0_i32_0 = arith.constant 0 : i32
    %c0_i32_1 = arith.constant 0 : i32
    return %c0_i32, %c0_i32_0 : i32, i32
  }
  func.func @transform_8(%arg0: i32) -> (i32, i32) {
    %c0_i32 = arith.constant 0 : i32
    %c0_i32_0 = arith.constant 0 : i32
    %c0_i32_1 = arith.constant 0 : i32
    return %c0_i32, %c0_i32_0 : i32, i32
  }
  func.func @transform_9(%arg0: i32) -> (i32, i32) {
    %c0_i32 = arith.constant 0 : i32
    %c0_i32_0 = arith.constant 0 : i32
    return %arg0, %c0_i32 : i32, i32
  }
}

</mosaic_0001>

<bundles_post_ra>
// kernel: generator_forward.1
= control target key start
LH: loop header
LB: loop body
LE: loop exit
PB: predicated region body
PF: predicated region fallthrough
CT: control target
= control target key end

     0   :  { %14 = vsyncpa [#allocation3], 0  ;;  %s6004_s0 = inlined_call_operand.vmem [shape: f32[8,32], index: 0, kind: input, shape index: {}]   ;;  %s6005_s1 = inlined_call_operand.vmem [shape: f32[8,256], index: 1, kind: input, shape index: {}]   ;;  %s6006_s2 = inlined_call_operand.hbm [shape: f32[32,256], index: 2, kind: input, shape index: {}]   ;;  %s6007_s3 = inlined_call_operand.hbm [shape: f32[256,512], index: 3, kind: input, shape index: {}]   ;;  %s6008_s4 = inlined_call_operand.hbm [shape: f32[1,512], index: 4, kind: input, shape index: {}]   ;;  %s6009_s5 = inlined_call_operand.hbm [shape: f32[512,1024], index: 5, kind: input, shape index: {}]   ;;  %s6010_s6 = inlined_call_operand.hbm [shape: f32[1,1024], index: 6, kind: input, shape index: {}]   ;;  %s6011_s7 = inlined_call_operand.hbm [shape: f32[1024,896], index: 7, kind: input, shape index: {}]   ;;  %s6012_s8 = inlined_call_operand.hbm [shape: f32[1,896], index: 8, kind: input, shape index: {}]   ;;  %s6013_s9 = inlined_call_operand.vmem [shape: f32[8,896], index: 9, kind: output, shape index: {}]  }
   0x1   :  { %15 = vsyncpa [#allocation5], 0 }
   0x2   :  { %16 = vsyncpa [#allocation8], 0 }
   0x3   :  { %17 = vsyncpa [#allocation11], 0  ;;  %s5668_s30 = smov [#allocation4]   ;;  %s5506_s13 = scalar_lea.hbm %s6007_s3, 16384 }
   0x4   :  { %s39_s10 = sshll.u32 %s5668_s30, 4  ;;  %p5507_p0 = scmp.ne.s32.totalorder %s6007_s3, %s5506_s13  ;;  %s40_s10 = int_to_ptr.vmem [resolvable:$true] %s39_s10 }
   0x5   :  { %p5510_p1 = scmp.lt.u32.totalorder %s5506_s13, %s6007_s3 }
   0x7   :  { %p5512_p2 = pnand %p5510_p1, %p5507_p0 }
   0x9   :  { %5515 = shalt.err (!%p5512_p2)
}
   0xa   :  { %s5516_s18 = scalar_lea.vmem %s40_s10, 16384  ;;  %p5521_p4 = scmp.lt.s32.totalorder %s40_s10, %s40_s10 }
   0xb   :  { %p5517_p3 = scmp.ne.s32.totalorder %s40_s10, %s5516_s18  ;;  %p5522_p5 = scmp.lt.s32.totalorder %s5516_s18, %s5516_s18 }
   0xd   :  { %p5523_p6 = por %p5522_p5, %p5521_p4 }
   0xf   :  { %p5524_p7 = pnand %p5523_p6, %p5517_p3 }
  0x11   :  { %5527 = shalt.err (!%p5524_p7)
}
  0x12   :  { %s5669_s19 = smov 512   ;;  %s5670_s20 = smov 32  }
  0x13   :  { %45 = dma.hbm_to_vmem [thread:$0]  %s6007_s3, 16384, %s40_s10, [#allocation5], %s5669_s19, %s5669_s19, %s5670_s20  }
  0x14   :  { %s5671_s23 = smov [#allocation7]   ;;  %s5528_s27 = scalar_lea.hbm %s6009_s5, 65536 }
  0x15   :  { %s61_s24 = sshll.u32 %s5671_s23, 4  ;;  %p5529_p8 = scmp.ne.s32.totalorder %s6009_s5, %s5528_s27  ;;  %s62_s24 = int_to_ptr.vmem [resolvable:$true] %s61_s24 }
  0x16   :  { %p5532_p9 = scmp.lt.u32.totalorder %s5528_s27, %s6009_s5 }
  0x18   :  { %p5534_p10 = pnand %p5532_p9, %p5529_p8 }
  0x1a   :  { %5537 = shalt.err (!%p5534_p10)
}
  0x1b   :  { %s5538_s12 = scalar_lea.vmem %s62_s24, 65536  ;;  %p5543_p12 = scmp.lt.s32.totalorder %s62_s24, %s62_s24 }
  0x1c   :  { %p5539_p11 = scmp.ne.s32.totalorder %s62_s24, %s5538_s12  ;;  %p5544_p13 = scmp.lt.s32.totalorder %s5538_s12, %s5538_s12 }
  0x1e   :  { %p5545_p0 = por %p5544_p13, %p5543_p12 }
  0x20   :  { %p5546_p1 = pnand %p5545_p0, %p5539_p11 }
  0x22   :  { %5549 = shalt.err (!%p5546_p1)
}
  0x23   :  { %s5672_s3 = smov 1024   ;;  %s5673_s10 = smov 64  }
  0x24   :  { %67 = dma.hbm_to_vmem [thread:$0]  %s6009_s5, 65536, %s62_s24, [#allocation8], %s5672_s3, %s5672_s3, %s5673_s10  }
  0x25   :  { %s5674_s15 = smov [#allocation10]   ;;  %s5550_s19 = scalar_lea.hbm %s6011_s7, 114688 }
  0x26   :  { %s83_s16 = sshll.u32 %s5674_s15, 4  ;;  %p5551_p2 = scmp.ne.s32.totalorder %s6011_s7, %s5550_s19  ;;  %s84_s16 = int_to_ptr.vmem [resolvable:$true] %s83_s16 }
  0x27   :  { %p5554_p3 = scmp.lt.u32.totalorder %s5550_s19, %s6011_s7 }
  0x29   :  { %p5556_p4 = pnand %p5554_p3, %p5551_p2 }
  0x2b   :  { %5559 = shalt.err (!%p5556_p4)
}
  0x2c   :  { %s5560_s25 = scalar_lea.vmem %s84_s16, 114688  ;;  %p5565_p6 = scmp.lt.s32.totalorder %s84_s16, %s84_s16 }
  0x2d   :  { %p5561_p5 = scmp.ne.s32.totalorder %s84_s16, %s5560_s25  ;;  %p5566_p7 = scmp.lt.s32.totalorder %s5560_s25, %s5560_s25 }
  0x2f   :  { %p5567_p8 = por %p5566_p7, %p5565_p6 }
  0x31   :  { %p5568_p9 = pnand %p5567_p8, %p5561_p5 }
  0x33   :  { %5571 = shalt.err (!%p5568_p9)
}
  0x34   :  { %s5675_s5 = smov 896   ;;  %s5676_s24 = smov 56  }
  0x35   :  { %89 = dma.hbm_to_vmem [thread:$0]  %s6011_s7, 114688, %s84_s16, [#allocation11], %s5675_s5, %s5675_s5, %s5676_s24  }
  0x36   :  { %s5677_s28 = smov [#allocation2]   ;;  %s5572_s12 = scalar_lea.hbm %s6006_s2, 1024 }
  0x37   :  { %s27_s29 = sshll.u32 %s5677_s28, 4  ;;  %p5573_p10 = scmp.ne.s32.totalorder %s6006_s2, %s5572_s12  ;;  %s28_s29 = int_to_ptr.vmem [resolvable:$true] %s27_s29 }
  0x38   :  { %p5576_p11 = scmp.lt.u32.totalorder %s5572_s12, %s6006_s2 }
  0x3a   :  { %p5578_p12 = pnand %p5576_p11, %p5573_p10 }
  0x3c   :  { %5581 = shalt.err (!%p5578_p12)
}
  0x3d   :  { %s5582_s15 = scalar_lea.vmem %s28_s29, 1024  ;;  %p5587_p0 = scmp.lt.s32.totalorder %s28_s29, %s28_s29 }
  0x3e   :  { %p5583_p13 = scmp.ne.s32.totalorder %s28_s29, %s5582_s15  ;;  %p5588_p1 = scmp.lt.s32.totalorder %s5582_s15, %s5582_s15 }
  0x40   :  { %p5589_p2 = por %p5588_p1, %p5587_p0 }
  0x42   :  { %p5590_p3 = pnand %p5589_p2, %p5583_p13 }
  0x44   :  { %5593 = shalt.err (!%p5590_p3)
}
  0x45   :  { %s5678_s7 = smov 256   ;;  %s5679_s16 = smov 16  }
  0x46   :  { %33 = dma.hbm_to_vmem [thread:$0]  %s6006_s2, 1024, %s28_s29, [#allocation3], %s5678_s7, %s5678_s7, %s5679_s16  }
  0x47   :  { %s5680_s19 = smov [#allocation6]   ;;  %s5681_s21 = smov [#allocation9]  }
  0x48   :  { %s52_s20 = sshll.u32 %s5680_s19, 4  ;;  %s74_s22 = sshll.u32 %s5681_s21, 4  ;;  %s53_s20 = int_to_ptr.vmem [resolvable:$true] %s52_s20  ;;  %s75_s22 = int_to_ptr.vmem [resolvable:$true] %s74_s22 }
  0x49   :  { %s5594_s5 = scalar_lea.hbm %s6008_s4, 64 }
  0x4a   :  { %p5595_p4 = scmp.ne.s32.totalorder %s6008_s4, %s5594_s5  ;;  %p5598_p5 = scmp.lt.u32.totalorder %s5594_s5, %s6008_s4 }
  0x4c   :  { %p5600_p6 = pnand %p5598_p5, %p5595_p4 }
  0x4e   :  { %5603 = shalt.err (!%p5600_p6)
}
  0x4f   :  { %s5604_s2 = scalar_lea.vmem %s53_s20, 64  ;;  %p5609_p8 = scmp.lt.s32.totalorder %s53_s20, %s53_s20 }
  0x50   :  { %p5605_p7 = scmp.ne.s32.totalorder %s53_s20, %s5604_s2  ;;  %p5610_p9 = scmp.lt.s32.totalorder %s5604_s2, %s5604_s2 }
  0x52   :  { %p5611_p10 = por %p5610_p9, %p5609_p8 }
  0x54   :  { %p5612_p11 = pnand %p5611_p10, %p5605_p7 }
  0x56   :  { %5615 = shalt.err (!%p5612_p11)
}
  0x57   :  { %55 = dma.hbm_to_vmem [thread:$0]  %s6008_s4, 64, %s53_s20, [#allocation5]  }
  0x58   :  { %s5616_s3 = scalar_lea.hbm %s6010_s6, 128 }
  0x59   :  { %p5617_p12 = scmp.ne.s32.totalorder %s6010_s6, %s5616_s3  ;;  %p5620_p13 = scmp.lt.u32.totalorder %s5616_s3, %s6010_s6 }
  0x5b   :  { %p5622_p0 = pnand %p5620_p13, %p5617_p12 }
  0x5d   :  { %5625 = shalt.err (!%p5622_p0)
}
  0x5e   :  { %s5626_s7 = scalar_lea.vmem %s75_s22, 128  ;;  %p5631_p2 = scmp.lt.s32.totalorder %s75_s22, %s75_s22 }
  0x5f   :  { %p5627_p1 = scmp.ne.s32.totalorder %s75_s22, %s5626_s7  ;;  %p5632_p3 = scmp.lt.s32.totalorder %s5626_s7, %s5626_s7 }
  0x61   :  { %p5633_p4 = por %p5632_p3, %p5631_p2 }
  0x63   :  { %p5634_p5 = pnand %p5633_p4, %p5627_p1 }
  0x65   :  { %5637 = shalt.err (!%p5634_p5)
}
  0x66   :  { %77 = dma.hbm_to_vmem [thread:$0]  %s6010_s6, 128, %s75_s22, [#allocation8]  }
  0x67   :  { %s5682_s17 = smov [#allocation12]   ;;  %s5638_s21 = scalar_lea.hbm %s6012_s8, 112 }
  0x68   :  { %s96_s18 = sshll.u32 %s5682_s17, 4  ;;  %p5639_p6 = scmp.ne.s32.totalorder %s6012_s8, %s5638_s21  ;;  %s97_s18 = int_to_ptr.vmem [resolvable:$true] %s96_s18 }
  0x69   :  { %p5642_p7 = scmp.lt.u32.totalorder %s5638_s21, %s6012_s8 }
  0x6b   :  { %p5644_p8 = pnand %p5642_p7, %p5639_p6 }
  0x6d   :  { %5647 = shalt.err (!%p5644_p8)
}
  0x6e   :  { %s5648_s26 = scalar_lea.vmem %s97_s18, 112  ;;  %s5652_s6 = scalar_lea.vmem %s97_s18, 128 }
  0x6f   :  { %p5649_p9 = scmp.ne.s32.totalorder %s97_s18, %s5648_s26  ;;  %p5653_p10 = scmp.lt.s32.totalorder %s97_s18, %s97_s18 }
  0x70   :  { %p5654_p11 = scmp.lt.s32.totalorder %s5652_s6, %s5648_s26 }
  0x72   :  { %p5655_p12 = por %p5654_p11, %p5653_p10 }
  0x74   :  { %p5656_p13 = pnand %p5655_p12, %p5649_p9 }
  0x76   :  { %5659 = shalt.err (!%p5656_p13)
}
  0x77   :  { %99 = dma.hbm_to_vmem [thread:$0]  %s6012_s8, 112, %s97_s18, [#allocation11]  }
  0x78   :  { %5660 = dma.done.wait [#allocation3], 1024  }
  0x79   :  { %5661 = vsyncadd [#allocation3], 4294966272 }
  0x7a   :  { %5662 = dma.done.wait [#allocation5], 16448  }
  0x7b   :  { %5663 = vsyncadd [#allocation5], 4294950848 }
  0x7c   :  { %5664 = dma.done.wait [#allocation8], 65664  }
  0x7d   :  { %5665 = vsyncadd [#allocation8], 4294901632 }
  0x7e   :  { %5666 = dma.done.wait [#allocation11], 114800  }
  0x7f   :  { %5667 = vsyncadd [#allocation11], 4294852496  ;;  %v5683_v0 = vmov 0.0   ;;  %v123_v1 = vld [vmem:[#allocation2 + $0x8] sm:$0xff]  ;;  %v125_v2 = vld [vmem:[#allocation2 + $0x18] sm:$0xff]  ;;  %vm132_vm0 = vcmask 261120  }
  0x80   :  { %200 = vmatprep.mubr.f32.mxu0 %v5683_v0  ;;  %v122_v3 = vld [vmem:[#allocation2] sm:$0xff]  ;;  %v3891_v4 = vpack.c.bf16 %v125_v2, %v123_v1  ;;  %v124_v5 = vld [vmem:[#allocation2 + $0x10] sm:$0xff]  ;;  %v127_v6 = vld [vmem:[#allocation2 + $0x28] sm:$0xff] }
  0x81   :  { %v129_v7 = vld [vmem:[#allocation2 + $0x38] sm:$0xff]  ;;  %v3893_v8 = vpack.c.bf16 %v124_v5, %v122_v3  ;;  %v126_v10 = vld [vmem:[#allocation2 + $0x20] sm:$0xff]  ;;  %v128_v11 = vld [vmem:[#allocation2 + $0x30] sm:$0xff] }
  0x82   :  { %v3895_v9 = vpack.c.bf16 %v129_v7, %v127_v6  ;;  %3892 = vmatprep.subr.bf16.mxu0 %v3891_v4  ;;  %v214_v12 = vld [vmem:[#allocation4 + $0x8] sm:$0xff]  ;;  %v3897_v14 = vpack.c.bf16 %v128_v11, %v126_v10  ;;  %v213_v16 = vld [vmem:[#allocation4] sm:$0xff] }
  0x83   :  { %v218_v13 = vld [vmem:[#allocation4 + $0x28] sm:$0xff]  ;;  %3894 = vmatpush1.bf16.msra.mxu0 %v3893_v8  ;;  %v217_v17 = vld [vmem:[#allocation4 + $0x20] sm:$0xff] }
  0x84   :  { %3896 = vmatprep.subr.bf16.mxu0 %v3895_v9  ;;  %v3899_v15 = vpack.c.bf16 %v218_v13, %v214_v12  ;;  %v222_v18 = vld [vmem:[#allocation4 + $0x48] sm:$0xff]  ;;  %v121_v20 = vld [vmem:[%s6004_s0] sm:$0xff]  ;;  %v3901_v21 = vpack.c.bf16 %v217_v17, %v213_v16 }
  0x85   :  { %v226_v19 = vld [vmem:[#allocation4 + $0x68] sm:$0xff]  ;;  %v221_v23 = vld [vmem:[#allocation4 + $0x40] sm:$0xff] }
  0x86   :  { %v3903_v22 = vpack.c.bf16 %v226_v19, %v222_v18  ;;  %v225_v24 = vld [vmem:[#allocation4 + $0x60] sm:$0xff]  ;;  %v230_v25 = vld [vmem:[#allocation4 + $0x88] sm:$0xff] }
  0x87   :  { %3898 = vmatpush1.bf16.msra.mxu0 %v3897_v14  ;;  %v234_v26 = vld [vmem:[#allocation4 + $0xa8] sm:$0xff]  ;;  %v3905_v27 = vpack.c.bf16 %v225_v24, %v221_v23  ;;  %v229_v29 = vld [vmem:[#allocation4 + $0x80] sm:$0xff] }
  0x88   :  { %3900 = vmatprep.subr.bf16.mxu0 %v3899_v15  ;;  %v3907_v28 = vpack.c.bf16 %v234_v26, %v230_v25  ;;  %v233_v30 = vld [vmem:[#allocation4 + $0xa0] sm:$0xff]  ;;  %v238_v31 = vld [vmem:[#allocation4 + $0xc8] sm:$0xff] }
  0x89   :  { %v242_v32 = vld [vmem:[#allocation4 + $0xe8] sm:$0xff]  ;;  %v3909_v33 = vpack.c.bf16 %v233_v30, %v229_v29  ;;  %v237_v35 = vld [vmem:[#allocation4 + $0xc0] sm:$0xff] }
  0x8a   :  { %3750 = vmatmul.mubr.msk.f32.vlgmr.msra.gmra.mrb[0].mxu0 %vm132_vm0, %v121_v20  ;;  %v3911_v34 = vpack.c.bf16 %v242_v32, %v238_v31  ;;  %v241_v36 = vld [vmem:[#allocation4 + $0xe0] sm:$0xff]  ;;  %v246_v37 = vld [vmem:[#allocation4 + $0x108] sm:$0xff] }
  0x8b   :  { %3902 = vmatpush1.bf16.msra.mxu0 %v3901_v21  ;;  %v250_v38 = vld [vmem:[#allocation4 + $0x128] sm:$0xff]  ;;  %v3913_v39 = vpack.c.bf16 %v241_v36, %v237_v35  ;;  %v245_v41 = vld [vmem:[#allocation4 + $0x100] sm:$0xff] }
  0x8c   :  { %3904 = vmatprep.subr.bf16.mxu0 %v3903_v22  ;;  %v3915_v40 = vpack.c.bf16 %v250_v38, %v246_v37  ;;  %v249_v42 = vld [vmem:[#allocation4 + $0x120] sm:$0xff]  ;;  %v254_v43 = vld [vmem:[#allocation4 + $0x148] sm:$0xff] }
  0x8d   :  { %v258_v44 = vld [vmem:[#allocation4 + $0x168] sm:$0xff]  ;;  %v3917_v45 = vpack.c.bf16 %v249_v42, %v245_v41  ;;  %v253_v47 = vld [vmem:[#allocation4 + $0x140] sm:$0xff] }
  0x8e   :  { %v3919_v46 = vpack.c.bf16 %v258_v44, %v254_v43  ;;  %v257_v48 = vld [vmem:[#allocation4 + $0x160] sm:$0xff]  ;;  %v262_v49 = vld [vmem:[#allocation4 + $0x188] sm:$0xff] }
  0x8f   :  { %3906 = vmatpush1.bf16.msra.mxu0 %v3905_v27  ;;  %v266_v50 = vld [vmem:[#allocation4 + $0x1a8] sm:$0xff]  ;;  %v3921_v51 = vpack.c.bf16 %v257_v48, %v253_v47  ;;  %v261_v53 = vld [vmem:[#allocation4 + $0x180] sm:$0xff]  ;;  %v220_v47 = vld [vmem:[#allocation4 + $0x38] sm:$0xff] }
  0x90   :  { %3908 = vmatprep.subr.bf16.mxu0 %v3907_v28  ;;  %v3923_v52 = vpack.c.bf16 %v266_v50, %v262_v49  ;;  %v265_v54 = vld [vmem:[#allocation4 + $0x1a0] sm:$0xff]  ;;  %v270_v55 = vld [vmem:[#allocation4 + $0x1c8] sm:$0xff] }
  0x91   :  { %v274_v56 = vld [vmem:[#allocation4 + $0x1e8] sm:$0xff]  ;;  %v3925_v57 = vpack.c.bf16 %v265_v54, %v261_v53  ;;  %v269_v59 = vld [vmem:[#allocation4 + $0x1c0] sm:$0xff] }
  0x92   :  { %v3927_v58 = vpack.c.bf16 %v274_v56, %v270_v55  ;;  %v273_v60 = vld [vmem:[#allocation4 + $0x1e0] sm:$0xff]  ;;  %v278_v61 = vld [vmem:[#allocation4 + $0x208] sm:$0xff] }
  0x93   :  { %3910 = vmatpush1.bf16.msra.mxu0 %v3909_v33  ;;  %v282_v62 = vld [vmem:[#allocation4 + $0x228] sm:$0xff]  ;;  %v3929_v63 = vpack.c.bf16 %v273_v60, %v269_v59  ;;  %v277_v1 = vld [vmem:[#allocation4 + $0x200] sm:$0xff] }
  0x94   :  { %3912 = vmatprep.subr.bf16.mxu0 %v3911_v34  ;;  %v3931_v0 = vpack.c.bf16 %v282_v62, %v278_v61  ;;  %v281_v2 = vld [vmem:[#allocation4 + $0x220] sm:$0xff]  ;;  %v286_v3 = vld [vmem:[#allocation4 + $0x248] sm:$0xff] }
  0x95   :  { %v290_v4 = vld [vmem:[#allocation4 + $0x268] sm:$0xff]  ;;  %v3933_v5 = vpack.c.bf16 %v281_v2, %v277_v1  ;;  %v285_v7 = vld [vmem:[#allocation4 + $0x240] sm:$0xff] }
  0x96   :  { %v3935_v6 = vpack.c.bf16 %v290_v4, %v286_v3  ;;  %v289_v8 = vld [vmem:[#allocation4 + $0x260] sm:$0xff]  ;;  %v294_v9 = vld [vmem:[#allocation4 + $0x288] sm:$0xff] }
  0x97   :  { %3914 = vmatpush1.bf16.msra.mxu0 %v3913_v39  ;;  %v298_v10 = vld [vmem:[#allocation4 + $0x2a8] sm:$0xff]  ;;  %v3937_v11 = vpack.c.bf16 %v289_v8, %v285_v7  ;;  %v293_v13 = vld [vmem:[#allocation4 + $0x280] sm:$0xff] }
  0x98   :  { %3916 = vmatprep.subr.bf16.mxu0 %v3915_v40  ;;  %v3939_v12 = vpack.c.bf16 %v298_v10, %v294_v9  ;;  %v297_v14 = vld [vmem:[#allocation4 + $0x2a0] sm:$0xff]  ;;  %v302_v15 = vld [vmem:[#allocation4 + $0x2c8] sm:$0xff] }
  0x99   :  { %v306_v16 = vld [vmem:[#allocation4 + $0x2e8] sm:$0xff]  ;;  %v3941_v17 = vpack.c.bf16 %v297_v14, %v293_v13  ;;  %v301_v19 = vld [vmem:[#allocation4 + $0x2c0] sm:$0xff] }
  0x9a   :  { %v3943_v18 = vpack.c.bf16 %v306_v16, %v302_v15  ;;  %v305_v20 = vld [vmem:[#allocation4 + $0x2e0] sm:$0xff]  ;;  %v310_v21 = vld [vmem:[#allocation4 + $0x308] sm:$0xff] }
  0x9b   :  { %3918 = vmatpush1.bf16.msra.mxu0 %v3917_v45  ;;  %v314_v22 = vld [vmem:[#allocation4 + $0x328] sm:$0xff]  ;;  %v3945_v23 = vpack.c.bf16 %v305_v20, %v301_v19  ;;  %v309_v25 = vld [vmem:[#allocation4 + $0x300] sm:$0xff] }
  0x9c   :  { %3920 = vmatprep.subr.bf16.mxu0 %v3919_v46  ;;  %v3947_v24 = vpack.c.bf16 %v314_v22, %v310_v21  ;;  %v313_v26 = vld [vmem:[#allocation4 + $0x320] sm:$0xff]  ;;  %v318_v27 = vld [vmem:[#allocation4 + $0x348] sm:$0xff]  ;;  %v216_v46 = vld [vmem:[#allocation4 + $0x18] sm:$0xff] }
  0x9d   :  { %v322_v28 = vld [vmem:[#allocation4 + $0x368] sm:$0xff]  ;;  %v3949_v29 = vpack.c.bf16 %v313_v26, %v309_v25  ;;  %v317_v31 = vld [vmem:[#allocation4 + $0x340] sm:$0xff]  ;;  %v3963_v48 = vpack.c.bf16 %v220_v47, %v216_v46 }
  0x9e   :  { %v3951_v30 = vpack.c.bf16 %v322_v28, %v318_v27  ;;  %v321_v32 = vld [vmem:[#allocation4 + $0x360] sm:$0xff]  ;;  %v326_v33 = vld [vmem:[#allocation4 + $0x388] sm:$0xff] }
  0x9f   :  { %3922 = vmatpush1.bf16.msra.mxu0 %v3921_v51  ;;  %v330_v34 = vld [vmem:[#allocation4 + $0x3a8] sm:$0xff]  ;;  %v3953_v35 = vpack.c.bf16 %v321_v32, %v317_v31  ;;  %v325_v37 = vld [vmem:[#allocation4 + $0x380] sm:$0xff] }
  0xa0   :  { %3924 = vmatprep.subr.bf16.mxu0 %v3923_v52  ;;  %v3955_v36 = vpack.c.bf16 %v330_v34, %v326_v33  ;;  %v329_v38 = vld [vmem:[#allocation4 + $0x3a0] sm:$0xff]  ;;  %v334_v40 = vld [vmem:[#allocation4 + $0x3c8] sm:$0xff] }
  0xa1   :  { %v3957_v39 = vpack.c.bf16 %v329_v38, %v325_v37  ;;  %v338_v41 = vld [vmem:[#allocation4 + $0x3e8] sm:$0xff]  ;;  %v333_v43 = vld [vmem:[#allocation4 + $0x3c0] sm:$0xff] }
  0xa2   :  { %v3959_v42 = vpack.c.bf16 %v338_v41, %v334_v40  ;;  %v337_v44 = vld [vmem:[#allocation4 + $0x3e0] sm:$0xff]  ;;  %v518_v49 = vld [vmem:[#allocation7 + $0x8] sm:$0xff] }
  0xa3   :  { %3926 = vmatpush1.bf16.msra.mxu0 %v3925_v57  ;;  %v3961_v45 = vpack.c.bf16 %v337_v44, %v333_v43  ;;  %v526_v50 = vld [vmem:[#allocation7 + $0x48] sm:$0xff]  ;;  %v517_v52 = vld [vmem:[#allocation7] sm:$0xff] }
  0xa4   :  { %3928 = vmatprep.subr.bf16.mxu0 %v3927_v58  ;;  %v4027_v51 = vpack.c.bf16 %v526_v50, %v518_v49  ;;  %v525_v53 = vld [vmem:[#allocation7 + $0x40] sm:$0xff]  ;;  %v534_v55 = vld [vmem:[#allocation7 + $0x88] sm:$0xff] }
  0xa5   :  { %v4029_v54 = vpack.c.bf16 %v525_v53, %v517_v52  ;;  %v542_v56 = vld [vmem:[#allocation7 + $0xc8] sm:$0xff]  ;;  %v533_v58 = vld [vmem:[#allocation7 + $0x80] sm:$0xff] }
  0xa6   :  { %4028 = vmatprep.subr.bf16.mxu1 %v4027_v51  ;;  %v4031_v57 = vpack.c.bf16 %v542_v56, %v534_v55  ;;  %v541_v59 = vld [vmem:[#allocation7 + $0xc0] sm:$0xff]  ;;  %v550_v61 = vld [vmem:[#allocation7 + $0x108] sm:$0xff] }
  0xa7   :  { %3930 = vmatpush1.bf16.msra.mxu0 %v3929_v63  ;;  %4030 = vmatpush1.bf16.msra.mxu1 %v4029_v54  ;;  %v4033_v60 = vpack.c.bf16 %v541_v59, %v533_v58  ;;  %v558_v62 = vld [vmem:[#allocation7 + $0x148] sm:$0xff]  ;;  %v557_v1 = vld [vmem:[#allocation7 + $0x140] sm:$0xff] }
  0xa8   :  { %3932 = vmatprep.subr.bf16.mxu0 %v3931_v0  ;;  %4032 = vmatprep.subr.bf16.mxu1 %v4031_v57  ;;  %v4035_v63 = vpack.c.bf16 %v558_v62, %v550_v61  ;;  %v549_v0 = vld [vmem:[#allocation7 + $0x100] sm:$0xff]  ;;  %v566_v3 = vld [vmem:[#allocation7 + $0x188] sm:$0xff] }
  0xa9   :  { %v4037_v2 = vpack.c.bf16 %v557_v1, %v549_v0  ;;  %v574_v4 = vld [vmem:[#allocation7 + $0x1c8] sm:$0xff]  ;;  %v573_v7 = vld [vmem:[#allocation7 + $0x1c0] sm:$0xff] }
  0xaa   :  { %v582_v9 = vld [vmem:[#allocation7 + $0x208] sm:$0xff]  ;;  %v589_v13 = vld [vmem:[#allocation7 + $0x240] sm:$0xff] }
  0xab   :  { %3934 = vmatpush1.bf16.msra.mxu0 %v3933_v5  ;;  %4034 = vmatpush1.bf16.msra.mxu1 %v4033_v60  ;;  %v4039_v5 = vpack.c.bf16 %v574_v4, %v566_v3  ;;  %v590_v10 = vld [vmem:[#allocation7 + $0x248] sm:$0xff]  ;;  %v605_v19 = vld [vmem:[#allocation7 + $0x2c0] sm:$0xff] }
  0xac   :  { %3936 = vmatprep.subr.bf16.mxu0 %v3935_v6  ;;  %4036 = vmatprep.subr.bf16.mxu1 %v4035_v63  ;;  %v565_v6 = vld [vmem:[#allocation7 + $0x180] sm:$0xff]  ;;  %v598_v15 = vld [vmem:[#allocation7 + $0x288] sm:$0xff] }
  0xad   :  { %v4041_v8 = vpack.c.bf16 %v573_v7, %v565_v6  ;;  %v606_v16 = vld [vmem:[#allocation7 + $0x2c8] sm:$0xff]  ;;  %v621_v25 = vld [vmem:[#allocation7 + $0x340] sm:$0xff] }
  0xae   :  { %v614_v21 = vld [vmem:[#allocation7 + $0x308] sm:$0xff]  ;;  %v637_v31 = vld [vmem:[#allocation7 + $0x3c0] sm:$0xff] }
  0xaf   :  { %3938 = vmatpush1.bf16.msra.mxu0 %v3937_v11  ;;  %4038 = vmatpush1.bf16.msra.mxu1 %v4037_v2  ;;  %v4043_v11 = vpack.c.bf16 %v590_v10, %v582_v9  ;;  %v622_v22 = vld [vmem:[#allocation7 + $0x348] sm:$0xff]  ;;  %v653_v37 = vld [vmem:[#allocation7 + $0x440] sm:$0xff] }
  0xb0   :  { %3940 = vmatprep.subr.bf16.mxu0 %v3939_v12  ;;  %4040 = vmatprep.subr.bf16.mxu1 %v4039_v5  ;;  %v581_v12 = vld [vmem:[#allocation7 + $0x200] sm:$0xff]  ;;  %v630_v27 = vld [vmem:[#allocation7 + $0x388] sm:$0xff] }
  0xb1   :  { %v4045_v14 = vpack.c.bf16 %v589_v13, %v581_v12  ;;  %v638_v28 = vld [vmem:[#allocation7 + $0x3c8] sm:$0xff]  ;;  %v669_v43 = vld [vmem:[#allocation7 + $0x4c0] sm:$0xff] }
  0xb2   :  { %v646_v33 = vld [vmem:[#allocation7 + $0x408] sm:$0xff]  ;;  %v685_v49 = vld [vmem:[#allocation7 + $0x540] sm:$0xff] }
  0xb3   :  { %3942 = vmatpush1.bf16.msra.mxu0 %v3941_v17  ;;  %4042 = vmatpush1.bf16.msra.mxu1 %v4041_v8  ;;  %v4047_v17 = vpack.c.bf16 %v606_v16, %v598_v15  ;;  %v654_v34 = vld [vmem:[#allocation7 + $0x448] sm:$0xff]  ;;  %v693_v54 = vld [vmem:[#allocation7 + $0x580] sm:$0xff] }
  0xb4   :  { %3944 = vmatprep.subr.bf16.mxu0 %v3943_v18  ;;  %4044 = vmatprep.subr.bf16.mxu1 %v4043_v11  ;;  %v597_v18 = vld [vmem:[#allocation7 + $0x280] sm:$0xff]  ;;  %v670_v40 = vld [vmem:[#allocation7 + $0x4c8] sm:$0xff] }
  0xb5   :  { %v4049_v20 = vpack.c.bf16 %v605_v19, %v597_v18  ;;  %v686_v46 = vld [vmem:[#allocation7 + $0x548] sm:$0xff]  ;;  %v701_v55 = vld [vmem:[#allocation7 + $0x5c0] sm:$0xff]  ;;  %v228_v18 = vld [vmem:[#allocation4 + $0x78] sm:$0xff] }
  0xb6   :  { %v694_v51 = vld [vmem:[#allocation7 + $0x588] sm:$0xff]  ;;  %v4073_v56 = vpack.c.bf16 %v701_v55, %v693_v54  ;;  %v709_v60 = vld [vmem:[#allocation7 + $0x600] sm:$0xff] }
  0xb7   :  { %3946 = vmatpush1.bf16.msra.mxu0 %v3945_v23  ;;  %4046 = vmatpush1.bf16.msra.mxu1 %v4045_v14  ;;  %v4051_v23 = vpack.c.bf16 %v622_v22, %v614_v21  ;;  %v702_v52 = vld [vmem:[#allocation7 + $0x5c8] sm:$0xff]  ;;  %v717_v61 = vld [vmem:[#allocation7 + $0x640] sm:$0xff] }
  0xb8   :  { %3948 = vmatprep.subr.bf16.mxu0 %v3947_v24  ;;  %4048 = vmatprep.subr.bf16.mxu1 %v4047_v17  ;;  %v613_v24 = vld [vmem:[#allocation7 + $0x300] sm:$0xff]  ;;  %v4071_v53 = vpack.c.bf16 %v702_v52, %v694_v51  ;;  %v710_v57 = vld [vmem:[#allocation7 + $0x608] sm:$0xff]  ;;  %v4077_v62 = vpack.c.bf16 %v717_v61, %v709_v60  ;;  %v224_v17 = vld [vmem:[#allocation4 + $0x58] sm:$0xff] }
  0xb9   :  { %v4053_v26 = vpack.c.bf16 %v621_v25, %v613_v24  ;;  %v718_v58 = vld [vmem:[#allocation7 + $0x648] sm:$0xff]  ;;  %v725_v2 = vld [vmem:[#allocation7 + $0x680] sm:$0xff]  ;;  %v3967_v22 = vpack.c.bf16 %v228_v18, %v224_v17  ;;  %v268_v51 = vld [vmem:[#allocation4 + $0x1b8] sm:$0xff] }
  0xba   :  { %v4075_v59 = vpack.c.bf16 %v718_v58, %v710_v57  ;;  %v726_v63 = vld [vmem:[#allocation7 + $0x688] sm:$0xff]  ;;  %v733_v3 = vld [vmem:[#allocation7 + $0x6c0] sm:$0xff]  ;;  %v276_v57 = vld [vmem:[#allocation4 + $0x1f8] sm:$0xff] }
  0xbb   :  { %3950 = vmatpush1.bf16.msra.mxu0 %v3949_v29  ;;  %4050 = vmatpush1.bf16.msra.mxu1 %v4049_v20  ;;  %v4055_v29 = vpack.c.bf16 %v638_v28, %v630_v27  ;;  %v734_v0 = vld [vmem:[#allocation7 + $0x6c8] sm:$0xff]  ;;  %v4081_v4 = vpack.c.bf16 %v733_v3, %v725_v2  ;;  %v130_v7 = vld [vmem:[%s6005_s1] sm:$0xff]  ;;  %v236_v27 = vld [vmem:[#allocation4 + $0xb8] sm:$0xff] }
  0xbc   :  { %3952 = vmatprep.subr.bf16.mxu0 %v3951_v30  ;;  %4052 = vmatprep.subr.bf16.mxu1 %v4051_v23  ;;  %v629_v30 = vld [vmem:[#allocation7 + $0x380] sm:$0xff]  ;;  %v4079_v1 = vpack.c.bf16 %v734_v0, %v726_v63  ;;  %v742_v5 = vld [vmem:[#allocation7 + $0x708] sm:$0xff]  ;;  %v284_v63 = vld [vmem:[#allocation4 + $0x238] sm:$0xff] }
  0xbd   :  { %v4057_v32 = vpack.c.bf16 %v637_v31, %v629_v30  ;;  %v750_v6 = vld [vmem:[#allocation7 + $0x748] sm:$0xff]  ;;  %v308_v17 = vld [vmem:[#allocation4 + $0x2f8] sm:$0xff] }
  0xbe   :  { %v4083_v8 = vpack.c.bf16 %v750_v6, %v742_v5  ;;  %v131_v9 = vld [vmem:[%s6005_s1 + $0x8] sm:$0xff]  ;;  %v215_v14 = vld [vmem:[#allocation4 + $0x10] sm:$0xff]  ;;  %v292_v5 = vld [vmem:[#allocation4 + $0x278] sm:$0xff] }
  0xbf   :  { %3954 = vmatpush1.bf16.msra.mxu0 %v3953_v35  ;;  %4054 = vmatpush1.bf16.msra.mxu1 %v4053_v26  ;;  %v4059_v35 = vpack.c.bf16 %v654_v34, %v646_v33  ;;  %v219_v15 = vld [vmem:[#allocation4 + $0x30] sm:$0xff]  ;;  %v232_v26 = vld [vmem:[#allocation4 + $0x98] sm:$0xff] }
  0xc0   :  { %3956 = vmatprep.subr.bf16.mxu0 %v3955_v36  ;;  %4056 = vmatprep.subr.bf16.mxu1 %v4055_v29  ;;  %v645_v36 = vld [vmem:[#allocation7 + $0x400] sm:$0xff]  ;;  %v3965_v20 = vpack.c.bf16 %v219_v15, %v215_v14  ;;  %v223_v23 = vld [vmem:[#allocation4 + $0x50] sm:$0xff]  ;;  %v3971_v29 = vpack.c.bf16 %v236_v27, %v232_v26  ;;  %v244_v33 = vld [vmem:[#allocation4 + $0xf8] sm:$0xff] }
  0xc1   :  { %v4061_v38 = vpack.c.bf16 %v653_v37, %v645_v36  ;;  %v227_v24 = vld [vmem:[#allocation4 + $0x70] sm:$0xff] }
  0xc2   :  { %v3969_v28 = vpack.c.bf16 %v227_v24, %v223_v23  ;;  %v231_v30 = vld [vmem:[#allocation4 + $0x90] sm:$0xff]  ;;  %v316_v23 = vld [vmem:[#allocation4 + $0x338] sm:$0xff] }
  0xc3   :  { %3958 = vmatpush1.bf16.msra.mxu0 %v3957_v39  ;;  %4058 = vmatpush1.bf16.msra.mxu1 %v4057_v32  ;;  %v662_v39 = vld [vmem:[#allocation7 + $0x488] sm:$0xff]  ;;  %v240_v32 = vld [vmem:[#allocation4 + $0xd8] sm:$0xff] }
  0xc4   :  { %3960 = vmatprep.subr.bf16.mxu0 %v3959_v42  ;;  %4060 = vmatprep.subr.bf16.mxu1 %v4059_v35  ;;  %v4063_v41 = vpack.c.bf16 %v670_v40, %v662_v39  ;;  %v661_v42 = vld [vmem:[#allocation7 + $0x480] sm:$0xff]  ;;  %v235_v31 = vld [vmem:[#allocation4 + $0xb0] sm:$0xff]  ;;  %v3975_v35 = vpack.c.bf16 %v244_v33, %v240_v32  ;;  %v252_v39 = vld [vmem:[#allocation4 + $0x138] sm:$0xff] }
  0xc5   :  { %v4065_v44 = vpack.c.bf16 %v669_v43, %v661_v42  ;;  %v3973_v34 = vpack.c.bf16 %v235_v31, %v231_v30  ;;  %v239_v36 = vld [vmem:[#allocation4 + $0xd0] sm:$0xff]  ;;  %v324_v30 = vld [vmem:[#allocation4 + $0x378] sm:$0xff] }
  0xc6   :  { %v243_v37 = vld [vmem:[#allocation4 + $0xf0] sm:$0xff] }
  0xc7   :  { %3962 = vmatpush1.bf16.msra.mxu0 %v3961_v45  ;;  %4062 = vmatpush1.bf16.msra.mxu1 %v4061_v38  ;;  %v678_v45 = vld [vmem:[#allocation7 + $0x508] sm:$0xff]  ;;  %v248_v38 = vld [vmem:[#allocation4 + $0x118] sm:$0xff]  ;;  %v3977_v40 = vpack.c.bf16 %v243_v37, %v239_v36 }
  0xc8   :  { %3964 = vmatprep.subr.bf16.mxu0 %v3963_v48  ;;  %4064 = vmatprep.subr.bf16.mxu1 %v4063_v41  ;;  %v4067_v47 = vpack.c.bf16 %v686_v46, %v678_v45  ;;  %v677_v48 = vld [vmem:[#allocation7 + $0x500] sm:$0xff]  ;;  %v3979_v41 = vpack.c.bf16 %v252_v39, %v248_v38  ;;  %v247_v42 = vld [vmem:[#allocation4 + $0x110] sm:$0xff]  ;;  %v260_v45 = vld [vmem:[#allocation4 + $0x178] sm:$0xff] }
  0xc9   :  { %v4069_v50 = vpack.c.bf16 %v685_v49, %v677_v48  ;;  %v251_v43 = vld [vmem:[#allocation4 + $0x130] sm:$0xff]  ;;  %v332_v36 = vld [vmem:[#allocation4 + $0x3b8] sm:$0xff] }
  0xca   :  { %v3981_v46 = vpack.c.bf16 %v251_v43, %v247_v42  ;;  %v255_v48 = vld [vmem:[#allocation4 + $0x150] sm:$0xff]  ;;  %v340_v42 = vld [vmem:[#allocation4 + $0x3f8] sm:$0xff] }
  0xcb   :  { %4066 = vmatpush1.bf16.msra.mxu1 %v4065_v44  ;;  %v256_v44 = vld [vmem:[#allocation4 + $0x158] sm:$0xff]  ;;  %v259_v49 = vld [vmem:[#allocation4 + $0x170] sm:$0xff] }
  0xcc   :  { %4068 = vmatprep.subr.bf16.mxu1 %v4067_v47  ;;  %v3983_v47 = vpack.c.bf16 %v260_v45, %v256_v44  ;;  %v3985_v52 = vpack.c.bf16 %v259_v49, %v255_v48  ;;  %v263_v54 = vld [vmem:[#allocation4 + $0x190] sm:$0xff]  ;;  %v528_v48 = vld [vmem:[#allocation7 + $0x58] sm:$0xff] }
  0xcd   :  { %v267_v55 = vld [vmem:[#allocation4 + $0x1b0] sm:$0xff] }
  0xce   :  { %v3989_v58 = vpack.c.bf16 %v267_v55, %v263_v54  ;;  %v271_v60 = vld [vmem:[#allocation4 + $0x1d0] sm:$0xff]  ;;  %v544_v54 = vld [vmem:[#allocation7 + $0xd8] sm:$0xff] }
  0xcf   :  { %4070 = vmatpush1.bf16.msra.mxu1 %v4069_v50  ;;  %v264_v50 = vld [vmem:[#allocation4 + $0x198] sm:$0xff]  ;;  %v275_v61 = vld [vmem:[#allocation4 + $0x1f0] sm:$0xff] }
  0xd0   :  { %4072 = vmatprep.subr.bf16.mxu1 %v4071_v53  ;;  %v3987_v53 = vpack.c.bf16 %v268_v51, %v264_v50  ;;  %v3993_v0 = vpack.c.bf16 %v275_v61, %v271_v60  ;;  %v279_v2 = vld [vmem:[#allocation4 + $0x210] sm:$0xff]  ;;  %v560_v60 = vld [vmem:[#allocation7 + $0x158] sm:$0xff] }
  0xd1   :  { %v283_v3 = vld [vmem:[#allocation4 + $0x230] sm:$0xff] }
  0xd2   :  { %v3997_v6 = vpack.c.bf16 %v283_v3, %v279_v2  ;;  %v295_v14 = vld [vmem:[#allocation4 + $0x290] sm:$0xff]  ;;  %v576_v2 = vld [vmem:[#allocation7 + $0x1d8] sm:$0xff] }
  0xd3   :  { %4074 = vmatpush1.bf16.msra.mxu1 %v4073_v56  ;;  %v272_v56 = vld [vmem:[#allocation4 + $0x1d8] sm:$0xff]  ;;  %v299_v15 = vld [vmem:[#allocation4 + $0x2b0] sm:$0xff] }
  0xd4   :  { %4076 = vmatprep.subr.bf16.mxu1 %v4075_v59  ;;  %v3991_v59 = vpack.c.bf16 %v276_v57, %v272_v56  ;;  %v4005_v18 = vpack.c.bf16 %v299_v15, %v295_v14  ;;  %v311_v27 = vld [vmem:[#allocation4 + $0x310] sm:$0xff] }
  0xd5   :  { %v319_v33 = vld [vmem:[#allocation4 + $0x350] sm:$0xff] }
  0xd6   :  { %v327_v39 = vld [vmem:[#allocation4 + $0x390] sm:$0xff] }
  0xd7   :  { %4078 = vmatpush1.bf16.msra.mxu1 %v4077_v62  ;;  %v280_v62 = vld [vmem:[#allocation4 + $0x218] sm:$0xff]  ;;  %v335_v45 = vld [vmem:[#allocation4 + $0x3d0] sm:$0xff] }
  0xd8   :  { %4080 = vmatprep.subr.bf16.mxu1 %v4079_v1  ;;  %v3995_v1 = vpack.c.bf16 %v284_v63, %v280_v62  ;;  %v519_v51 = vld [vmem:[#allocation7 + $0x10] sm:$0xff] }
  0xd9   :  { %v535_v57 = vld [vmem:[#allocation7 + $0x90] sm:$0xff] }
  0xda   :  { %v551_v63 = vld [vmem:[#allocation7 + $0x110] sm:$0xff] }
  0xdb   :  { %4082 = vmatpush1.bf16.msra.mxu1 %v4081_v4  ;;  %v288_v4 = vld [vmem:[#allocation4 + $0x258] sm:$0xff] }
  0xdc   :  { %4084 = vmatprep.subr.bf16.mxu1 %v4083_v8  ;;  %v287_v8 = vld [vmem:[#allocation4 + $0x250] sm:$0xff] }
 0x15d   :  { %v202_v10 = vpop.f32.mrb[0].mxu0 }
 0x15e   :  { %v203_v11 = vadd.f32 %v202_v10, %v130_v7  ;;  %v204_v12 = vpop.f32.mrb[1].mxu0  ;;  %v3999_v7 = vpack.c.bf16 %v292_v5, %v288_v4  ;;  %v296_v10 = vld [vmem:[#allocation4 + $0x298] sm:$0xff] }
 0x15f   :  { %v205_v13 = vadd.f32 %v204_v12, %v131_v9  ;;  %v291_v9 = vld [vmem:[#allocation4 + $0x270] sm:$0xff] }
 0x160   :  { %v209_v16 = vmul.f32 0.2, %v203_v11  ;;  %vm207_vm1 = vcmp.gt.f32.partialorder %v203_v11, 0.0  ;;  %v4001_v12 = vpack.c.bf16 %v291_v9, %v287_v8  ;;  %v567_v5 = vld [vmem:[#allocation7 + $0x190] sm:$0xff]  ;;  %v592_v8 = vld [vmem:[#allocation7 + $0x258] sm:$0xff] }
 0x161   :  { %v210_v19 = vmul.f32 0.2, %v205_v13  ;;  %vm208_vm2 = vcmp.gt.f32.partialorder %v205_v13, 0.0 }
 0x162   :  { %v5827_v25 = vsel %vm207_vm1, %v203_v11, %v209_v16  ;;  %v300_v11 = vld [vmem:[#allocation4 + $0x2b8] sm:$0xff] }
 0x163   :  { %v212_v21 = vsel %vm208_vm2, %v205_v13, %v210_v19  ;;  %v4003_v13 = vpack.c.bf16 %v300_v11, %v296_v10  ;;  %v304_v16 = vld [vmem:[#allocation4 + $0x2d8] sm:$0xff] }
 0x164   :  { %427 = vmatprep.mubr.f32.mxu0 %v212_v21  ;;  %v4007_v19 = vpack.c.bf16 %v308_v17, %v304_v16  ;;  %v583_v10 = vld [vmem:[#allocation7 + $0x210] sm:$0xff] }
 0x165   :  { %428 = vmatmul.mubr.f32.vlgmr.msra.gmra.mrb[2].mxu0 %v5827_v25  ;;  %v591_v11 = vld [vmem:[#allocation7 + $0x250] sm:$0xff] }
 0x166   :  { %3966 = vmatpush1.bf16.msra.mxu0 %v3965_v20  ;;  %498 = vmatprep.mubr.f32.mxu0 %v212_v21  ;;  %v303_v20 = vld [vmem:[#allocation4 + $0x2d0] sm:$0xff]  ;;  %v4173_v14 = vpack.c.bf16 %v591_v11, %v583_v10 }
 0x167   :  { %3968 = vmatprep.subr.bf16.mxu0 %v3967_v22  ;;  %v307_v21 = vld [vmem:[#allocation4 + $0x2f0] sm:$0xff]  ;;  %v312_v22 = vld [vmem:[#allocation4 + $0x318] sm:$0xff] }
 0x168   :  { %v4009_v24 = vpack.c.bf16 %v307_v21, %v303_v20  ;;  %v4011_v26 = vpack.c.bf16 %v316_v23, %v312_v22  ;;  %v599_v16 = vld [vmem:[#allocation7 + $0x290] sm:$0xff]  ;;  %v741_v21 = vld [vmem:[#allocation7 + $0x700] sm:$0xff] }
 0x169   :  { %v607_v17 = vld [vmem:[#allocation7 + $0x2d0] sm:$0xff]  ;;  %v749_v22 = vld [vmem:[#allocation7 + $0x740] sm:$0xff] }
 0x16a   :  { %3970 = vmatpush1.bf16.msra.mxu0 %v3969_v28  ;;  %v315_v28 = vld [vmem:[#allocation4 + $0x330] sm:$0xff]  ;;  %v4177_v20 = vpack.c.bf16 %v607_v17, %v599_v16 }
 0x16b   :  { %3972 = vmatprep.subr.bf16.mxu0 %v3971_v29  ;;  %v320_v29 = vld [vmem:[#allocation4 + $0x358] sm:$0xff]  ;;  %v4013_v31 = vpack.c.bf16 %v315_v28, %v311_v27  ;;  %v4085_v27 = vpack.c.bf16 %v749_v22, %v741_v21 }
 0x16c   :  { %v4015_v32 = vpack.c.bf16 %v324_v30, %v320_v29  ;;  %v632_v28 = vld [vmem:[#allocation7 + $0x398] sm:$0xff]  ;;  %v758_v30 = vld [vmem:[#allocation7 + $0x788] sm:$0xff] }
 0x16d   :  { %v640_v29 = vld [vmem:[#allocation7 + $0x3d8] sm:$0xff]  ;;  %4086 = vmatpush1.bf16.msra.mxu1 %v4085_v27 }
 0x16e   :  { %3974 = vmatpush1.bf16.msra.mxu0 %v3973_v34  ;;  %v323_v34 = vld [vmem:[#allocation4 + $0x370] sm:$0xff]  ;;  %v768_v21 = vld [vmem:[#allocation7 + $0x7d8] sm:$0xff] }
 0x16f   :  { %3976 = vmatprep.subr.bf16.mxu0 %v3975_v35  ;;  %v328_v35 = vld [vmem:[#allocation4 + $0x398] sm:$0xff]  ;;  %v4017_v37 = vpack.c.bf16 %v323_v34, %v319_v33  ;;  %v757_v34 = vld [vmem:[#allocation7 + $0x780] sm:$0xff] }
 0x170   :  { %v4019_v38 = vpack.c.bf16 %v332_v36, %v328_v35  ;;  %v765_v35 = vld [vmem:[#allocation7 + $0x7c0] sm:$0xff]  ;;  %v4183_v36 = vpack.c.bf16 %v640_v29, %v632_v28  ;;  %v776_v27 = vld [vmem:[#allocation7 + $0x818] sm:$0xff] }
 0x171   :  { %v784_v28 = vld [vmem:[#allocation7 + $0x858] sm:$0xff] }
 0x172   :  { %3978 = vmatpush1.bf16.msra.mxu0 %v3977_v40  ;;  %v331_v40 = vld [vmem:[#allocation4 + $0x3b0] sm:$0xff] }
 0x173   :  { %3980 = vmatprep.subr.bf16.mxu0 %v3979_v41  ;;  %v336_v41 = vld [vmem:[#allocation4 + $0x3d8] sm:$0xff]  ;;  %v4021_v43 = vpack.c.bf16 %v331_v40, %v327_v39  ;;  %v4089_v39 = vpack.c.bf16 %v765_v35, %v757_v34  ;;  %v5836_v34 = vld [vmem:[#allocation6] sm:$0xf] }
 0x174   :  { %v4023_v44 = vpack.c.bf16 %v340_v42, %v336_v41  ;;  %v648_v40 = vld [vmem:[#allocation7 + $0x418] sm:$0xff]  ;;  %v774_v42 = vld [vmem:[#allocation7 + $0x808] sm:$0xff] }
 0x175   :  { %v656_v41 = vld [vmem:[#allocation7 + $0x458] sm:$0xff] }
 0x176   :  { %3982 = vmatpush1.bf16.msra.mxu0 %v3981_v46  ;;  %v339_v46 = vld [vmem:[#allocation4 + $0x3f0] sm:$0xff] }
 0x177   :  { %3984 = vmatprep.subr.bf16.mxu0 %v3983_v47  ;;  %v520_v47 = vld [vmem:[#allocation7 + $0x18] sm:$0xff]  ;;  %v4025_v49 = vpack.c.bf16 %v339_v46, %v335_v45  ;;  %v4187_v46 = vpack.c.bf16 %v656_v41, %v648_v40  ;;  %v773_v41 = vld [vmem:[#allocation7 + $0x800] sm:$0xff] }
 0x178   :  { %v4155_v50 = vpack.c.bf16 %v528_v48, %v520_v47  ;;  %v647_v47 = vld [vmem:[#allocation7 + $0x410] sm:$0xff] }
 0x179   :  { %v655_v48 = vld [vmem:[#allocation7 + $0x450] sm:$0xff] }
 0x17a   :  { %3986 = vmatpush1.bf16.msra.mxu0 %v3985_v52  ;;  %v527_v52 = vld [vmem:[#allocation7 + $0x50] sm:$0xff] }
 0x17b   :  { %3988 = vmatprep.subr.bf16.mxu0 %v3987_v53  ;;  %v536_v53 = vld [vmem:[#allocation7 + $0x98] sm:$0xff]  ;;  %v4157_v55 = vpack.c.bf16 %v527_v52, %v519_v51  ;;  %v4189_v51 = vpack.c.bf16 %v655_v48, %v647_v47  ;;  %v798_v48 = vld [vmem:[#allocation7 + $0x8c8] sm:$0xff] }
 0x17c   :  { %v4159_v56 = vpack.c.bf16 %v544_v54, %v536_v53  ;;  %v663_v53 = vld [vmem:[#allocation7 + $0x490] sm:$0xff] }
 0x17d   :  { %v671_v54 = vld [vmem:[#allocation7 + $0x4d0] sm:$0xff] }
 0x17e   :  { %3990 = vmatpush1.bf16.msra.mxu0 %v3989_v58  ;;  %v543_v58 = vld [vmem:[#allocation7 + $0xd0] sm:$0xff] }
 0x17f   :  { %3992 = vmatprep.subr.bf16.mxu0 %v3991_v59  ;;  %v552_v59 = vld [vmem:[#allocation7 + $0x118] sm:$0xff]  ;;  %v4161_v61 = vpack.c.bf16 %v543_v58, %v535_v57  ;;  %v4193_v57 = vpack.c.bf16 %v671_v54, %v663_v53  ;;  %v789_v54 = vld [vmem:[#allocation7 + $0x880] sm:$0xff] }
 0x180   :  { %v4163_v62 = vpack.c.bf16 %v560_v60, %v552_v59  ;;  %v679_v59 = vld [vmem:[#allocation7 + $0x510] sm:$0xff] }
 0x181   :  { %v687_v60 = vld [vmem:[#allocation7 + $0x550] sm:$0xff] }
 0x182   :  { %3994 = vmatpush1.bf16.msra.mxu0 %v3993_v0  ;;  %v559_v0 = vld [vmem:[#allocation7 + $0x150] sm:$0xff] }
 0x183   :  { %3996 = vmatprep.subr.bf16.mxu0 %v3995_v1  ;;  %v568_v1 = vld [vmem:[#allocation7 + $0x198] sm:$0xff]  ;;  %v4165_v3 = vpack.c.bf16 %v559_v0, %v551_v63  ;;  %v4197_v63 = vpack.c.bf16 %v687_v60, %v679_v59  ;;  %v791_v59 = vld [vmem:[#allocation7 + $0x890] sm:$0xff] }
 0x184   :  { %v4167_v4 = vpack.c.bf16 %v576_v2, %v568_v1  ;;  %v695_v1 = vld [vmem:[#allocation7 + $0x590] sm:$0xff] }
 0x185   :  { %v703_v2 = vld [vmem:[#allocation7 + $0x5d0] sm:$0xff] }
 0x186   :  { %3998 = vmatpush1.bf16.msra.mxu0 %v3997_v6  ;;  %v575_v6 = vld [vmem:[#allocation7 + $0x1d0] sm:$0xff] }
 0x187   :  { %4000 = vmatprep.subr.bf16.mxu0 %v3999_v7  ;;  %v584_v7 = vld [vmem:[#allocation7 + $0x218] sm:$0xff]  ;;  %v4169_v9 = vpack.c.bf16 %v575_v6, %v567_v5  ;;  %v4201_v5 = vpack.c.bf16 %v703_v2, %v695_v1  ;;  %v799_v60 = vld [vmem:[#allocation7 + $0x8d0] sm:$0xff] }
 0x188   :  { %v816_v1 = vld [vmem:[#allocation7 + $0x958] sm:$0xff] }
 0x18a   :  { %4002 = vmatpush1.bf16.msra.mxu0 %v4001_v12  ;;  %v600_v12 = vld [vmem:[#allocation7 + $0x298] sm:$0xff] }
 0x18b   :  { %4004 = vmatprep.subr.bf16.mxu0 %v4003_v13  ;;  %v608_v13 = vld [vmem:[#allocation7 + $0x2d8] sm:$0xff] }
 0x18c   :  { %v4175_v15 = vpack.c.bf16 %v608_v13, %v600_v12  ;;  %v727_v12 = vld [vmem:[#allocation7 + $0x690] sm:$0xff] }
 0x18d   :  { %v735_v13 = vld [vmem:[#allocation7 + $0x6d0] sm:$0xff] }
 0x18e   :  { %4006 = vmatpush1.bf16.msra.mxu0 %v4005_v18  ;;  %v616_v18 = vld [vmem:[#allocation7 + $0x318] sm:$0xff]  ;;  %v4209_v16 = vpack.c.bf16 %v735_v13, %v727_v12 }
 0x18f   :  { %4008 = vmatprep.subr.bf16.mxu0 %v4007_v19  ;;  %v624_v19 = vld [vmem:[#allocation7 + $0x358] sm:$0xff] }
 0x190   :  { %v4179_v23 = vpack.c.bf16 %v624_v19, %v616_v18  ;;  %v743_v18 = vld [vmem:[#allocation7 + $0x710] sm:$0xff]  ;;  %v832_v12 = vld [vmem:[#allocation7 + $0x9d8] sm:$0xff] }
 0x191   :  { %v751_v19 = vld [vmem:[#allocation7 + $0x750] sm:$0xff] }
 0x192   :  { %4010 = vmatpush1.bf16.msra.mxu0 %v4009_v24  ;;  %v615_v24 = vld [vmem:[#allocation7 + $0x310] sm:$0xff]  ;;  %v4213_v22 = vpack.c.bf16 %v751_v19, %v743_v18 }
 0x193   :  { %4012 = vmatprep.subr.bf16.mxu0 %v4011_v26  ;;  %v623_v26 = vld [vmem:[#allocation7 + $0x350] sm:$0xff] }
 0x194   :  { %v823_v19 = vld [vmem:[#allocation7 + $0x990] sm:$0xff] }
 0x196   :  { %4014 = vmatpush1.bf16.msra.mxu0 %v4013_v31  ;;  %v766_v31 = vld [vmem:[#allocation7 + $0x7c8] sm:$0xff] }
 0x197   :  { %4016 = vmatprep.subr.bf16.mxu0 %v4015_v32  ;;  %v4181_v32 = vpack.c.bf16 %v623_v26, %v615_v24  ;;  %v4087_v33 = vpack.c.bf16 %v766_v31, %v758_v30  ;;  %v759_v24 = vld [vmem:[#allocation7 + $0x790] sm:$0xff]  ;;  %v4219_v30 = vpack.c.bf16 %v784_v28, %v776_v27  ;;  %v343_v31 = vlaneseq  ;;  %v837_v28 = vld [vmem:[#allocation7 + $0xa00] sm:$0xff] }
 0x198   :  { %v767_v26 = vld [vmem:[#allocation7 + $0x7d0] sm:$0xff] }
 0x199   :  { %4088 = vmatprep.subr.bf16.mxu1 %v4087_v33  ;;  %v4217_v29 = vpack.c.bf16 %v767_v26, %v759_v24  ;;  %v848_v24 = vld [vmem:[#allocation7 + $0xa58] sm:$0xff] }
 0x19a   :  { %4018 = vmatpush1.bf16.msra.mxu0 %v4017_v37  ;;  %v631_v37 = vld [vmem:[#allocation7 + $0x390] sm:$0xff]  ;;  %4090 = vmatpush1.bf16.msra.mxu1 %v4089_v39 }
 0x19b   :  { %4020 = vmatprep.subr.bf16.mxu0 %v4019_v38  ;;  %v639_v38 = vld [vmem:[#allocation7 + $0x3d0] sm:$0xff] }
 0x19e   :  { %4022 = vmatpush1.bf16.msra.mxu0 %v4021_v43  ;;  %v782_v43 = vld [vmem:[#allocation7 + $0x848] sm:$0xff] }
 0x19f   :  { %4024 = vmatprep.subr.bf16.mxu0 %v4023_v44  ;;  %v4185_v44 = vpack.c.bf16 %v639_v38, %v631_v37  ;;  %v4091_v45 = vpack.c.bf16 %v782_v43, %v774_v42  ;;  %v781_v42 = vld [vmem:[#allocation7 + $0x840] sm:$0xff] }
 0x1a1   :  { %4092 = vmatprep.subr.bf16.mxu1 %v4091_v45  ;;  %v783_v45 = vld [vmem:[#allocation7 + $0x850] sm:$0xff] }
 0x1a2   :  { %4026 = vmatpush1.bf16.msra.mxu0 %v4025_v49  ;;  %v664_v49 = vld [vmem:[#allocation7 + $0x498] sm:$0xff] }
 0x1a3   :  { %4156 = vmatprep.subr.bf16.mxu0 %v4155_v50  ;;  %v672_v50 = vld [vmem:[#allocation7 + $0x4d8] sm:$0xff] }
 0x1a4   :  { %v4191_v52 = vpack.c.bf16 %v672_v50, %v664_v49  ;;  %v792_v49 = vld [vmem:[#allocation7 + $0x898] sm:$0xff] }
 0x1a5   :  { %499 = vmatmul.mubr.f32.vlgmr.msra.gmra.mrb[4].mxu0 %v5827_v25  ;;  %v4171_v25 = vpack.c.bf16 %v592_v8, %v584_v7  ;;  %v711_v7 = vld [vmem:[#allocation7 + $0x610] sm:$0xff]  ;;  %v800_v50 = vld [vmem:[#allocation7 + $0x8d8] sm:$0xff] }
 0x1a6   :  { %4158 = vmatpush1.bf16.msra.mxu0 %v4157_v55  ;;  %v680_v55 = vld [vmem:[#allocation7 + $0x518] sm:$0xff]  ;;  %v719_v8 = vld [vmem:[#allocation7 + $0x650] sm:$0xff] }
 0x1a7   :  { %4160 = vmatprep.subr.bf16.mxu0 %v4159_v56  ;;  %v688_v56 = vld [vmem:[#allocation7 + $0x558] sm:$0xff]  ;;  %v4205_v10 = vpack.c.bf16 %v719_v8, %v711_v7  ;;  %v807_v8 = vld [vmem:[#allocation7 + $0x910] sm:$0xff] }
 0x1a8   :  { %v4195_v58 = vpack.c.bf16 %v688_v56, %v680_v55  ;;  %v797_v55 = vld [vmem:[#allocation7 + $0x8c0] sm:$0xff] }
 0x1a9   :  { %v4097_v2 = vpack.c.bf16 %v797_v55, %v789_v54 }
 0x1aa   :  { %4162 = vmatpush1.bf16.msra.mxu0 %v4161_v61  ;;  %v696_v61 = vld [vmem:[#allocation7 + $0x598] sm:$0xff] }
 0x1ab   :  { %4164 = vmatprep.subr.bf16.mxu0 %v4163_v62  ;;  %v704_v62 = vld [vmem:[#allocation7 + $0x5d8] sm:$0xff] }
 0x1ac   :  { %v4199_v0 = vpack.c.bf16 %v704_v62, %v696_v61  ;;  %v806_v61 = vld [vmem:[#allocation7 + $0x908] sm:$0xff] }
 0x1ae   :  { %4166 = vmatpush1.bf16.msra.mxu0 %v4165_v3  ;;  %v712_v3 = vld [vmem:[#allocation7 + $0x618] sm:$0xff] }
 0x1af   :  { %4168 = vmatprep.subr.bf16.mxu0 %v4167_v4  ;;  %v720_v4 = vld [vmem:[#allocation7 + $0x658] sm:$0xff] }
 0x1b0   :  { %v4203_v6 = vpack.c.bf16 %v720_v4, %v712_v3  ;;  %v4225_v3 = vpack.c.bf16 %v799_v60, %v791_v59  ;;  %v805_v4 = vld [vmem:[#allocation7 + $0x900] sm:$0xff] }
 0x1b2   :  { %4170 = vmatpush1.bf16.msra.mxu0 %v4169_v9  ;;  %v728_v9 = vld [vmem:[#allocation7 + $0x698] sm:$0xff] }
 0x1b3   :  { %4172 = vmatprep.subr.bf16.mxu0 %v4171_v25  ;;  %v736_v25 = vld [vmem:[#allocation7 + $0x6d8] sm:$0xff] }
 0x1b4   :  { %v4207_v11 = vpack.c.bf16 %v736_v25, %v728_v9  ;;  %v815_v9 = vld [vmem:[#allocation7 + $0x950] sm:$0xff]  ;;  %v822_v25 = vld [vmem:[#allocation7 + $0x988] sm:$0xff] }
 0x1b6   :  { %4174 = vmatpush1.bf16.msra.mxu0 %v4173_v14  ;;  %v744_v14 = vld [vmem:[#allocation7 + $0x718] sm:$0xff] }
 0x1b7   :  { %4176 = vmatprep.subr.bf16.mxu0 %v4175_v15  ;;  %v752_v15 = vld [vmem:[#allocation7 + $0x758] sm:$0xff] }
 0x1b8   :  { %v4211_v17 = vpack.c.bf16 %v752_v15, %v744_v14  ;;  %v4229_v14 = vpack.c.bf16 %v815_v9, %v807_v8  ;;  %v821_v15 = vld [vmem:[#allocation7 + $0x980] sm:$0xff] }
 0x1ba   :  { %4178 = vmatpush1.bf16.msra.mxu0 %v4177_v20  ;;  %v760_v20 = vld [vmem:[#allocation7 + $0x798] sm:$0xff] }
 0x1bb   :  { %4180 = vmatprep.subr.bf16.mxu0 %v4179_v23  ;;  %v4215_v23 = vpack.c.bf16 %v768_v21, %v760_v20  ;;  %v831_v20 = vld [vmem:[#allocation7 + $0x9d0] sm:$0xff]  ;;  %v838_v21 = vld [vmem:[#allocation7 + $0xa08] sm:$0xff] }
 0x1bc   :  { %v4233_v27 = vpack.c.bf16 %v831_v20, %v823_v19 }
 0x1be   :  { %4182 = vmatpush1.bf16.msra.mxu0 %v4181_v32  ;;  %v5831_v32 = vshrl.u32 %v343_v31, 7 }
 0x1bf   :  { %4184 = vmatprep.subr.bf16.mxu0 %v4183_v36 }
 0x1c0   :  { %v5834_v33 = vsub.s32 0, %v5831_v32  ;;  %v5839_v35 = vsub.s32 1, %v5831_v32 }
 0x1c2   :  { %4186 = vmatpush1.bf16.msra.mxu0 %v4185_v44  ;;  %v346_v36 = vrot.slane %v5836_v34, %v5834_v33  ;;  %v350_v37 = vrot.slane %v5836_v34, %v5839_v35  ;;  %v775_v44 = vld [vmem:[#allocation7 + $0x810] sm:$0xff] }
 0x1c3   :  { %4188 = vmatprep.subr.bf16.mxu0 %v4187_v46  ;;  %v790_v46 = vld [vmem:[#allocation7 + $0x888] sm:$0xff]  ;;  %v4221_v53 = vpack.c.bf16 %v783_v45, %v775_v44  ;;  %v853_v44 = vld [vmem:[#allocation7 + $0xa80] sm:$0xff] }
 0x1c4   :  { %v861_v45 = vld [vmem:[#allocation7 + $0xac0] sm:$0xff] }
 0x1c5   :  { %v4113_v54 = vpack.c.bf16 %v861_v45, %v853_v44 }
 0x1c6   :  { %4190 = vmatpush1.bf16.msra.mxu0 %v4189_v51 }
 0x1c7   :  { %4192 = vmatprep.subr.bf16.mxu0 %v4191_v52  ;;  %v4093_v52 = vpack.c.bf16 %v781_v42, %v773_v41  ;;  %v864_v41 = vld [vmem:[#allocation7 + $0xad8] sm:$0xff] }
 0x1ca   :  { %4194 = vmatpush1.bf16.msra.mxu0 %v4193_v57  ;;  %v4095_v57 = vpack.c.bf16 %v798_v48, %v790_v46  ;;  %v855_v48 = vld [vmem:[#allocation7 + $0xa90] sm:$0xff] }
 0x1cb   :  { %4196 = vmatprep.subr.bf16.mxu0 %v4195_v58  ;;  %v4223_v58 = vpack.c.bf16 %v800_v50, %v792_v49  ;;  %v863_v49 = vld [vmem:[#allocation7 + $0xad0] sm:$0xff]  ;;  %v870_v50 = vld [vmem:[#allocation7 + $0xb08] sm:$0xff] }
 0x1cc   :  { %v4241_v55 = vpack.c.bf16 %v863_v49, %v855_v48 }
 0x1ce   :  { %4198 = vmatpush1.bf16.msra.mxu0 %v4197_v63  ;;  %v814_v63 = vld [vmem:[#allocation7 + $0x948] sm:$0xff] }
 0x1cf   :  { %4200 = vmatprep.subr.bf16.mxu0 %v4199_v0  ;;  %v808_v0 = vld [vmem:[#allocation7 + $0x918] sm:$0xff] }
 0x1d0   :  { %v4227_v7 = vpack.c.bf16 %v816_v1, %v808_v0  ;;  %v886_v0 = vld [vmem:[#allocation7 + $0xb88] sm:$0xff] }
 0x1d1   :  { %v894_v1 = vld [vmem:[#allocation7 + $0xbc8] sm:$0xff] }
 0x1d2   :  { %4202 = vmatpush1.bf16.msra.mxu0 %v4201_v5  ;;  %v813_v5 = vld [vmem:[#allocation7 + $0x940] sm:$0xff]  ;;  %v4119_v8 = vpack.c.bf16 %v894_v1, %v886_v0  ;;  %v951_v0 = vld [vmem:[#allocation7 + $0xd90] sm:$0xff] }
 0x1d3   :  { %4204 = vmatprep.subr.bf16.mxu0 %v4203_v6  ;;  %v4099_v6 = vpack.c.bf16 %v814_v63, %v806_v61  ;;  %v4101_v13 = vpack.c.bf16 %v813_v5, %v805_v4  ;;  %v871_v61 = vld [vmem:[#allocation7 + $0xb10] sm:$0xff] }
 0x1d4   :  { %v879_v63 = vld [vmem:[#allocation7 + $0xb50] sm:$0xff] }
 0x1d5   :  { %v4245_v5 = vpack.c.bf16 %v879_v63, %v871_v61  ;;  %v959_v1 = vld [vmem:[#allocation7 + $0xdd0] sm:$0xff] }
 0x1d6   :  { %4206 = vmatpush1.bf16.msra.mxu0 %v4205_v10  ;;  %v830_v10 = vld [vmem:[#allocation7 + $0x9c8] sm:$0xff] }
 0x1d7   :  { %4208 = vmatprep.subr.bf16.mxu0 %v4207_v11  ;;  %v824_v11 = vld [vmem:[#allocation7 + $0x998] sm:$0xff] }
 0x1d8   :  { %v4231_v18 = vpack.c.bf16 %v832_v12, %v824_v11  ;;  %v902_v11 = vld [vmem:[#allocation7 + $0xc08] sm:$0xff] }
 0x1d9   :  { %v910_v12 = vld [vmem:[#allocation7 + $0xc48] sm:$0xff] }
 0x1da   :  { %4210 = vmatpush1.bf16.msra.mxu0 %v4209_v16  ;;  %v829_v16 = vld [vmem:[#allocation7 + $0x9c0] sm:$0xff]  ;;  %v4123_v19 = vpack.c.bf16 %v910_v12, %v902_v11  ;;  %v967_v11 = vld [vmem:[#allocation7 + $0xe10] sm:$0xff] }
 0x1db   :  { %4212 = vmatprep.subr.bf16.mxu0 %v4211_v17  ;;  %v4103_v17 = vpack.c.bf16 %v830_v10, %v822_v25  ;;  %v4105_v26 = vpack.c.bf16 %v829_v16, %v821_v15  ;;  %v887_v25 = vld [vmem:[#allocation7 + $0xb90] sm:$0xff] }
 0x1dc   :  { %v895_v10 = vld [vmem:[#allocation7 + $0xbd0] sm:$0xff] }
 0x1dd   :  { %v4249_v16 = vpack.c.bf16 %v895_v10, %v887_v25  ;;  %v975_v12 = vld [vmem:[#allocation7 + $0xe50] sm:$0xff] }
 0x1de   :  { %4214 = vmatpush1.bf16.msra.mxu0 %v4213_v22  ;;  %v846_v22 = vld [vmem:[#allocation7 + $0xa48] sm:$0xff] }
 0x1df   :  { %4216 = vmatprep.subr.bf16.mxu0 %v4215_v23  ;;  %v840_v23 = vld [vmem:[#allocation7 + $0xa18] sm:$0xff] }
 0x1e0   :  { %v4235_v31 = vpack.c.bf16 %v848_v24, %v840_v23  ;;  %v918_v23 = vld [vmem:[#allocation7 + $0xc88] sm:$0xff] }
 0x1e1   :  { %v926_v24 = vld [vmem:[#allocation7 + $0xcc8] sm:$0xff] }
 0x1e2   :  { %4218 = vmatpush1.bf16.msra.mxu0 %v4217_v29  ;;  %v845_v29 = vld [vmem:[#allocation7 + $0xa40] sm:$0xff] }
 0x1e3   :  { %4220 = vmatprep.subr.bf16.mxu0 %v4219_v30  ;;  %v4107_v30 = vpack.c.bf16 %v846_v22, %v838_v21  ;;  %v4109_v42 = vpack.c.bf16 %v845_v29, %v837_v28  ;;  %v903_v21 = vld [vmem:[#allocation7 + $0xc10] sm:$0xff] }
 0x1e4   :  { %v911_v22 = vld [vmem:[#allocation7 + $0xc50] sm:$0xff] }
 0x1e5   :  { %v4253_v29 = vpack.c.bf16 %v911_v22, %v903_v21 }
 0x238   :  { %v429_v38 = vpop.f32.mrb[2].mxu0 }
 0x239   :  { %v430_v39 = vadd.f32 %v429_v38, %v346_v36  ;;  %v431_v40 = vpop.f32.mrb[3].mxu0  ;;  %v839_v36 = vld [vmem:[#allocation7 + $0xa10] sm:$0xff]  ;;  %v854_v38 = vld [vmem:[#allocation7 + $0xa88] sm:$0xff] }
 0x23a   :  { %v432_v43 = vadd.f32 %v431_v40, %v350_v37  ;;  %v847_v37 = vld [vmem:[#allocation7 + $0xa50] sm:$0xff]  ;;  %v856_v40 = vld [vmem:[#allocation7 + $0xa98] sm:$0xff] }
 0x23b   :  { %v509_v47 = vmul.f32 0.2, %v430_v39  ;;  %vm505_vm3 = vcmp.gt.f32.partialorder %v430_v39, 0.0 }
 0x23c   :  { %vm506_vm4 = vcmp.gt.f32.partialorder %v432_v43, 0.0  ;;  %v510_v51 = vmul.f32 0.2, %v432_v43 }
 0x23d   :  { %v5849_v62 = vsel %vm505_vm3, %v430_v39, %v509_v47  ;;  %v862_v39 = vld [vmem:[#allocation7 + $0xac8] sm:$0xff]  ;;  %v4239_v47 = vpack.c.bf16 %v864_v41, %v856_v40 }
 0x23e   :  { %v5845_v56 = vsel %vm506_vm4, %v432_v43, %v510_v51  ;;  %v4237_v43 = vpack.c.bf16 %v847_v37, %v839_v36  ;;  %v4111_v46 = vpack.c.bf16 %v862_v39, %v854_v38  ;;  %v878_v51 = vld [vmem:[#allocation7 + $0xb48] sm:$0xff]  ;;  %v4127_v36 = vpack.c.bf16 %v926_v24, %v918_v23  ;;  %v919_v38 = vld [vmem:[#allocation7 + $0xc90] sm:$0xff] }
 0x23f   :  { %1135 = vmatprep.mubr.f32.mxu1 %v5845_v56  ;;  %1277 = vmatprep.mubr.f32.mxu0 %v5845_v56  ;;  %v4115_v59 = vpack.c.bf16 %v878_v51, %v870_v50  ;;  %v927_v39 = vld [vmem:[#allocation7 + $0xcd0] sm:$0xff]  ;;  %v934_v40 = vld [vmem:[#allocation7 + $0xd08] sm:$0xff] }
 0x240   :  { %1136 = vmatmul.mubr.f32.vlgmr.msra.gmra.mrb[0].mxu1 %v5849_v62  ;;  %1278 = vmatmul.mubr.f32.vlgmr.msra.gmra.mrb[6].mxu0 %v5849_v62  ;;  %v942_v41 = vld [vmem:[#allocation7 + $0xd48] sm:$0xff]  ;;  %v4257_v45 = vpack.c.bf16 %v927_v39, %v919_v38  ;;  %v935_v50 = vld [vmem:[#allocation7 + $0xd10] sm:$0xff]  ;;  %v1005_v38 = vld [vmem:[#allocation7 + $0xf40] sm:$0xff] }
 0x241   :  { %4094 = vmatpush1.bf16.msra.mxu1 %v4093_v52  ;;  %4222 = vmatpush1.bf16.msra.mxu0 %v4221_v53  ;;  %v872_v52 = vld [vmem:[#allocation7 + $0xb18] sm:$0xff]  ;;  %v4131_v48 = vpack.c.bf16 %v942_v41, %v934_v40  ;;  %v943_v51 = vld [vmem:[#allocation7 + $0xd50] sm:$0xff]  ;;  %v5857_v41 = vsub.s32 3, %v5831_v32 }
 0x242   :  { %4096 = vmatprep.subr.bf16.mxu1 %v4095_v57  ;;  %4224 = vmatprep.subr.bf16.mxu0 %v4223_v58  ;;  %v880_v53 = vld [vmem:[#allocation7 + $0xb58] sm:$0xff]  ;;  %v869_v57 = vld [vmem:[#allocation7 + $0xb00] sm:$0xff]  ;;  %v983_v23 = vld [vmem:[#allocation7 + $0xe90] sm:$0xff] }
 0x243   :  { %v877_v58 = vld [vmem:[#allocation7 + $0xb40] sm:$0xff]  ;;  %v4243_v60 = vpack.c.bf16 %v880_v53, %v872_v52  ;;  %v950_v52 = vld [vmem:[#allocation7 + $0xd88] sm:$0xff]  ;;  %v991_v24 = vld [vmem:[#allocation7 + $0xed0] sm:$0xff] }
 0x244   :  { %v4117_v4 = vpack.c.bf16 %v877_v58, %v869_v57  ;;  %v958_v53 = vld [vmem:[#allocation7 + $0xdc8] sm:$0xff]  ;;  %v4261_v58 = vpack.c.bf16 %v943_v51, %v935_v50  ;;  %v1013_v51 = vld [vmem:[#allocation7 + $0xf80] sm:$0xff] }
 0x245   :  { %4098 = vmatpush1.bf16.msra.mxu1 %v4097_v2  ;;  %4226 = vmatpush1.bf16.msra.mxu0 %v4225_v3  ;;  %v888_v2 = vld [vmem:[#allocation7 + $0xb98] sm:$0xff]  ;;  %v4135_v61 = vpack.c.bf16 %v958_v53, %v950_v52  ;;  %v1021_v52 = vld [vmem:[#allocation7 + $0xfc0] sm:$0xff]  ;;  %v358_v53 = vrot.slane %v5836_v34, %v5857_v41 }
 0x246   :  { %4100 = vmatprep.subr.bf16.mxu1 %v4099_v6  ;;  %4228 = vmatprep.subr.bf16.mxu0 %v4227_v7  ;;  %v896_v3 = vld [vmem:[#allocation7 + $0xbd8] sm:$0xff]  ;;  %v885_v6 = vld [vmem:[#allocation7 + $0xb80] sm:$0xff] }
 0x247   :  { %v893_v7 = vld [vmem:[#allocation7 + $0xbc0] sm:$0xff]  ;;  %v4247_v9 = vpack.c.bf16 %v896_v3, %v888_v2  ;;  %v966_v2 = vld [vmem:[#allocation7 + $0xe08] sm:$0xff] }
 0x248   :  { %v4121_v15 = vpack.c.bf16 %v893_v7, %v885_v6  ;;  %v974_v3 = vld [vmem:[#allocation7 + $0xe48] sm:$0xff]  ;;  %v4265_v7 = vpack.c.bf16 %v959_v1, %v951_v0 }
 0x249   :  { %4102 = vmatpush1.bf16.msra.mxu1 %v4101_v13  ;;  %4230 = vmatpush1.bf16.msra.mxu0 %v4229_v14  ;;  %v904_v13 = vld [vmem:[#allocation7 + $0xc18] sm:$0xff]  ;;  %v4139_v25 = vpack.c.bf16 %v974_v3, %v966_v2  ;;  %v4153_v3 = vpack.c.bf16 %v1021_v52, %v1013_v51  ;;  %v577_v52 = vld [vmem:[#allocation7 + $0x1e0] sm:$0xff] }
 0x24a   :  { %4104 = vmatprep.subr.bf16.mxu1 %v4103_v17  ;;  %4232 = vmatprep.subr.bf16.mxu0 %v4231_v18  ;;  %v912_v14 = vld [vmem:[#allocation7 + $0xc58] sm:$0xff]  ;;  %v901_v17 = vld [vmem:[#allocation7 + $0xc00] sm:$0xff] }
 0x24b   :  { %v909_v18 = vld [vmem:[#allocation7 + $0xc40] sm:$0xff]  ;;  %v4251_v20 = vpack.c.bf16 %v912_v14, %v904_v13  ;;  %v982_v13 = vld [vmem:[#allocation7 + $0xe88] sm:$0xff] }
 0x24c   :  { %v4125_v28 = vpack.c.bf16 %v909_v18, %v901_v17  ;;  %v990_v14 = vld [vmem:[#allocation7 + $0xec8] sm:$0xff]  ;;  %v4269_v18 = vpack.c.bf16 %v975_v12, %v967_v11 }
 0x24d   :  { %4106 = vmatpush1.bf16.msra.mxu1 %v4105_v26  ;;  %4234 = vmatpush1.bf16.msra.mxu0 %v4233_v27  ;;  %v920_v26 = vld [vmem:[#allocation7 + $0xc98] sm:$0xff]  ;;  %v4143_v21 = vpack.c.bf16 %v990_v14, %v982_v13  ;;  %v538_v11 = vld [vmem:[#allocation7 + $0xa8] sm:$0xff] }
 0x24e   :  { %4108 = vmatprep.subr.bf16.mxu1 %v4107_v30  ;;  %4236 = vmatprep.subr.bf16.mxu0 %v4235_v31  ;;  %v928_v27 = vld [vmem:[#allocation7 + $0xcd8] sm:$0xff]  ;;  %v917_v30 = vld [vmem:[#allocation7 + $0xc80] sm:$0xff]  ;;  %v546_v12 = vld [vmem:[#allocation7 + $0xe8] sm:$0xff] }
 0x24f   :  { %v925_v31 = vld [vmem:[#allocation7 + $0xcc0] sm:$0xff]  ;;  %v4255_v37 = vpack.c.bf16 %v928_v27, %v920_v26  ;;  %v998_v26 = vld [vmem:[#allocation7 + $0xf08] sm:$0xff]  ;;  %v540_v14 = vld [vmem:[#allocation7 + $0xb8] sm:$0xff] }
 0x250   :  { %v4129_v44 = vpack.c.bf16 %v925_v31, %v917_v30  ;;  %v1006_v27 = vld [vmem:[#allocation7 + $0xf48] sm:$0xff]  ;;  %v4273_v31 = vpack.c.bf16 %v991_v24, %v983_v23  ;;  %v4287_v23 = vpack.c.bf16 %v546_v12, %v538_v11  ;;  %v601_v11 = vld [vmem:[#allocation7 + $0x2a0] sm:$0xff] }
 0x251   :  { %4110 = vmatpush1.bf16.msra.mxu1 %v4109_v42  ;;  %4238 = vmatpush1.bf16.msra.mxu0 %v4237_v43  ;;  %v936_v42 = vld [vmem:[#allocation7 + $0xd18] sm:$0xff]  ;;  %v4147_v39 = vpack.c.bf16 %v1006_v27, %v998_v26  ;;  %v547_v26 = vld [vmem:[#allocation7 + $0xf0] sm:$0xff]  ;;  %v554_v27 = vld [vmem:[#allocation7 + $0x128] sm:$0xff] }
 0x252   :  { %4112 = vmatprep.subr.bf16.mxu1 %v4111_v46  ;;  %4240 = vmatprep.subr.bf16.mxu0 %v4239_v47  ;;  %v944_v43 = vld [vmem:[#allocation7 + $0xd58] sm:$0xff]  ;;  %v933_v46 = vld [vmem:[#allocation7 + $0xd00] sm:$0xff] }
 0x253   :  { %v941_v47 = vld [vmem:[#allocation7 + $0xd40] sm:$0xff]  ;;  %v4259_v49 = vpack.c.bf16 %v944_v43, %v936_v42  ;;  %v999_v42 = vld [vmem:[#allocation7 + $0xf10] sm:$0xff] }
 0x254   :  { %v4133_v57 = vpack.c.bf16 %v941_v47, %v933_v46  ;;  %v1007_v43 = vld [vmem:[#allocation7 + $0xf50] sm:$0xff]  ;;  %v1016_v46 = vld [vmem:[#allocation7 + $0xf98] sm:$0xff]  ;;  %v609_v12 = vld [vmem:[#allocation7 + $0x2e0] sm:$0xff] }
 0x255   :  { %4114 = vmatpush1.bf16.msra.mxu1 %v4113_v54  ;;  %4242 = vmatpush1.bf16.msra.mxu0 %v4241_v55  ;;  %v952_v54 = vld [vmem:[#allocation7 + $0xd98] sm:$0xff]  ;;  %v4277_v50 = vpack.c.bf16 %v1007_v43, %v999_v42  ;;  %v555_v42 = vld [vmem:[#allocation7 + $0x130] sm:$0xff] }
 0x256   :  { %4116 = vmatprep.subr.bf16.mxu1 %v4115_v59  ;;  %4244 = vmatprep.subr.bf16.mxu0 %v4243_v60  ;;  %v960_v55 = vld [vmem:[#allocation7 + $0xdd8] sm:$0xff]  ;;  %v949_v59 = vld [vmem:[#allocation7 + $0xd80] sm:$0xff] }
 0x257   :  { %v957_v60 = vld [vmem:[#allocation7 + $0xdc0] sm:$0xff]  ;;  %v4263_v63 = vpack.c.bf16 %v960_v55, %v952_v54  ;;  %v1024_v47 = vld [vmem:[#allocation7 + $0xfd8] sm:$0xff] }
 0x258   :  { %v4137_v6 = vpack.c.bf16 %v957_v60, %v949_v59  ;;  %v4279_v55 = vpack.c.bf16 %v1024_v47, %v1016_v46  ;;  %v522_v59 = vld [vmem:[#allocation7 + $0x28] sm:$0xff]  ;;  %v572_v47 = vld [vmem:[#allocation7 + $0x1b8] sm:$0xff] }
 0x259   :  { %4118 = vmatpush1.bf16.msra.mxu1 %v4117_v4  ;;  %4246 = vmatpush1.bf16.msra.mxu0 %v4245_v5  ;;  %v968_v4 = vld [vmem:[#allocation7 + $0xe18] sm:$0xff]  ;;  %v530_v60 = vld [vmem:[#allocation7 + $0x68] sm:$0xff] }
 0x25a   :  { %4120 = vmatprep.subr.bf16.mxu1 %v4119_v8  ;;  %4248 = vmatprep.subr.bf16.mxu0 %v4247_v9  ;;  %v976_v5 = vld [vmem:[#allocation7 + $0xe58] sm:$0xff]  ;;  %v965_v8 = vld [vmem:[#allocation7 + $0xe00] sm:$0xff]  ;;  %v578_v46 = vld [vmem:[#allocation7 + $0x1e8] sm:$0xff] }
 0x25b   :  { %v973_v9 = vld [vmem:[#allocation7 + $0xe40] sm:$0xff]  ;;  %v4267_v10 = vpack.c.bf16 %v976_v5, %v968_v4 }
 0x25c   :  { %v4141_v17 = vpack.c.bf16 %v973_v9, %v965_v8  ;;  %v529_v8 = vld [vmem:[#allocation7 + $0x60] sm:$0xff]  ;;  %v523_v9 = vld [vmem:[#allocation7 + $0x30] sm:$0xff] }
 0x25d   :  { %4122 = vmatpush1.bf16.msra.mxu1 %v4121_v15  ;;  %4250 = vmatpush1.bf16.msra.mxu0 %v4249_v16  ;;  %v984_v15 = vld [vmem:[#allocation7 + $0xe98] sm:$0xff] }
 0x25e   :  { %4124 = vmatprep.subr.bf16.mxu1 %v4123_v19  ;;  %4252 = vmatprep.subr.bf16.mxu0 %v4251_v20  ;;  %v992_v16 = vld [vmem:[#allocation7 + $0xed8] sm:$0xff]  ;;  %v981_v19 = vld [vmem:[#allocation7 + $0xe80] sm:$0xff] }
 0x25f   :  { %v989_v20 = vld [vmem:[#allocation7 + $0xec0] sm:$0xff]  ;;  %v4271_v22 = vpack.c.bf16 %v992_v16, %v984_v15  ;;  %v548_v15 = vld [vmem:[#allocation7 + $0xf8] sm:$0xff] }
 0x260   :  { %v4145_v30 = vpack.c.bf16 %v989_v20, %v981_v19  ;;  %v537_v19 = vld [vmem:[#allocation7 + $0xa0] sm:$0xff]  ;;  %v4415_v24 = vpack.c.bf16 %v548_v15, %v540_v14  ;;  %v611_v15 = vld [vmem:[#allocation7 + $0x2f0] sm:$0xff] }
 0x261   :  { %4126 = vmatpush1.bf16.msra.mxu1 %v4125_v28  ;;  %4254 = vmatpush1.bf16.msra.mxu0 %v4253_v29  ;;  %v1000_v28 = vld [vmem:[#allocation7 + $0xf18] sm:$0xff]  ;;  %v545_v20 = vld [vmem:[#allocation7 + $0xe0] sm:$0xff] }
 0x262   :  { %4128 = vmatprep.subr.bf16.mxu1 %v4127_v36  ;;  %4256 = vmatprep.subr.bf16.mxu0 %v4255_v37  ;;  %v1008_v29 = vld [vmem:[#allocation7 + $0xf58] sm:$0xff]  ;;  %v5854_v36 = vsub.s32 2, %v5831_v32  ;;  %v997_v37 = vld [vmem:[#allocation7 + $0xf00] sm:$0xff] }
 0x263   :  { %v4275_v40 = vpack.c.bf16 %v1008_v29, %v1000_v28  ;;  %v562_v28 = vld [vmem:[#allocation7 + $0x168] sm:$0xff]  ;;  %v556_v29 = vld [vmem:[#allocation7 + $0x138] sm:$0xff] }
 0x265   :  { %4130 = vmatpush1.bf16.msra.mxu1 %v4129_v44  ;;  %4258 = vmatpush1.bf16.msra.mxu0 %v4257_v45  ;;  %v1014_v44 = vld [vmem:[#allocation7 + $0xf88] sm:$0xff] }
 0x266   :  { %4132 = vmatprep.subr.bf16.mxu1 %v4131_v48  ;;  %4260 = vmatprep.subr.bf16.mxu0 %v4259_v49  ;;  %v1022_v45 = vld [vmem:[#allocation7 + $0xfc8] sm:$0xff]  ;;  %v354_v48 = vrot.slane %v5836_v34, %v5854_v36  ;;  %v4149_v49 = vpack.c.bf16 %v1005_v38, %v997_v37  ;;  %v4291_v38 = vpack.c.bf16 %v562_v28, %v554_v27  ;;  %v625_v27 = vld [vmem:[#allocation7 + $0x360] sm:$0xff]  ;;  %v619_v28 = vld [vmem:[#allocation7 + $0x330] sm:$0xff] }
 0x267   :  { %v4151_v54 = vpack.c.bf16 %v1022_v45, %v1014_v44  ;;  %v563_v44 = vld [vmem:[#allocation7 + $0x170] sm:$0xff]  ;;  %v570_v45 = vld [vmem:[#allocation7 + $0x1a8] sm:$0xff] }
 0x268   :  { %v4295_v51 = vpack.c.bf16 %v578_v46, %v570_v45  ;;  %v641_v45 = vld [vmem:[#allocation7 + $0x3e0] sm:$0xff]  ;;  %v635_v46 = vld [vmem:[#allocation7 + $0x3b0] sm:$0xff] }
 0x269   :  { %4134 = vmatpush1.bf16.msra.mxu1 %v4133_v57  ;;  %4262 = vmatpush1.bf16.msra.mxu0 %v4261_v58  ;;  %v1015_v57 = vld [vmem:[#allocation7 + $0xf90] sm:$0xff] }
 0x26a   :  { %4136 = vmatprep.subr.bf16.mxu1 %v4135_v61  ;;  %4264 = vmatprep.subr.bf16.mxu0 %v4263_v63  ;;  %v1023_v58 = vld [vmem:[#allocation7 + $0xfd0] sm:$0xff]  ;;  %v524_v61 = vld [vmem:[#allocation7 + $0x38] sm:$0xff] }
 0x26b   :  { %v532_v63 = vld [vmem:[#allocation7 + $0x78] sm:$0xff]  ;;  %v4281_v4 = vpack.c.bf16 %v1023_v58, %v1015_v57  ;;  %v586_v57 = vld [vmem:[#allocation7 + $0x228] sm:$0xff] }
 0x26c   :  { %v4411_v34 = vpack.c.bf16 %v532_v63, %v524_v61  ;;  %v594_v58 = vld [vmem:[#allocation7 + $0x268] sm:$0xff] }
 0x26d   :  { %4138 = vmatpush1.bf16.msra.mxu1 %v4137_v6  ;;  %4266 = vmatpush1.bf16.msra.mxu0 %v4265_v7  ;;  %v4283_v6 = vpack.c.bf16 %v530_v60, %v522_v59  ;;  %v521_v7 = vld [vmem:[#allocation7 + $0x20] sm:$0xff]  ;;  %v588_v59 = vld [vmem:[#allocation7 + $0x238] sm:$0xff] }
 0x26e   :  { %4140 = vmatprep.subr.bf16.mxu1 %v4139_v25  ;;  %4268 = vmatprep.subr.bf16.mxu0 %v4267_v10  ;;  %v531_v10 = vld [vmem:[#allocation7 + $0x70] sm:$0xff]  ;;  %v4285_v16 = vpack.c.bf16 %v529_v8, %v521_v7  ;;  %v596_v60 = vld [vmem:[#allocation7 + $0x278] sm:$0xff] }
 0x26f   :  { %v604_v7 = vld [vmem:[#allocation7 + $0x2b8] sm:$0xff] }
 0x270   :  { %v612_v8 = vld [vmem:[#allocation7 + $0x2f8] sm:$0xff] }
 0x271   :  { %4142 = vmatpush1.bf16.msra.mxu1 %v4141_v17  ;;  %4270 = vmatpush1.bf16.msra.mxu0 %v4269_v18  ;;  %v4413_v18 = vpack.c.bf16 %v531_v10, %v523_v9  ;;  %v4431_v14 = vpack.c.bf16 %v612_v8, %v604_v7  ;;  %v675_v8 = vld [vmem:[#allocation7 + $0x4f0] sm:$0xff] }
 0x272   :  { %4144 = vmatprep.subr.bf16.mxu1 %v4143_v21  ;;  %4272 = vmatprep.subr.bf16.mxu0 %v4271_v22  ;;  %v539_v21 = vld [vmem:[#allocation7 + $0xb0] sm:$0xff] }
 0x273   :  { %v4417_v37 = vpack.c.bf16 %v547_v26, %v539_v21  ;;  %v4305_v21 = vpack.c.bf16 %v609_v12, %v601_v11  ;;  %v617_v26 = vld [vmem:[#allocation7 + $0x320] sm:$0xff]  ;;  %v692_v11 = vld [vmem:[#allocation7 + $0x578] sm:$0xff] }
 0x275   :  { %4146 = vmatpush1.bf16.msra.mxu1 %v4145_v30  ;;  %4274 = vmatpush1.bf16.msra.mxu0 %v4273_v31  ;;  %v564_v30 = vld [vmem:[#allocation7 + $0x178] sm:$0xff]  ;;  %v4289_v31 = vpack.c.bf16 %v545_v20, %v537_v19 }
 0x276   :  { %4148 = vmatprep.subr.bf16.mxu1 %v4147_v39  ;;  %4276 = vmatprep.subr.bf16.mxu0 %v4275_v40  ;;  %v553_v39 = vld [vmem:[#allocation7 + $0x120] sm:$0xff]  ;;  %v4419_v43 = vpack.c.bf16 %v564_v30, %v556_v29  ;;  %v620_v19 = vld [vmem:[#allocation7 + $0x338] sm:$0xff]  ;;  %v627_v30 = vld [vmem:[#allocation7 + $0x370] sm:$0xff] }
 0x277   :  { %v561_v40 = vld [vmem:[#allocation7 + $0x160] sm:$0xff]  ;;  %v628_v20 = vld [vmem:[#allocation7 + $0x378] sm:$0xff] }
 0x278   :  { %v500_v0 = vpop.f32.mrb[4].mxu0  ;;  %v4435_v29 = vpack.c.bf16 %v628_v20, %v620_v19  ;;  %v691_v20 = vld [vmem:[#allocation7 + $0x570] sm:$0xff] }
 0x279   :  { %v501_v1 = vadd.f32 %v500_v0, %v354_v48  ;;  %v502_v2 = vpop.f32.mrb[5].mxu0  ;;  %4150 = vmatpush1.bf16.msra.mxu1 %v4149_v49  ;;  %4278 = vmatpush1.bf16.msra.mxu0 %v4277_v50  ;;  %v580_v48 = vld [vmem:[#allocation7 + $0x1f8] sm:$0xff]  ;;  %v4293_v49 = vpack.c.bf16 %v561_v40, %v553_v39  ;;  %v4421_v50 = vpack.c.bf16 %v563_v44, %v555_v42  ;;  %v633_v44 = vld [vmem:[#allocation7 + $0x3a0] sm:$0xff] }
 0x27a   :  { %v503_v5 = vadd.f32 %v502_v2, %v358_v53  ;;  %4152 = vmatprep.subr.bf16.mxu1 %v4151_v54  ;;  %4280 = vmatprep.subr.bf16.mxu0 %v4279_v55  ;;  %v571_v53 = vld [vmem:[#allocation7 + $0x1b0] sm:$0xff]  ;;  %v4423_v54 = vpack.c.bf16 %v580_v48, %v572_v47  ;;  %v4299_v0 = vpack.c.bf16 %v594_v58, %v586_v57  ;;  %v593_v2 = vld [vmem:[#allocation7 + $0x260] sm:$0xff]  ;;  %v644_v39 = vld [vmem:[#allocation7 + $0x3f8] sm:$0xff] }
 0x27b   :  { %v511_v25 = vmul.f32 0.2, %v501_v1  ;;  %vm507_vm5 = vcmp.gt.f32.partialorder %v501_v1, 0.0  ;;  %v579_v55 = vld [vmem:[#allocation7 + $0x1f0] sm:$0xff]  ;;  %v4309_v40 = vpack.c.bf16 %v625_v27, %v617_v26  ;;  %v4437_v42 = vpack.c.bf16 %v627_v30, %v619_v28  ;;  %v657_v57 = vld [vmem:[#allocation7 + $0x460] sm:$0xff]  ;;  %v708_v26 = vld [vmem:[#allocation7 + $0x5f8] sm:$0xff] }
 0x27c   :  { %vm508_vm6 = vcmp.gt.f32.partialorder %v503_v5, 0.0  ;;  %v512_v13 = vmul.f32 0.2, %v503_v5  ;;  %v4425_v63 = vpack.c.bf16 %v579_v55, %v571_v53  ;;  %v643_v48 = vld [vmem:[#allocation7 + $0x3f0] sm:$0xff]  ;;  %v649_v55 = vld [vmem:[#allocation7 + $0x420] sm:$0xff] }
 0x27d   :  { %4154 = vmatpush1.bf16.msra.mxu1 %v4153_v3  ;;  %4282 = vmatpush1.bf16.msra.mxu0 %v4281_v4  ;;  %v5868_v22 = vsel %vm507_vm5, %v501_v1, %v511_v25  ;;  %v585_v1 = vld [vmem:[#allocation7 + $0x220] sm:$0xff]  ;;  %v587_v3 = vld [vmem:[#allocation7 + $0x230] sm:$0xff]  ;;  %v4427_v4 = vpack.c.bf16 %v596_v60, %v588_v59  ;;  %v4441_v53 = vpack.c.bf16 %v643_v48, %v635_v46 }
 0x27e   :  { %v5863_v17 = vsel %vm508_vm6, %v503_v5, %v512_v13  ;;  %4284 = vmatprep.subr.bf16.mxu1 %v4283_v6  ;;  %4412 = vmatprep.subr.bf16.mxu0 %v4411_v34  ;;  %v595_v5 = vld [vmem:[#allocation7 + $0x270] sm:$0xff]  ;;  %v602_v6 = vld [vmem:[#allocation7 + $0x2a8] sm:$0xff]  ;;  %v4301_v9 = vpack.c.bf16 %v593_v2, %v585_v1  ;;  %v676_v1 = vld [vmem:[#allocation7 + $0x4f8] sm:$0xff]  ;;  %v4317_v2 = vpack.c.bf16 %v657_v57, %v649_v55 }
 0x27f   :  { %1206 = vmatprep.mubr.f32.mxu1 %v5863_v17  ;;  %1348 = vmatprep.mubr.f32.mxu0 %v5863_v17  ;;  %v610_v34 = vld [vmem:[#allocation7 + $0x2e8] sm:$0xff]  ;;  %v4429_v25 = vpack.c.bf16 %v595_v5, %v587_v3  ;;  %v603_v13 = vld [vmem:[#allocation7 + $0x2b0] sm:$0xff]  ;;  %v665_v5 = vld [vmem:[#allocation7 + $0x4a0] sm:$0xff] }
 0x280   :  { %1207 = vmatmul.mubr.f32.vlgmr.msra.gmra.mrb[0].mxu1 %v5868_v22  ;;  %1349 = vmatmul.mubr.f32.vlgmr.msra.gmra.mrb[6].mxu0 %v5868_v22  ;;  %v4303_v10 = vpack.c.bf16 %v610_v34, %v602_v6  ;;  %v651_v58 = vld [vmem:[#allocation7 + $0x430] sm:$0xff]  ;;  %v673_v6 = vld [vmem:[#allocation7 + $0x4e0] sm:$0xff]  ;;  %v740_v55 = vld [vmem:[#allocation7 + $0x6f8] sm:$0xff] }
 0x281   :  { %4286 = vmatpush1.bf16.msra.mxu1 %v4285_v16  ;;  %1419 = vmatprep.mubr.f32.mxu1 %v5845_v56  ;;  %v618_v16 = vld [vmem:[#allocation7 + $0x328] sm:$0xff]  ;;  %v659_v60 = vld [vmem:[#allocation7 + $0x470] sm:$0xff]  ;;  %v4321_v12 = vpack.c.bf16 %v673_v6, %v665_v5  ;;  %v697_v30 = vld [vmem:[#allocation7 + $0x5a0] sm:$0xff] }
 0x282   :  { %4414 = vmatpush1.bf16.msra.mxu0 %v4413_v18  ;;  %1561 = vmatprep.mubr.f32.mxu0 %v5845_v56  ;;  %v569_v56 = vld [vmem:[#allocation7 + $0x1a0] sm:$0xff]  ;;  %v626_v18 = vld [vmem:[#allocation7 + $0x368] sm:$0xff]  ;;  %v4445_v3 = vpack.c.bf16 %v659_v60, %v651_v58  ;;  %v667_v34 = vld [vmem:[#allocation7 + $0x4b0] sm:$0xff] }
 0x283   :  { %4288 = vmatprep.subr.bf16.mxu1 %v4287_v23  ;;  %4416 = vmatprep.subr.bf16.mxu0 %v4415_v24  ;;  %v4297_v61 = vpack.c.bf16 %v577_v52, %v569_v56  ;;  %v4433_v23 = vpack.c.bf16 %v611_v15, %v603_v13  ;;  %v4307_v24 = vpack.c.bf16 %v626_v18, %v618_v16  ;;  %v660_v56 = vld [vmem:[#allocation7 + $0x478] sm:$0xff]  ;;  %v681_v15 = vld [vmem:[#allocation7 + $0x520] sm:$0xff]  ;;  %v683_v18 = vld [vmem:[#allocation7 + $0x530] sm:$0xff] }
 0x284   :  { %v4313_v52 = vpack.c.bf16 %v641_v45, %v633_v44  ;;  %v4449_v13 = vpack.c.bf16 %v675_v8, %v667_v34  ;;  %v689_v16 = vld [vmem:[#allocation7 + $0x560] sm:$0xff]  ;;  %v4453_v28 = vpack.c.bf16 %v691_v20, %v683_v18  ;;  %v724_v44 = vld [vmem:[#allocation7 + $0x678] sm:$0xff] }
 0x285   :  { %4290 = vmatpush1.bf16.msra.mxu1 %v4289_v31  ;;  %v634_v31 = vld [vmem:[#allocation7 + $0x3a8] sm:$0xff]  ;;  %v4325_v27 = vpack.c.bf16 %v689_v16, %v681_v15  ;;  %v713_v48 = vld [vmem:[#allocation7 + $0x620] sm:$0xff]  ;;  %v756_v5 = vld [vmem:[#allocation7 + $0x778] sm:$0xff] }
 0x286   :  { %4418 = vmatpush1.bf16.msra.mxu0 %v4417_v37  ;;  %4292 = vmatprep.subr.bf16.mxu1 %v4291_v38  ;;  %v642_v37 = vld [vmem:[#allocation7 + $0x3e8] sm:$0xff]  ;;  %v636_v38 = vld [vmem:[#allocation7 + $0x3b8] sm:$0xff]  ;;  %v729_v60 = vld [vmem:[#allocation7 + $0x6a0] sm:$0xff] }
 0x287   :  { %4420 = vmatprep.subr.bf16.mxu0 %v4419_v43  ;;  %v4311_v43 = vpack.c.bf16 %v642_v37, %v634_v31  ;;  %v4439_v47 = vpack.c.bf16 %v644_v39, %v636_v38  ;;  %v705_v31 = vld [vmem:[#allocation7 + $0x5e0] sm:$0xff]  ;;  %v699_v37 = vld [vmem:[#allocation7 + $0x5b0] sm:$0xff]  ;;  %v772_v15 = vld [vmem:[#allocation7 + $0x7f8] sm:$0xff] }
 0x288   :  { %v707_v39 = vld [vmem:[#allocation7 + $0x5f0] sm:$0xff]  ;;  %v4329_v45 = vpack.c.bf16 %v705_v31, %v697_v30  ;;  %v745_v8 = vld [vmem:[#allocation7 + $0x720] sm:$0xff]  ;;  %v788_v30 = vld [vmem:[#allocation7 + $0x878] sm:$0xff] }
 0x289   :  { %4294 = vmatpush1.bf16.msra.mxu1 %v4293_v49  ;;  %v650_v49 = vld [vmem:[#allocation7 + $0x428] sm:$0xff]  ;;  %v4457_v46 = vpack.c.bf16 %v707_v39, %v699_v37  ;;  %v761_v20 = vld [vmem:[#allocation7 + $0x7a0] sm:$0xff] }
 0x28a   :  { %4422 = vmatpush1.bf16.msra.mxu0 %v4421_v50  ;;  %4296 = vmatprep.subr.bf16.mxu1 %v4295_v51  ;;  %v658_v50 = vld [vmem:[#allocation7 + $0x468] sm:$0xff]  ;;  %v652_v51 = vld [vmem:[#allocation7 + $0x438] sm:$0xff]  ;;  %v777_v39 = vld [vmem:[#allocation7 + $0x820] sm:$0xff] }
 0x28b   :  { %4424 = vmatprep.subr.bf16.mxu0 %v4423_v54  ;;  %v4315_v54 = vpack.c.bf16 %v658_v50, %v650_v49  ;;  %v4443_v59 = vpack.c.bf16 %v660_v56, %v652_v51  ;;  %v721_v49 = vld [vmem:[#allocation7 + $0x660] sm:$0xff]  ;;  %v715_v50 = vld [vmem:[#allocation7 + $0x630] sm:$0xff] }
 0x28c   :  { %v723_v56 = vld [vmem:[#allocation7 + $0x670] sm:$0xff]  ;;  %v4333_v57 = vpack.c.bf16 %v721_v49, %v713_v48  ;;  %v796_v48 = vld [vmem:[#allocation7 + $0x8b8] sm:$0xff] }
 0x28d   :  { %4298 = vmatpush1.bf16.msra.mxu1 %v4297_v61  ;;  %v666_v61 = vld [vmem:[#allocation7 + $0x4a8] sm:$0xff]  ;;  %v4461_v58 = vpack.c.bf16 %v723_v56, %v715_v50  ;;  %v804_v49 = vld [vmem:[#allocation7 + $0x8f8] sm:$0xff]  ;;  %v801_v56 = vld [vmem:[#allocation7 + $0x8e0] sm:$0xff] }
 0x28e   :  { %4426 = vmatpush1.bf16.msra.mxu0 %v4425_v63  ;;  %4300 = vmatprep.subr.bf16.mxu1 %v4299_v0  ;;  %v674_v63 = vld [vmem:[#allocation7 + $0x4e8] sm:$0xff]  ;;  %v668_v0 = vld [vmem:[#allocation7 + $0x4b8] sm:$0xff] }
 0x28f   :  { %4428 = vmatprep.subr.bf16.mxu0 %v4427_v4  ;;  %v4319_v4 = vpack.c.bf16 %v674_v63, %v666_v61  ;;  %v4447_v7 = vpack.c.bf16 %v676_v1, %v668_v0  ;;  %v737_v61 = vld [vmem:[#allocation7 + $0x6e0] sm:$0xff]  ;;  %v731_v63 = vld [vmem:[#allocation7 + $0x6b0] sm:$0xff] }
 0x290   :  { %v739_v1 = vld [vmem:[#allocation7 + $0x6f0] sm:$0xff]  ;;  %v4337_v6 = vpack.c.bf16 %v737_v61, %v729_v60  ;;  %v820_v60 = vld [vmem:[#allocation7 + $0x978] sm:$0xff] }
 0x291   :  { %4302 = vmatpush1.bf16.msra.mxu1 %v4301_v9  ;;  %v682_v9 = vld [vmem:[#allocation7 + $0x528] sm:$0xff]  ;;  %v4465_v34 = vpack.c.bf16 %v739_v1, %v731_v63  ;;  %v809_v1 = vld [vmem:[#allocation7 + $0x920] sm:$0xff] }
 0x292   :  { %4430 = vmatpush1.bf16.msra.mxu0 %v4429_v25  ;;  %4304 = vmatprep.subr.bf16.mxu1 %v4303_v10  ;;  %v690_v25 = vld [vmem:[#allocation7 + $0x568] sm:$0xff]  ;;  %v684_v10 = vld [vmem:[#allocation7 + $0x538] sm:$0xff] }
 0x293   :  { %4432 = vmatprep.subr.bf16.mxu0 %v4431_v14  ;;  %v4323_v14 = vpack.c.bf16 %v690_v25, %v682_v9  ;;  %v4451_v19 = vpack.c.bf16 %v692_v11, %v684_v10  ;;  %v753_v9 = vld [vmem:[#allocation7 + $0x760] sm:$0xff]  ;;  %v747_v25 = vld [vmem:[#allocation7 + $0x730] sm:$0xff] }
 0x294   :  { %v755_v11 = vld [vmem:[#allocation7 + $0x770] sm:$0xff]  ;;  %v4341_v16 = vpack.c.bf16 %v753_v9, %v745_v8 }
 0x295   :  { %4306 = vmatpush1.bf16.msra.mxu1 %v4305_v21  ;;  %v698_v21 = vld [vmem:[#allocation7 + $0x5a8] sm:$0xff]  ;;  %v4469_v18 = vpack.c.bf16 %v755_v11, %v747_v25  ;;  %v833_v11 = vld [vmem:[#allocation7 + $0x9e0] sm:$0xff] }
 0x296   :  { %4434 = vmatpush1.bf16.msra.mxu0 %v4433_v23  ;;  %4308 = vmatprep.subr.bf16.mxu1 %v4307_v24  ;;  %v706_v23 = vld [vmem:[#allocation7 + $0x5e8] sm:$0xff]  ;;  %v700_v24 = vld [vmem:[#allocation7 + $0x5b8] sm:$0xff] }
 0x297   :  { %4436 = vmatprep.subr.bf16.mxu0 %v4435_v29  ;;  %v4327_v29 = vpack.c.bf16 %v706_v23, %v698_v21  ;;  %v4455_v38 = vpack.c.bf16 %v708_v26, %v700_v24  ;;  %v769_v21 = vld [vmem:[#allocation7 + $0x7e0] sm:$0xff]  ;;  %v763_v23 = vld [vmem:[#allocation7 + $0x7b0] sm:$0xff] }
 0x298   :  { %v771_v26 = vld [vmem:[#allocation7 + $0x7f0] sm:$0xff]  ;;  %v4345_v31 = vpack.c.bf16 %v769_v21, %v761_v20 }
 0x299   :  { %4310 = vmatpush1.bf16.msra.mxu1 %v4309_v40  ;;  %v714_v40 = vld [vmem:[#allocation7 + $0x628] sm:$0xff]  ;;  %v4473_v37 = vpack.c.bf16 %v771_v26, %v763_v23  ;;  %v841_v23 = vld [vmem:[#allocation7 + $0xa20] sm:$0xff]  ;;  %v843_v26 = vld [vmem:[#allocation7 + $0xa30] sm:$0xff] }
 0x29a   :  { %4438 = vmatpush1.bf16.msra.mxu0 %v4437_v42  ;;  %4312 = vmatprep.subr.bf16.mxu1 %v4311_v43  ;;  %v722_v42 = vld [vmem:[#allocation7 + $0x668] sm:$0xff]  ;;  %v716_v43 = vld [vmem:[#allocation7 + $0x638] sm:$0xff] }
 0x29b   :  { %4440 = vmatprep.subr.bf16.mxu0 %v4439_v47  ;;  %v4331_v47 = vpack.c.bf16 %v722_v42, %v714_v40  ;;  %v4459_v51 = vpack.c.bf16 %v724_v44, %v716_v43  ;;  %v785_v40 = vld [vmem:[#allocation7 + $0x860] sm:$0xff]  ;;  %v779_v43 = vld [vmem:[#allocation7 + $0x830] sm:$0xff] }
 0x29c   :  { %v787_v44 = vld [vmem:[#allocation7 + $0x870] sm:$0xff] }
 0x29d   :  { %4314 = vmatpush1.bf16.msra.mxu1 %v4313_v52  ;;  %v730_v52 = vld [vmem:[#allocation7 + $0x6a8] sm:$0xff]  ;;  %v4477_v50 = vpack.c.bf16 %v787_v44, %v779_v43  ;;  %v865_v43 = vld [vmem:[#allocation7 + $0xae0] sm:$0xff]  ;;  %v859_v44 = vld [vmem:[#allocation7 + $0xab0] sm:$0xff] }
 0x29e   :  { %4442 = vmatpush1.bf16.msra.mxu0 %v4441_v53  ;;  %4316 = vmatprep.subr.bf16.mxu1 %v4315_v54  ;;  %v738_v53 = vld [vmem:[#allocation7 + $0x6e8] sm:$0xff]  ;;  %v732_v54 = vld [vmem:[#allocation7 + $0x6b8] sm:$0xff] }
 0x29f   :  { %4444 = vmatprep.subr.bf16.mxu0 %v4443_v59  ;;  %v4335_v59 = vpack.c.bf16 %v738_v53, %v730_v52  ;;  %v4463_v0 = vpack.c.bf16 %v740_v55, %v732_v54  ;;  %v795_v52 = vld [vmem:[#allocation7 + $0x8b0] sm:$0xff]  ;;  %v810_v55 = vld [vmem:[#allocation7 + $0x928] sm:$0xff] }
 0x2a0   :  { %v803_v54 = vld [vmem:[#allocation7 + $0x8f0] sm:$0xff] }
 0x2a1   :  { %4318 = vmatpush1.bf16.msra.mxu1 %v4317_v2  ;;  %v746_v2 = vld [vmem:[#allocation7 + $0x728] sm:$0xff]  ;;  %v4481_v63 = vpack.c.bf16 %v803_v54, %v795_v52  ;;  %v881_v54 = vld [vmem:[#allocation7 + $0xb60] sm:$0xff] }
 0x2a2   :  { %4446 = vmatpush1.bf16.msra.mxu0 %v4445_v3  ;;  %4320 = vmatprep.subr.bf16.mxu1 %v4319_v4  ;;  %v754_v3 = vld [vmem:[#allocation7 + $0x768] sm:$0xff]  ;;  %v748_v4 = vld [vmem:[#allocation7 + $0x738] sm:$0xff] }
 0x2a3   :  { %4448 = vmatprep.subr.bf16.mxu0 %v4447_v7  ;;  %v4339_v7 = vpack.c.bf16 %v754_v3, %v746_v2  ;;  %v4467_v10 = vpack.c.bf16 %v756_v5, %v748_v4  ;;  %v817_v2 = vld [vmem:[#allocation7 + $0x960] sm:$0xff]  ;;  %v811_v3 = vld [vmem:[#allocation7 + $0x930] sm:$0xff] }
 0x2a4   :  { %v819_v5 = vld [vmem:[#allocation7 + $0x970] sm:$0xff]  ;;  %v4357_v8 = vpack.c.bf16 %v817_v2, %v809_v1 }
 0x2a5   :  { %4322 = vmatpush1.bf16.msra.mxu1 %v4321_v12  ;;  %v762_v12 = vld [vmem:[#allocation7 + $0x7a8] sm:$0xff]  ;;  %v4485_v9 = vpack.c.bf16 %v819_v5, %v811_v3  ;;  %v889_v3 = vld [vmem:[#allocation7 + $0xba0] sm:$0xff]  ;;  %v891_v5 = vld [vmem:[#allocation7 + $0xbb0] sm:$0xff] }
 0x2a6   :  { %4450 = vmatpush1.bf16.msra.mxu0 %v4449_v13  ;;  %4324 = vmatprep.subr.bf16.mxu1 %v4323_v14  ;;  %v770_v13 = vld [vmem:[#allocation7 + $0x7e8] sm:$0xff]  ;;  %v764_v14 = vld [vmem:[#allocation7 + $0x7b8] sm:$0xff] }
 0x2a7   :  { %4452 = vmatprep.subr.bf16.mxu0 %v4451_v19  ;;  %v4343_v19 = vpack.c.bf16 %v770_v13, %v762_v12  ;;  %v4471_v24 = vpack.c.bf16 %v772_v15, %v764_v14  ;;  %v827_v12 = vld [vmem:[#allocation7 + $0x9b0] sm:$0xff]  ;;  %v842_v14 = vld [vmem:[#allocation7 + $0xa28] sm:$0xff] }
 0x2a8   :  { %v850_v15 = vld [vmem:[#allocation7 + $0xa68] sm:$0xff] }
 0x2a9   :  { %4326 = vmatpush1.bf16.msra.mxu1 %v4325_v27  ;;  %v778_v27 = vld [vmem:[#allocation7 + $0x828] sm:$0xff]  ;;  %v4363_v21 = vpack.c.bf16 %v850_v15, %v842_v14  ;;  %v915_v15 = vld [vmem:[#allocation7 + $0xc70] sm:$0xff] }
 0x2aa   :  { %4454 = vmatpush1.bf16.msra.mxu0 %v4453_v28  ;;  %4328 = vmatprep.subr.bf16.mxu1 %v4327_v29  ;;  %v786_v28 = vld [vmem:[#allocation7 + $0x868] sm:$0xff]  ;;  %v780_v29 = vld [vmem:[#allocation7 + $0x838] sm:$0xff] }
 0x2ab   :  { %4456 = vmatprep.subr.bf16.mxu0 %v4455_v38  ;;  %v4347_v38 = vpack.c.bf16 %v786_v28, %v778_v27  ;;  %v4475_v42 = vpack.c.bf16 %v788_v30, %v780_v29  ;;  %v851_v28 = vld [vmem:[#allocation7 + $0xa70] sm:$0xff]  ;;  %v858_v29 = vld [vmem:[#allocation7 + $0xaa8] sm:$0xff] }
 0x2ac   :  { %v866_v30 = vld [vmem:[#allocation7 + $0xae8] sm:$0xff] }
 0x2ad   :  { %4330 = vmatpush1.bf16.msra.mxu1 %v4329_v45  ;;  %v794_v45 = vld [vmem:[#allocation7 + $0x8a8] sm:$0xff] }
 0x2ae   :  { %4458 = vmatpush1.bf16.msra.mxu0 %v4457_v46  ;;  %4332 = vmatprep.subr.bf16.mxu1 %v4331_v47  ;;  %v802_v46 = vld [vmem:[#allocation7 + $0x8e8] sm:$0xff]  ;;  %v4349_v47 = vpack.c.bf16 %v785_v40, %v777_v39  ;;  %v4493_v39 = vpack.c.bf16 %v851_v28, %v843_v26  ;;  %v4367_v40 = vpack.c.bf16 %v866_v30, %v858_v29  ;;  %v921_v26 = vld [vmem:[#allocation7 + $0xca0] sm:$0xff]  ;;  %v923_v28 = vld [vmem:[#allocation7 + $0xcb0] sm:$0xff] }
 0x2af   :  { %4460 = vmatprep.subr.bf16.mxu0 %v4459_v51  ;;  %v793_v51 = vld [vmem:[#allocation7 + $0x8a0] sm:$0xff]  ;;  %v4351_v53 = vpack.c.bf16 %v802_v46, %v794_v45  ;;  %v867_v46 = vld [vmem:[#allocation7 + $0xaf0] sm:$0xff] }
 0x2b0   :  { %v4353_v61 = vpack.c.bf16 %v801_v56, %v793_v51  ;;  %v4497_v56 = vpack.c.bf16 %v867_v46, %v859_v44  ;;  %v931_v30 = vld [vmem:[#allocation7 + $0xcf0] sm:$0xff]  ;;  %v937_v44 = vld [vmem:[#allocation7 + $0xd20] sm:$0xff] }
 0x2b1   :  { %4334 = vmatpush1.bf16.msra.mxu1 %v4333_v57  ;;  %v818_v57 = vld [vmem:[#allocation7 + $0x968] sm:$0xff]  ;;  %v939_v46 = vld [vmem:[#allocation7 + $0xd30] sm:$0xff] }
 0x2b2   :  { %4462 = vmatpush1.bf16.msra.mxu0 %v4461_v58  ;;  %4336 = vmatprep.subr.bf16.mxu1 %v4335_v59  ;;  %v4479_v58 = vpack.c.bf16 %v804_v49, %v796_v48  ;;  %v812_v59 = vld [vmem:[#allocation7 + $0x938] sm:$0xff]  ;;  %v882_v48 = vld [vmem:[#allocation7 + $0xb68] sm:$0xff] }
 0x2b3   :  { %4464 = vmatprep.subr.bf16.mxu0 %v4463_v0  ;;  %v4355_v0 = vpack.c.bf16 %v818_v57, %v810_v55  ;;  %v4483_v4 = vpack.c.bf16 %v820_v60, %v812_v59  ;;  %v876_v49 = vld [vmem:[#allocation7 + $0xb38] sm:$0xff]  ;;  %v875_v55 = vld [vmem:[#allocation7 + $0xb30] sm:$0xff]  ;;  %v890_v59 = vld [vmem:[#allocation7 + $0xba8] sm:$0xff] }
 0x2b4   :  { %v898_v60 = vld [vmem:[#allocation7 + $0xbe8] sm:$0xff] }
 0x2b5   :  { %4338 = vmatpush1.bf16.msra.mxu1 %v4337_v6  ;;  %v826_v6 = vld [vmem:[#allocation7 + $0x9a8] sm:$0xff]  ;;  %v4375_v2 = vpack.c.bf16 %v898_v60, %v890_v59  ;;  %v963_v60 = vld [vmem:[#allocation7 + $0xdf0] sm:$0xff] }
 0x2b6   :  { %4466 = vmatpush1.bf16.msra.mxu0 %v4465_v34  ;;  %4340 = vmatprep.subr.bf16.mxu1 %v4339_v7  ;;  %v834_v34 = vld [vmem:[#allocation7 + $0x9e8] sm:$0xff]  ;;  %v828_v7 = vld [vmem:[#allocation7 + $0x9b8] sm:$0xff] }
 0x2b7   :  { %4468 = vmatprep.subr.bf16.mxu0 %v4467_v10  ;;  %v4359_v25 = vpack.c.bf16 %v834_v34, %v826_v6  ;;  %v825_v10 = vld [vmem:[#allocation7 + $0x9a0] sm:$0xff]  ;;  %v899_v34 = vld [vmem:[#allocation7 + $0xbf0] sm:$0xff] }
 0x2b9   :  { %4342 = vmatpush1.bf16.msra.mxu1 %v4341_v16  ;;  %v844_v16 = vld [vmem:[#allocation7 + $0xa38] sm:$0xff] }
 0x2ba   :  { %4470 = vmatpush1.bf16.msra.mxu0 %v4469_v18  ;;  %4344 = vmatprep.subr.bf16.mxu1 %v4343_v19  ;;  %v852_v18 = vld [vmem:[#allocation7 + $0xa78] sm:$0xff]  ;;  %v4361_v19 = vpack.c.bf16 %v833_v11, %v825_v10  ;;  %v4505_v10 = vpack.c.bf16 %v899_v34, %v891_v5  ;;  %v969_v5 = vld [vmem:[#allocation7 + $0xe20] sm:$0xff]  ;;  %v971_v34 = vld [vmem:[#allocation7 + $0xe30] sm:$0xff] }
 0x2bb   :  { %4472 = vmatprep.subr.bf16.mxu0 %v4471_v24  ;;  %v849_v24 = vld [vmem:[#allocation7 + $0xa60] sm:$0xff]  ;;  %v4491_v27 = vpack.c.bf16 %v852_v18, %v844_v16  ;;  %v922_v16 = vld [vmem:[#allocation7 + $0xca8] sm:$0xff] }
 0x2bc   :  { %v930_v18 = vld [vmem:[#allocation7 + $0xce8] sm:$0xff] }
 0x2bd   :  { %4346 = vmatpush1.bf16.msra.mxu1 %v4345_v31  ;;  %v860_v31 = vld [vmem:[#allocation7 + $0xab8] sm:$0xff] }
 0x2be   :  { %4474 = vmatpush1.bf16.msra.mxu0 %v4473_v37  ;;  %4348 = vmatprep.subr.bf16.mxu1 %v4347_v38  ;;  %v868_v37 = vld [vmem:[#allocation7 + $0xaf8] sm:$0xff]  ;;  %v4365_v38 = vpack.c.bf16 %v849_v24, %v841_v23  ;;  %v4383_v24 = vpack.c.bf16 %v930_v18, %v922_v16  ;;  %v995_v18 = vld [vmem:[#allocation7 + $0xef0] sm:$0xff] }
 0x2bf   :  { %4476 = vmatprep.subr.bf16.mxu0 %v4475_v42  ;;  %v857_v42 = vld [vmem:[#allocation7 + $0xaa0] sm:$0xff]  ;;  %v4495_v45 = vpack.c.bf16 %v868_v37, %v860_v31  ;;  %v938_v31 = vld [vmem:[#allocation7 + $0xd28] sm:$0xff] }
 0x2c0   :  { %1420 = vmatmul.mubr.f32.vlgmr.msra.gmra.mrb[2].mxu1 %v5849_v62  ;;  %v4369_v51 = vpack.c.bf16 %v865_v43, %v857_v42  ;;  %v946_v37 = vld [vmem:[#allocation7 + $0xd68] sm:$0xff]  ;;  %v4513_v42 = vpack.c.bf16 %v931_v30, %v923_v28  ;;  %v1001_v28 = vld [vmem:[#allocation7 + $0xf20] sm:$0xff]  ;;  %v1003_v30 = vld [vmem:[#allocation7 + $0xf30] sm:$0xff] }
 0x2c1   :  { %1562 = vmatmul.mubr.f32.vlgmr.msra.gmra.mrb[8].mxu0 %v5849_v62  ;;  %4350 = vmatpush1.bf16.msra.mxu1 %v4349_v47  ;;  %v836_v62 = vld [vmem:[#allocation7 + $0x9f8] sm:$0xff]  ;;  %v874_v47 = vld [vmem:[#allocation7 + $0xb28] sm:$0xff]  ;;  %v4387_v43 = vpack.c.bf16 %v946_v37, %v938_v31  ;;  %v1011_v37 = vld [vmem:[#allocation7 + $0xf70] sm:$0xff] }
 0x2c2   :  { %1490 = vmatprep.mubr.f32.mxu1 %v5863_v17  ;;  %4478 = vmatpush1.bf16.msra.mxu0 %v4477_v50  ;;  %v4487_v13 = vpack.c.bf16 %v836_v62, %v828_v7  ;;  %v884_v50 = vld [vmem:[#allocation7 + $0xb78] sm:$0xff]  ;;  %v4371_v52 = vpack.c.bf16 %v882_v48, %v874_v47  ;;  %v906_v7 = vld [vmem:[#allocation7 + $0xc28] sm:$0xff]  ;;  %v947_v48 = vld [vmem:[#allocation7 + $0xd70] sm:$0xff] }
 0x2c3   :  { %1632 = vmatprep.mubr.f32.mxu0 %v5863_v17  ;;  %4352 = vmatprep.subr.bf16.mxu1 %v4351_v53  ;;  %v835_v17 = vld [vmem:[#allocation7 + $0x9f0] sm:$0xff]  ;;  %v873_v53 = vld [vmem:[#allocation7 + $0xb20] sm:$0xff]  ;;  %v4499_v57 = vpack.c.bf16 %v884_v50, %v876_v49  ;;  %v914_v62 = vld [vmem:[#allocation7 + $0xc68] sm:$0xff] }
 0x2c4   :  { %4480 = vmatprep.subr.bf16.mxu0 %v4479_v58  ;;  %v4489_v20 = vpack.c.bf16 %v835_v17, %v827_v12  ;;  %v883_v58 = vld [vmem:[#allocation7 + $0xb70] sm:$0xff]  ;;  %v4379_v11 = vpack.c.bf16 %v914_v62, %v906_v7  ;;  %v905_v12 = vld [vmem:[#allocation7 + $0xc20] sm:$0xff]  ;;  %v954_v49 = vld [vmem:[#allocation7 + $0xda8] sm:$0xff] }
 0x2c5   :  { %4354 = vmatpush1.bf16.msra.mxu1 %v4353_v61  ;;  %v892_v61 = vld [vmem:[#allocation7 + $0xbb8] sm:$0xff]  ;;  %v4501_v1 = vpack.c.bf16 %v883_v58, %v875_v55  ;;  %v907_v17 = vld [vmem:[#allocation7 + $0xc30] sm:$0xff]  ;;  %v962_v50 = vld [vmem:[#allocation7 + $0xde8] sm:$0xff] }
 0x2c6   :  { %4482 = vmatpush1.bf16.msra.mxu0 %v4481_v63  ;;  %4356 = vmatprep.subr.bf16.mxu1 %v4355_v0  ;;  %v900_v63 = vld [vmem:[#allocation7 + $0xbf8] sm:$0xff]  ;;  %v4373_v0 = vpack.c.bf16 %v881_v54, %v873_v53  ;;  %v4509_v23 = vpack.c.bf16 %v915_v15, %v907_v17  ;;  %v4517_v53 = vpack.c.bf16 %v947_v48, %v939_v46  ;;  %v953_v55 = vld [vmem:[#allocation7 + $0xda0] sm:$0xff]  ;;  %v955_v58 = vld [vmem:[#allocation7 + $0xdb0] sm:$0xff] }
 0x2c7   :  { %4484 = vmatprep.subr.bf16.mxu0 %v4483_v4  ;;  %v897_v4 = vld [vmem:[#allocation7 + $0xbe0] sm:$0xff]  ;;  %v4503_v6 = vpack.c.bf16 %v900_v63, %v892_v61  ;;  %v4391_v54 = vpack.c.bf16 %v962_v50, %v954_v49  ;;  %v970_v61 = vld [vmem:[#allocation7 + $0xe28] sm:$0xff]  ;;  %v979_v62 = vld [vmem:[#allocation7 + $0xe70] sm:$0xff] }
 0x2c8   :  { %v978_v63 = vld [vmem:[#allocation7 + $0xe68] sm:$0xff]  ;;  %v985_v17 = vld [vmem:[#allocation7 + $0xea0] sm:$0xff]  ;;  %v987_v15 = vld [vmem:[#allocation7 + $0xeb0] sm:$0xff] }
 0x2c9   :  { %4358 = vmatpush1.bf16.msra.mxu1 %v4357_v8  ;;  %v908_v8 = vld [vmem:[#allocation7 + $0xc38] sm:$0xff]  ;;  %v1017_v46 = vld [vmem:[#allocation7 + $0xfa0] sm:$0xff]  ;;  %v1019_v48 = vld [vmem:[#allocation7 + $0xfb0] sm:$0xff] }
 0x2ca   :  { %4486 = vmatpush1.bf16.msra.mxu0 %v4485_v9  ;;  %4360 = vmatprep.subr.bf16.mxu1 %v4359_v25  ;;  %v916_v9 = vld [vmem:[#allocation7 + $0xc78] sm:$0xff]  ;;  %v4377_v25 = vpack.c.bf16 %v897_v4, %v889_v3  ;;  %v4521_v3 = vpack.c.bf16 %v963_v60, %v955_v58  ;;  %v4395_v4 = vpack.c.bf16 %v978_v63, %v970_v61  ;;  %v1027_v50 = vld [vmem:[#allocation7 + $0xff0] sm:$0xff]  ;;  %v1663_v58 = vld [vmem:[#allocation10] sm:$0xff] }
 0x2cb   :  { %4488 = vmatprep.subr.bf16.mxu0 %v4487_v13  ;;  %v913_v13 = vld [vmem:[#allocation7 + $0xc60] sm:$0xff]  ;;  %v4507_v14 = vpack.c.bf16 %v916_v9, %v908_v8  ;;  %v986_v8 = vld [vmem:[#allocation7 + $0xea8] sm:$0xff]  ;;  %v1665_v60 = vld [vmem:[#allocation10 + $0x10] sm:$0xff] }
 0x2cc   :  { %v994_v9 = vld [vmem:[#allocation7 + $0xee8] sm:$0xff]  ;;  %v1672_v63 = vld [vmem:[#allocation10 + $0x48] sm:$0xff] }
 0x2cd   :  { %4362 = vmatpush1.bf16.msra.mxu1 %v4361_v19  ;;  %v924_v19 = vld [vmem:[#allocation7 + $0xcb8] sm:$0xff] }
 0x2ce   :  { %4490 = vmatpush1.bf16.msra.mxu0 %v4489_v20  ;;  %4364 = vmatprep.subr.bf16.mxu1 %v4363_v21  ;;  %v932_v20 = vld [vmem:[#allocation7 + $0xcf8] sm:$0xff]  ;;  %v4381_v21 = vpack.c.bf16 %v913_v13, %v905_v12  ;;  %v4525_v12 = vpack.c.bf16 %v979_v62, %v971_v34  ;;  %v4399_v13 = vpack.c.bf16 %v994_v9, %v986_v8  ;;  %v1679_v62 = vld [vmem:[#allocation10 + $0x80] sm:$0xff]  ;;  %v1686_v9 = vld [vmem:[#allocation10 + $0xb8] sm:$0xff] }
 0x2cf   :  { %4492 = vmatprep.subr.bf16.mxu0 %v4491_v27  ;;  %v929_v27 = vld [vmem:[#allocation7 + $0xce0] sm:$0xff]  ;;  %v4511_v29 = vpack.c.bf16 %v932_v20, %v924_v19  ;;  %v1002_v19 = vld [vmem:[#allocation7 + $0xf28] sm:$0xff]  ;;  %v1677_v34 = vld [vmem:[#allocation10 + $0x70] sm:$0xff] }
 0x2d0   :  { %v1010_v20 = vld [vmem:[#allocation7 + $0xf68] sm:$0xff] }
 0x2d1   :  { %4366 = vmatpush1.bf16.msra.mxu1 %v4365_v38  ;;  %v940_v38 = vld [vmem:[#allocation7 + $0xd38] sm:$0xff] }
 0x2d2   :  { %4494 = vmatpush1.bf16.msra.mxu0 %v4493_v39  ;;  %4368 = vmatprep.subr.bf16.mxu1 %v4367_v40  ;;  %v948_v39 = vld [vmem:[#allocation7 + $0xd78] sm:$0xff]  ;;  %v4385_v40 = vpack.c.bf16 %v929_v27, %v921_v26  ;;  %v4529_v26 = vpack.c.bf16 %v995_v18, %v987_v15  ;;  %v4403_v27 = vpack.c.bf16 %v1010_v20, %v1002_v19  ;;  %v1691_v15 = vld [vmem:[#allocation10 + $0xe0] sm:$0xff]  ;;  %v1700_v20 = vld [vmem:[#allocation10 + $0x128] sm:$0xff] }
 0x2d3   :  { %4496 = vmatprep.subr.bf16.mxu0 %v4495_v45  ;;  %v945_v45 = vld [vmem:[#allocation7 + $0xd60] sm:$0xff]  ;;  %v4515_v47 = vpack.c.bf16 %v948_v39, %v940_v38  ;;  %v1018_v38 = vld [vmem:[#allocation7 + $0xfa8] sm:$0xff]  ;;  %v1693_v18 = vld [vmem:[#allocation10 + $0xf0] sm:$0xff] }
 0x2d4   :  { %v1026_v39 = vld [vmem:[#allocation7 + $0xfe8] sm:$0xff] }
 0x2d5   :  { %4370 = vmatpush1.bf16.msra.mxu1 %v4369_v51  ;;  %v956_v51 = vld [vmem:[#allocation7 + $0xdb8] sm:$0xff] }
 0x2d6   :  { %4498 = vmatpush1.bf16.msra.mxu0 %v4497_v56  ;;  %4372 = vmatprep.subr.bf16.mxu1 %v4371_v52  ;;  %v964_v56 = vld [vmem:[#allocation7 + $0xdf8] sm:$0xff]  ;;  %v4389_v52 = vpack.c.bf16 %v945_v45, %v937_v44  ;;  %v4533_v44 = vpack.c.bf16 %v1011_v37, %v1003_v30  ;;  %v4407_v45 = vpack.c.bf16 %v1026_v39, %v1018_v38  ;;  %v1712_v30 = vld [vmem:[#allocation10 + $0x188] sm:$0xff]  ;;  %v1714_v38 = vld [vmem:[#allocation10 + $0x198] sm:$0xff] }
 0x2d7   :  { %4500 = vmatprep.subr.bf16.mxu0 %v4499_v57  ;;  %v961_v57 = vld [vmem:[#allocation7 + $0xde0] sm:$0xff]  ;;  %v4519_v59 = vpack.c.bf16 %v964_v56, %v956_v51  ;;  %v1664_v51 = vld [vmem:[#allocation10 + $0x8] sm:$0xff]  ;;  %v1671_v56 = vld [vmem:[#allocation10 + $0x40] sm:$0xff] }
 0x2d8   :  { %v1720_v39 = vld [vmem:[#allocation10 + $0x1c8] sm:$0xff] }
 0x2d9   :  { %4374 = vmatpush1.bf16.msra.mxu1 %v4373_v0  ;;  %v972_v0 = vld [vmem:[#allocation7 + $0xe38] sm:$0xff] }
 0x2da   :  { %4502 = vmatpush1.bf16.msra.mxu0 %v4501_v1  ;;  %4376 = vmatprep.subr.bf16.mxu1 %v4375_v2  ;;  %v980_v1 = vld [vmem:[#allocation7 + $0xe78] sm:$0xff]  ;;  %v4393_v2 = vpack.c.bf16 %v961_v57, %v953_v55  ;;  %v4537_v55 = vpack.c.bf16 %v1027_v50, %v1019_v48  ;;  %v4539_v57 = vpack.c.bf16 %v1671_v56, %v1664_v51  ;;  %v1726_v48 = vld [vmem:[#allocation10 + $0x1f8] sm:$0xff]  ;;  %v1728_v51 = vld [vmem:[#allocation10 + $0x208] sm:$0xff] }
 0x2db   :  { %4504 = vmatprep.subr.bf16.mxu0 %v4503_v6  ;;  %v977_v6 = vld [vmem:[#allocation7 + $0xe60] sm:$0xff]  ;;  %v4523_v7 = vpack.c.bf16 %v980_v1, %v972_v0  ;;  %v1685_v1 = vld [vmem:[#allocation10 + $0xb0] sm:$0xff] }
 0x2dc   :  { %v1678_v0 = vld [vmem:[#allocation10 + $0x78] sm:$0xff] }
 0x2dd   :  { %4378 = vmatpush1.bf16.msra.mxu1 %v4377_v25  ;;  %v988_v25 = vld [vmem:[#allocation7 + $0xeb8] sm:$0xff]  ;;  %v1734_v56 = vld [vmem:[#allocation10 + $0x238] sm:$0xff] }
 0x2de   :  { %4506 = vmatpush1.bf16.msra.mxu0 %v4505_v10  ;;  %4380 = vmatprep.subr.bf16.mxu1 %v4379_v11  ;;  %v996_v10 = vld [vmem:[#allocation7 + $0xef8] sm:$0xff]  ;;  %v4397_v11 = vpack.c.bf16 %v977_v6, %v969_v5  ;;  %v4797_v5 = vpack.c.bf16 %v1672_v63, %v1665_v60  ;;  %v4543_v6 = vpack.c.bf16 %v1685_v1, %v1678_v0  ;;  %v1740_v60 = vld [vmem:[#allocation10 + $0x268] sm:$0xff]  ;;  %v1742_v0 = vld [vmem:[#allocation10 + $0x278] sm:$0xff] }
 0x2df   :  { %4508 = vmatprep.subr.bf16.mxu0 %v4507_v14  ;;  %v993_v14 = vld [vmem:[#allocation7 + $0xee0] sm:$0xff]  ;;  %v4527_v16 = vpack.c.bf16 %v996_v10, %v988_v25  ;;  %v1692_v25 = vld [vmem:[#allocation10 + $0xe8] sm:$0xff]  ;;  %v1699_v10 = vld [vmem:[#allocation10 + $0x120] sm:$0xff] }
 0x2e0   :  { %v1748_v1 = vld [vmem:[#allocation10 + $0x2a8] sm:$0xff] }
 0x2e1   :  { %4382 = vmatpush1.bf16.msra.mxu1 %v4381_v21  ;;  %v1004_v21 = vld [vmem:[#allocation7 + $0xf38] sm:$0xff] }
 0x2e2   :  { %4510 = vmatpush1.bf16.msra.mxu0 %v4509_v23  ;;  %4384 = vmatprep.subr.bf16.mxu1 %v4383_v24  ;;  %v1012_v23 = vld [vmem:[#allocation7 + $0xf78] sm:$0xff]  ;;  %v4401_v24 = vpack.c.bf16 %v993_v14, %v985_v17  ;;  %v4801_v17 = vpack.c.bf16 %v1686_v9, %v1679_v62  ;;  %v4547_v14 = vpack.c.bf16 %v1699_v10, %v1692_v25  ;;  %v1754_v62 = vld [vmem:[#allocation10 + $0x2d8] sm:$0xff]  ;;  %v1756_v25 = vld [vmem:[#allocation10 + $0x2e8] sm:$0xff] }
 0x2e3   :  { %4512 = vmatprep.subr.bf16.mxu0 %v4511_v29  ;;  %v1009_v29 = vld [vmem:[#allocation7 + $0xf60] sm:$0xff]  ;;  %v4531_v31 = vpack.c.bf16 %v1012_v23, %v1004_v21  ;;  %v1713_v23 = vld [vmem:[#allocation10 + $0x190] sm:$0xff] }
 0x2e4   :  { %v1706_v21 = vld [vmem:[#allocation10 + $0x158] sm:$0xff] }
 0x2e5   :  { %4386 = vmatpush1.bf16.msra.mxu1 %v4385_v40  ;;  %v1020_v40 = vld [vmem:[#allocation7 + $0xfb8] sm:$0xff]  ;;  %v1762_v10 = vld [vmem:[#allocation10 + $0x318] sm:$0xff] }
 0x2e6   :  { %4514 = vmatpush1.bf16.msra.mxu0 %v4513_v42  ;;  %4388 = vmatprep.subr.bf16.mxu1 %v4387_v43  ;;  %v1028_v42 = vld [vmem:[#allocation7 + $0xff8] sm:$0xff]  ;;  %v4405_v43 = vpack.c.bf16 %v1009_v29, %v1001_v28  ;;  %v4551_v28 = vpack.c.bf16 %v1713_v23, %v1706_v21  ;;  %v1770_v21 = vld [vmem:[#allocation10 + $0x358] sm:$0xff]  ;;  %v1776_v23 = vld [vmem:[#allocation10 + $0x388] sm:$0xff] }
 0x2e7   :  { %4516 = vmatprep.subr.bf16.mxu0 %v4515_v47  ;;  %v1025_v47 = vld [vmem:[#allocation7 + $0xfe0] sm:$0xff]  ;;  %v4535_v49 = vpack.c.bf16 %v1028_v42, %v1020_v40  ;;  %v1705_v29 = vld [vmem:[#allocation10 + $0x150] sm:$0xff]  ;;  %v1727_v40 = vld [vmem:[#allocation10 + $0x200] sm:$0xff] }
 0x2e8   :  { %v1722_v42 = vld [vmem:[#allocation10 + $0x1d8] sm:$0xff] }
 0x2e9   :  { %4390 = vmatpush1.bf16.msra.mxu1 %v4389_v52  ;;  %v1666_v52 = vld [vmem:[#allocation10 + $0x18] sm:$0xff] }
 0x2ea   :  { %4518 = vmatpush1.bf16.msra.mxu0 %v4517_v53  ;;  %4392 = vmatprep.subr.bf16.mxu1 %v4391_v54  ;;  %v1673_v53 = vld [vmem:[#allocation10 + $0x50] sm:$0xff]  ;;  %v4409_v54 = vpack.c.bf16 %v1025_v47, %v1017_v46  ;;  %v4555_v46 = vpack.c.bf16 %v1727_v40, %v1720_v39  ;;  %v1719_v47 = vld [vmem:[#allocation10 + $0x1c0] sm:$0xff]  ;;  %v1784_v39 = vld [vmem:[#allocation10 + $0x3c8] sm:$0xff] }
 0x2eb   :  { %4520 = vmatprep.subr.bf16.mxu0 %v4519_v59  ;;  %v1670_v59 = vld [vmem:[#allocation10 + $0x38] sm:$0xff]  ;;  %v4795_v61 = vpack.c.bf16 %v1673_v53, %v1666_v52  ;;  %v1741_v52 = vld [vmem:[#allocation10 + $0x270] sm:$0xff]  ;;  %v1736_v53 = vld [vmem:[#allocation10 + $0x248] sm:$0xff] }
 0x2ec   :  { %v1790_v40 = vld [vmem:[#allocation10 + $0x3f8] sm:$0xff] }
 0x2ed   :  { %4394 = vmatpush1.bf16.msra.mxu1 %v4393_v2  ;;  %v1680_v2 = vld [vmem:[#allocation10 + $0x88] sm:$0xff] }
 0x2ee   :  { %4522 = vmatpush1.bf16.msra.mxu0 %v4521_v3  ;;  %4396 = vmatprep.subr.bf16.mxu1 %v4395_v4  ;;  %v1687_v3 = vld [vmem:[#allocation10 + $0xc0] sm:$0xff]  ;;  %v4541_v4 = vpack.c.bf16 %v1670_v59, %v1663_v58  ;;  %v4559_v58 = vpack.c.bf16 %v1741_v52, %v1734_v56  ;;  %v1733_v59 = vld [vmem:[#allocation10 + $0x230] sm:$0xff]  ;;  %v1798_v56 = vld [vmem:[#allocation10 + $0x438] sm:$0xff] }
 0x2ef   :  { %4524 = vmatprep.subr.bf16.mxu0 %v4523_v7  ;;  %v1684_v7 = vld [vmem:[#allocation10 + $0xa8] sm:$0xff]  ;;  %v4799_v8 = vpack.c.bf16 %v1687_v3, %v1680_v2  ;;  %v1755_v2 = vld [vmem:[#allocation10 + $0x2e0] sm:$0xff]  ;;  %v1750_v3 = vld [vmem:[#allocation10 + $0x2b8] sm:$0xff] }
 0x2f0   :  { %v1804_v52 = vld [vmem:[#allocation10 + $0x468] sm:$0xff] }
 0x2f1   :  { %4398 = vmatpush1.bf16.msra.mxu1 %v4397_v11  ;;  %v1694_v11 = vld [vmem:[#allocation10 + $0xf8] sm:$0xff] }
 0x2f2   :  { %4526 = vmatpush1.bf16.msra.mxu0 %v4525_v12  ;;  %4400 = vmatprep.subr.bf16.mxu1 %v4399_v13  ;;  %v1701_v12 = vld [vmem:[#allocation10 + $0x130] sm:$0xff]  ;;  %v4545_v13 = vpack.c.bf16 %v1684_v7, %v1677_v34  ;;  %v4563_v34 = vpack.c.bf16 %v1755_v2, %v1748_v1  ;;  %v1747_v7 = vld [vmem:[#allocation10 + $0x2a0] sm:$0xff]  ;;  %v1812_v1 = vld [vmem:[#allocation10 + $0x4a8] sm:$0xff] }
 0x2f3   :  { %4528 = vmatprep.subr.bf16.mxu0 %v4527_v16  ;;  %v1698_v16 = vld [vmem:[#allocation10 + $0x118] sm:$0xff]  ;;  %v4803_v19 = vpack.c.bf16 %v1701_v12, %v1694_v11  ;;  %v1769_v11 = vld [vmem:[#allocation10 + $0x350] sm:$0xff]  ;;  %v1764_v12 = vld [vmem:[#allocation10 + $0x328] sm:$0xff] }
 0x2f4   :  { %v1818_v2 = vld [vmem:[#allocation10 + $0x4d8] sm:$0xff] }
 0x2f5   :  { %4402 = vmatpush1.bf16.msra.mxu1 %v4401_v24  ;;  %v1708_v24 = vld [vmem:[#allocation10 + $0x168] sm:$0xff] }
 0x2f6   :  { %4530 = vmatpush1.bf16.msra.mxu0 %v4529_v26  ;;  %4404 = vmatprep.subr.bf16.mxu1 %v4403_v27  ;;  %v1715_v26 = vld [vmem:[#allocation10 + $0x1a0] sm:$0xff]  ;;  %v4549_v27 = vpack.c.bf16 %v1698_v16, %v1691_v15  ;;  %v4567_v15 = vpack.c.bf16 %v1769_v11, %v1762_v10  ;;  %v1761_v16 = vld [vmem:[#allocation10 + $0x310] sm:$0xff]  ;;  %v1826_v10 = vld [vmem:[#allocation10 + $0x518] sm:$0xff] }
 0x2f7   :  { %4532 = vmatprep.subr.bf16.mxu0 %v4531_v31  ;;  %v1707_v31 = vld [vmem:[#allocation10 + $0x160] sm:$0xff]  ;;  %v4807_v37 = vpack.c.bf16 %v1715_v26, %v1708_v24  ;;  %v1778_v26 = vld [vmem:[#allocation10 + $0x398] sm:$0xff]  ;;  %v1832_v11 = vld [vmem:[#allocation10 + $0x548] sm:$0xff] }
 0x2f8   :  { %v1783_v24 = vld [vmem:[#allocation10 + $0x3c0] sm:$0xff] }
 0x2f9   :  { %4406 = vmatpush1.bf16.msra.mxu1 %v4405_v43  ;;  %v1729_v43 = vld [vmem:[#allocation10 + $0x210] sm:$0xff] }
 0x2fa   :  { %4534 = vmatpush1.bf16.msra.mxu0 %v4533_v44  ;;  %4408 = vmatprep.subr.bf16.mxu1 %v4407_v45  ;;  %v4553_v44 = vpack.c.bf16 %v1712_v30, %v1705_v29  ;;  %v4809_v45 = vpack.c.bf16 %v1714_v38, %v1707_v31  ;;  %v4811_v50 = vpack.c.bf16 %v1729_v43, %v1722_v42  ;;  %v1775_v30 = vld [vmem:[#allocation10 + $0x380] sm:$0xff]  ;;  %v1782_v31 = vld [vmem:[#allocation10 + $0x3b8] sm:$0xff]  ;;  %v1797_v42 = vld [vmem:[#allocation10 + $0x430] sm:$0xff] }
 0x2fb   :  { %4536 = vmatprep.subr.bf16.mxu0 %v4535_v49  ;;  %v1721_v49 = vld [vmem:[#allocation10 + $0x1d0] sm:$0xff]  ;;  %v4571_v29 = vpack.c.bf16 %v1783_v24, %v1776_v23  ;;  %v1792_v43 = vld [vmem:[#allocation10 + $0x408] sm:$0xff]  ;;  %v1846_v24 = vld [vmem:[#allocation10 + $0x5b8] sm:$0xff] }
 0x2fc   :  { %v1840_v23 = vld [vmem:[#allocation10 + $0x588] sm:$0xff] }
 0x2fd   :  { %4410 = vmatpush1.bf16.msra.mxu1 %v4409_v54  ;;  %v1743_v54 = vld [vmem:[#allocation10 + $0x280] sm:$0xff] }
 0x2fe   :  { %4538 = vmatpush1.bf16.msra.mxu0 %v4537_v55  ;;  %4540 = vmatprep.subr.bf16.mxu1 %v4539_v57  ;;  %v4557_v55 = vpack.c.bf16 %v1726_v48, %v1719_v47  ;;  %v4813_v57 = vpack.c.bf16 %v1728_v51, %v1721_v49  ;;  %v4815_v63 = vpack.c.bf16 %v1743_v54, %v1736_v53  ;;  %v1789_v48 = vld [vmem:[#allocation10 + $0x3f0] sm:$0xff]  ;;  %v1796_v49 = vld [vmem:[#allocation10 + $0x428] sm:$0xff]  ;;  %v1811_v53 = vld [vmem:[#allocation10 + $0x4a0] sm:$0xff] }
 0x2ff   :  { %4796 = vmatprep.subr.bf16.mxu0 %v4795_v61  ;;  %v1735_v61 = vld [vmem:[#allocation10 + $0x240] sm:$0xff]  ;;  %v4575_v47 = vpack.c.bf16 %v1797_v42, %v1790_v40  ;;  %v1806_v54 = vld [vmem:[#allocation10 + $0x478] sm:$0xff]  ;;  %v1860_v42 = vld [vmem:[#allocation10 + $0x628] sm:$0xff] }
 0x300   :  { %1491 = vmatmul.mubr.f32.vlgmr.msra.gmra.mrb[2].mxu1 %v5868_v22  ;;  %v1854_v40 = vld [vmem:[#allocation10 + $0x5f8] sm:$0xff] }
 0x301   :  { %1633 = vmatmul.mubr.f32.vlgmr.msra.gmra.mrb[8].mxu0 %v5868_v22  ;;  %4542 = vmatpush1.bf16.msra.mxu1 %v4541_v4  ;;  %v4805_v22 = vpack.c.bf16 %v1700_v20, %v1693_v18  ;;  %v1757_v4 = vld [vmem:[#allocation10 + $0x2f0] sm:$0xff]  ;;  %v1768_v18 = vld [vmem:[#allocation10 + $0x348] sm:$0xff] }
 0x302   :  { %4798 = vmatpush1.bf16.msra.mxu0 %v4797_v5  ;;  %4544 = vmatprep.subr.bf16.mxu1 %v4543_v6  ;;  %v4561_v5 = vpack.c.bf16 %v1740_v60, %v1733_v59  ;;  %v4817_v6 = vpack.c.bf16 %v1742_v0, %v1735_v61  ;;  %v4819_v9 = vpack.c.bf16 %v1757_v4, %v1750_v3  ;;  %v1803_v60 = vld [vmem:[#allocation10 + $0x460] sm:$0xff]  ;;  %v1810_v61 = vld [vmem:[#allocation10 + $0x498] sm:$0xff]  ;;  %v1825_v3 = vld [vmem:[#allocation10 + $0x510] sm:$0xff] }
 0x303   :  { %4800 = vmatprep.subr.bf16.mxu0 %v4799_v8  ;;  %v1749_v8 = vld [vmem:[#allocation10 + $0x2b0] sm:$0xff]  ;;  %v4579_v59 = vpack.c.bf16 %v1811_v53, %v1804_v52  ;;  %v1820_v4 = vld [vmem:[#allocation10 + $0x4e8] sm:$0xff]  ;;  %v1874_v53 = vld [vmem:[#allocation10 + $0x698] sm:$0xff] }
 0x304   :  { %v1868_v52 = vld [vmem:[#allocation10 + $0x668] sm:$0xff] }
 0x305   :  { %4546 = vmatpush1.bf16.msra.mxu1 %v4545_v13  ;;  %v1771_v13 = vld [vmem:[#allocation10 + $0x360] sm:$0xff] }
 0x306   :  { %4802 = vmatpush1.bf16.msra.mxu0 %v4801_v17  ;;  %4548 = vmatprep.subr.bf16.mxu1 %v4547_v14  ;;  %v4565_v17 = vpack.c.bf16 %v1754_v62, %v1747_v7  ;;  %v4821_v14 = vpack.c.bf16 %v1756_v25, %v1749_v8  ;;  %v4823_v20 = vpack.c.bf16 %v1771_v13, %v1764_v12  ;;  %v1817_v62 = vld [vmem:[#allocation10 + $0x4d0] sm:$0xff]  ;;  %v1824_v8 = vld [vmem:[#allocation10 + $0x508] sm:$0xff]  ;;  %v1839_v12 = vld [vmem:[#allocation10 + $0x580] sm:$0xff] }
 0x307   :  { %4804 = vmatprep.subr.bf16.mxu0 %v4803_v19  ;;  %v1763_v19 = vld [vmem:[#allocation10 + $0x320] sm:$0xff]  ;;  %v4583_v7 = vpack.c.bf16 %v1825_v3, %v1818_v2  ;;  %v1834_v13 = vld [vmem:[#allocation10 + $0x558] sm:$0xff]  ;;  %v1888_v3 = vld [vmem:[#allocation10 + $0x708] sm:$0xff] }
 0x308   :  { %v1882_v2 = vld [vmem:[#allocation10 + $0x6d8] sm:$0xff] }
 0x309   :  { %4550 = vmatpush1.bf16.msra.mxu1 %v4549_v27  ;;  %v1785_v27 = vld [vmem:[#allocation10 + $0x3d0] sm:$0xff] }
 0x30a   :  { %4806 = vmatpush1.bf16.msra.mxu0 %v4805_v22  ;;  %4552 = vmatprep.subr.bf16.mxu1 %v4551_v28  ;;  %v4569_v22 = vpack.c.bf16 %v1768_v18, %v1761_v16  ;;  %v4825_v28 = vpack.c.bf16 %v1770_v21, %v1763_v19  ;;  %v4827_v38 = vpack.c.bf16 %v1785_v27, %v1778_v26  ;;  %v1831_v18 = vld [vmem:[#allocation10 + $0x540] sm:$0xff]  ;;  %v1838_v19 = vld [vmem:[#allocation10 + $0x578] sm:$0xff]  ;;  %v1853_v26 = vld [vmem:[#allocation10 + $0x5f0] sm:$0xff] }
 0x30b   :  { %4808 = vmatprep.subr.bf16.mxu0 %v4807_v37  ;;  %v1777_v37 = vld [vmem:[#allocation10 + $0x390] sm:$0xff]  ;;  %v4587_v16 = vpack.c.bf16 %v1839_v12, %v1832_v11  ;;  %v1848_v27 = vld [vmem:[#allocation10 + $0x5c8] sm:$0xff] }
 0x30d   :  { %4554 = vmatpush1.bf16.msra.mxu1 %v4553_v44  ;;  %v1799_v44 = vld [vmem:[#allocation10 + $0x440] sm:$0xff] }
 0x30e   :  { %4810 = vmatpush1.bf16.msra.mxu0 %v4809_v45  ;;  %4556 = vmatprep.subr.bf16.mxu1 %v4555_v46  ;;  %v4573_v45 = vpack.c.bf16 %v1782_v31, %v1775_v30  ;;  %v4829_v46 = vpack.c.bf16 %v1784_v39, %v1777_v37  ;;  %v4831_v51 = vpack.c.bf16 %v1799_v44, %v1792_v43  ;;  %v1845_v31 = vld [vmem:[#allocation10 + $0x5b0] sm:$0xff]  ;;  %v1852_v37 = vld [vmem:[#allocation10 + $0x5e8] sm:$0xff]  ;;  %v1867_v43 = vld [vmem:[#allocation10 + $0x660] sm:$0xff] }
 0x30f   :  { %4812 = vmatprep.subr.bf16.mxu0 %v4811_v50  ;;  %v1791_v50 = vld [vmem:[#allocation10 + $0x400] sm:$0xff]  ;;  %v4591_v30 = vpack.c.bf16 %v1853_v26, %v1846_v24  ;;  %v1862_v44 = vld [vmem:[#allocation10 + $0x638] sm:$0xff] }
 0x310   :  { %v1902_v26 = vld [vmem:[#allocation10 + $0x778] sm:$0xff] }
 0x311   :  { %4558 = vmatpush1.bf16.msra.mxu1 %v4557_v55  ;;  %v1813_v55 = vld [vmem:[#allocation10 + $0x4b0] sm:$0xff] }
 0x312   :  { %4814 = vmatpush1.bf16.msra.mxu0 %v4813_v57  ;;  %4560 = vmatprep.subr.bf16.mxu1 %v4559_v58  ;;  %v4577_v57 = vpack.c.bf16 %v1796_v49, %v1789_v48  ;;  %v4833_v58 = vpack.c.bf16 %v1798_v56, %v1791_v50  ;;  %v4835_v0 = vpack.c.bf16 %v1813_v55, %v1806_v54  ;;  %v1859_v49 = vld [vmem:[#allocation10 + $0x620] sm:$0xff]  ;;  %v1866_v50 = vld [vmem:[#allocation10 + $0x658] sm:$0xff]  ;;  %v1881_v54 = vld [vmem:[#allocation10 + $0x6d0] sm:$0xff] }
 0x313   :  { %4816 = vmatprep.subr.bf16.mxu0 %v4815_v63  ;;  %v1805_v63 = vld [vmem:[#allocation10 + $0x470] sm:$0xff]  ;;  %v4595_v48 = vpack.c.bf16 %v1867_v43, %v1860_v42  ;;  %v1876_v55 = vld [vmem:[#allocation10 + $0x6a8] sm:$0xff]  ;;  %v1903_v42 = vld [vmem:[#allocation10 + $0x780] sm:$0xff] }
 0x314   :  { %v1910_v43 = vld [vmem:[#allocation10 + $0x7b8] sm:$0xff] }
 0x315   :  { %4562 = vmatpush1.bf16.msra.mxu1 %v4561_v5  ;;  %v1827_v5 = vld [vmem:[#allocation10 + $0x520] sm:$0xff] }
 0x316   :  { %4818 = vmatpush1.bf16.msra.mxu0 %v4817_v6  ;;  %4564 = vmatprep.subr.bf16.mxu1 %v4563_v34  ;;  %v4581_v6 = vpack.c.bf16 %v1810_v61, %v1803_v60  ;;  %v4837_v34 = vpack.c.bf16 %v1812_v1, %v1805_v63  ;;  %v4839_v25 = vpack.c.bf16 %v1827_v5, %v1820_v4  ;;  %v1873_v61 = vld [vmem:[#allocation10 + $0x690] sm:$0xff]  ;;  %v1880_v63 = vld [vmem:[#allocation10 + $0x6c8] sm:$0xff]  ;;  %v1895_v4 = vld [vmem:[#allocation10 + $0x740] sm:$0xff] }
 0x317   :  { %4820 = vmatprep.subr.bf16.mxu0 %v4819_v9  ;;  %v1819_v9 = vld [vmem:[#allocation10 + $0x4e0] sm:$0xff]  ;;  %v4599_v60 = vpack.c.bf16 %v1881_v54, %v1874_v53  ;;  %v1890_v5 = vld [vmem:[#allocation10 + $0x718] sm:$0xff] }
 0x318   :  { %v1915_v53 = vld [vmem:[#allocation10 + $0x7e0] sm:$0xff]  ;;  %v1922_v54 = vld [vmem:[#allocation10 + $0x818] sm:$0xff] }
 0x319   :  { %4566 = vmatpush1.bf16.msra.mxu1 %v4565_v17  ;;  %v1841_v17 = vld [vmem:[#allocation10 + $0x590] sm:$0xff] }
 0x31a   :  { %4822 = vmatpush1.bf16.msra.mxu0 %v4821_v14  ;;  %4568 = vmatprep.subr.bf16.mxu1 %v4567_v15  ;;  %v4585_v14 = vpack.c.bf16 %v1824_v8, %v1817_v62  ;;  %v4841_v15 = vpack.c.bf16 %v1826_v10, %v1819_v9  ;;  %v4843_v21 = vpack.c.bf16 %v1841_v17, %v1834_v13  ;;  %v5880_v9 = vld [vmem:[#allocation9] sm:$0xff] }
 0x31b   :  { %4824 = vmatprep.subr.bf16.mxu0 %v4823_v20  ;;  %v1833_v20 = vld [vmem:[#allocation10 + $0x550] sm:$0xff]  ;;  %v4603_v62 = vpack.c.bf16 %v1895_v4, %v1888_v3  ;;  %v1038_v10 = vrot.slane %v5880_v9, %v5839_v35  ;;  %v1046_v11 = vrot.slane %v5880_v9, %v5857_v41  ;;  %v1936_v4 = vld [vmem:[#allocation10 + $0x888] sm:$0xff] }
 0x31c   :  { %v1929_v3 = vld [vmem:[#allocation10 + $0x850] sm:$0xff] }
 0x31d   :  { %4570 = vmatpush1.bf16.msra.mxu1 %v4569_v22  ;;  %v1855_v22 = vld [vmem:[#allocation10 + $0x600] sm:$0xff] }
 0x31e   :  { %4826 = vmatpush1.bf16.msra.mxu0 %v4825_v28  ;;  %4572 = vmatprep.subr.bf16.mxu1 %v4571_v29  ;;  %v4589_v28 = vpack.c.bf16 %v1838_v19, %v1831_v18  ;;  %v4845_v29 = vpack.c.bf16 %v1840_v23, %v1833_v20  ;;  %v4847_v39 = vpack.c.bf16 %v1855_v22, %v1848_v27  ;;  %v1894_v20 = vld [vmem:[#allocation10 + $0x738] sm:$0xff]  ;;  %v1896_v23 = vld [vmem:[#allocation10 + $0x748] sm:$0xff]  ;;  %v1909_v27 = vld [vmem:[#allocation10 + $0x7b0] sm:$0xff] }
 0x31f   :  { %4828 = vmatprep.subr.bf16.mxu0 %v4827_v38  ;;  %v1847_v38 = vld [vmem:[#allocation10 + $0x5c0] sm:$0xff] }
 0x321   :  { %4574 = vmatpush1.bf16.msra.mxu1 %v4573_v45  ;;  %v1869_v45 = vld [vmem:[#allocation10 + $0x670] sm:$0xff] }
 0x322   :  { %4830 = vmatpush1.bf16.msra.mxu0 %v4829_v46  ;;  %4576 = vmatprep.subr.bf16.mxu1 %v4575_v47  ;;  %v4593_v46 = vpack.c.bf16 %v1852_v37, %v1845_v31  ;;  %v4849_v47 = vpack.c.bf16 %v1854_v40, %v1847_v38  ;;  %v4851_v56 = vpack.c.bf16 %v1869_v45, %v1862_v44  ;;  %v1901_v38 = vld [vmem:[#allocation10 + $0x770] sm:$0xff]  ;;  %v1916_v44 = vld [vmem:[#allocation10 + $0x7e8] sm:$0xff] }
 0x323   :  { %4832 = vmatprep.subr.bf16.mxu0 %v4831_v51  ;;  %v1861_v51 = vld [vmem:[#allocation10 + $0x630] sm:$0xff] }
 0x325   :  { %4578 = vmatpush1.bf16.msra.mxu1 %v4577_v57  ;;  %v1883_v57 = vld [vmem:[#allocation10 + $0x6e0] sm:$0xff] }
 0x326   :  { %4834 = vmatpush1.bf16.msra.mxu0 %v4833_v58  ;;  %4580 = vmatprep.subr.bf16.mxu1 %v4579_v59  ;;  %v4597_v58 = vpack.c.bf16 %v1866_v50, %v1859_v49  ;;  %v4853_v59 = vpack.c.bf16 %v1868_v52, %v1861_v51  ;;  %v4855_v1 = vpack.c.bf16 %v1883_v57, %v1876_v55  ;;  %v1918_v49 = vld [vmem:[#allocation10 + $0x7f8] sm:$0xff]  ;;  %v1925_v50 = vld [vmem:[#allocation10 + $0x830] sm:$0xff] }
 0x327   :  { %4836 = vmatprep.subr.bf16.mxu0 %v4835_v0  ;;  %v1875_v0 = vld [vmem:[#allocation10 + $0x6a0] sm:$0xff]  ;;  %v4865_v52 = vpack.c.bf16 %v1910_v43, %v1903_v42  ;;  %v4867_v57 = vpack.c.bf16 %v1925_v50, %v1918_v49  ;;  %v1974_v42 = vld [vmem:[#allocation10 + $0x9b8] sm:$0xff]  ;;  %v1981_v43 = vld [vmem:[#allocation10 + $0x9f0] sm:$0xff] }
 0x328   :  { %v4883_v50 = vpack.c.bf16 %v1981_v43, %v1974_v42 }
 0x329   :  { %4582 = vmatpush1.bf16.msra.mxu1 %v4581_v6  ;;  %v1897_v6 = vld [vmem:[#allocation10 + $0x750] sm:$0xff] }
 0x32a   :  { %4838 = vmatpush1.bf16.msra.mxu0 %v4837_v34  ;;  %4584 = vmatprep.subr.bf16.mxu1 %v4583_v7  ;;  %v4601_v34 = vpack.c.bf16 %v1880_v63, %v1873_v61  ;;  %v4857_v7 = vpack.c.bf16 %v1882_v2, %v1875_v0  ;;  %v4859_v8 = vpack.c.bf16 %v1897_v6, %v1890_v5  ;;  %v1937_v61 = vld [vmem:[#allocation10 + $0x890] sm:$0xff]  ;;  %v1932_v63 = vld [vmem:[#allocation10 + $0x868] sm:$0xff]  ;;  %v1939_v0 = vld [vmem:[#allocation10 + $0x8a0] sm:$0xff] }
 0x32b   :  { %4840 = vmatprep.subr.bf16.mxu0 %v4839_v25  ;;  %v1034_v25 = vrot.slane %v5880_v9, %v5834_v33  ;;  %v4871_v6 = vpack.c.bf16 %v1939_v0, %v1932_v63 }
 0x32d   :  { %4586 = vmatpush1.bf16.msra.mxu1 %v4585_v14 }
 0x32e   :  { %4842 = vmatpush1.bf16.msra.mxu0 %v4841_v15  ;;  %4588 = vmatprep.subr.bf16.mxu1 %v4587_v16  ;;  %v1887_v16 = vld [vmem:[#allocation10 + $0x700] sm:$0xff] }
 0x32f   :  { %4844 = vmatprep.subr.bf16.mxu0 %v4843_v21  ;;  %v1889_v21 = vld [vmem:[#allocation10 + $0x710] sm:$0xff]  ;;  %v4605_v31 = vpack.c.bf16 %v1894_v20, %v1887_v16  ;;  %v1958_v20 = vld [vmem:[#allocation10 + $0x938] sm:$0xff] }
 0x330   :  { %v4861_v37 = vpack.c.bf16 %v1896_v23, %v1889_v21  ;;  %v1965_v21 = vld [vmem:[#allocation10 + $0x970] sm:$0xff]  ;;  %v1960_v23 = vld [vmem:[#allocation10 + $0x948] sm:$0xff] }
 0x331   :  { %4590 = vmatpush1.bf16.msra.mxu1 %v4589_v28  ;;  %v1904_v28 = vld [vmem:[#allocation10 + $0x788] sm:$0xff] }
 0x332   :  { %4846 = vmatpush1.bf16.msra.mxu0 %v4845_v29  ;;  %4592 = vmatprep.subr.bf16.mxu1 %v4591_v30  ;;  %v1911_v29 = vld [vmem:[#allocation10 + $0x7c0] sm:$0xff] }
 0x333   :  { %4848 = vmatprep.subr.bf16.mxu0 %v4847_v39  ;;  %v1908_v39 = vld [vmem:[#allocation10 + $0x7a8] sm:$0xff] }
 0x335   :  { %4594 = vmatpush1.bf16.msra.mxu1 %v4593_v46  ;;  %v4607_v46 = vpack.c.bf16 %v1909_v27, %v1902_v26 }
 0x336   :  { %4850 = vmatpush1.bf16.msra.mxu0 %v4849_v47  ;;  %4596 = vmatprep.subr.bf16.mxu1 %v4595_v48  ;;  %v4863_v47 = vpack.c.bf16 %v1911_v29, %v1904_v28  ;;  %v1923_v48 = vld [vmem:[#allocation10 + $0x820] sm:$0xff]  ;;  %v1964_v28 = vld [vmem:[#allocation10 + $0x968] sm:$0xff]  ;;  %v4623_v29 = vpack.c.bf16 %v1965_v21, %v1958_v20  ;;  %v2013_v20 = vld [vmem:[#allocation10 + $0xaf0] sm:$0xff] }
 0x337   :  { %4852 = vmatprep.subr.bf16.mxu0 %v4851_v56  ;;  %v4609_v56 = vpack.c.bf16 %v1908_v39, %v1901_v38  ;;  %v4611_v55 = vpack.c.bf16 %v1923_v48, %v1916_v44  ;;  %v1972_v38 = vld [vmem:[#allocation10 + $0x9a8] sm:$0xff]  ;;  %v1979_v39 = vld [vmem:[#allocation10 + $0x9e0] sm:$0xff]  ;;  %v1978_v48 = vld [vmem:[#allocation10 + $0x9d8] sm:$0xff] }
 0x338   :  { %v4627_v49 = vpack.c.bf16 %v1979_v39, %v1972_v38  ;;  %v2020_v21 = vld [vmem:[#allocation10 + $0xb28] sm:$0xff]  ;;  %v2027_v38 = vld [vmem:[#allocation10 + $0xb60] sm:$0xff]  ;;  %v2034_v39 = vld [vmem:[#allocation10 + $0xb98] sm:$0xff] }
 0x339   :  { %4598 = vmatpush1.bf16.msra.mxu1 %v4597_v58  ;;  %v1917_v58 = vld [vmem:[#allocation10 + $0x7f0] sm:$0xff] }
 0x33a   :  { %4854 = vmatpush1.bf16.msra.mxu0 %v4853_v59  ;;  %4600 = vmatprep.subr.bf16.mxu1 %v4599_v60  ;;  %v1924_v59 = vld [vmem:[#allocation10 + $0x828] sm:$0xff]  ;;  %v1930_v60 = vld [vmem:[#allocation10 + $0x858] sm:$0xff] }
 0x33b   :  { %4856 = vmatprep.subr.bf16.mxu0 %v4855_v1  ;;  %v4613_v1 = vpack.c.bf16 %v1922_v54, %v1915_v53  ;;  %v4869_v2 = vpack.c.bf16 %v1924_v59, %v1917_v58  ;;  %v4615_v5 = vpack.c.bf16 %v1937_v61, %v1930_v60  ;;  %v1986_v53 = vld [vmem:[#allocation10 + $0xa18] sm:$0xff]  ;;  %v1993_v54 = vld [vmem:[#allocation10 + $0xa50] sm:$0xff]  ;;  %v1992_v61 = vld [vmem:[#allocation10 + $0xa48] sm:$0xff] }
 0x33c   :  { %v1985_v60 = vld [vmem:[#allocation10 + $0xa10] sm:$0xff]  ;;  %v4631_v63 = vpack.c.bf16 %v1993_v54, %v1986_v53  ;;  %v2048_v54 = vld [vmem:[#allocation10 + $0xc08] sm:$0xff] }
 0x33d   :  { %4602 = vmatpush1.bf16.msra.mxu1 %v4601_v34  ;;  %v1931_v34 = vld [vmem:[#allocation10 + $0x860] sm:$0xff]  ;;  %v2041_v53 = vld [vmem:[#allocation10 + $0xbd0] sm:$0xff] }
 0x33e   :  { %4858 = vmatpush1.bf16.msra.mxu0 %v4857_v7  ;;  %4604 = vmatprep.subr.bf16.mxu1 %v4603_v62  ;;  %v1938_v7 = vld [vmem:[#allocation10 + $0x898] sm:$0xff]  ;;  %v1944_v62 = vld [vmem:[#allocation10 + $0x8c8] sm:$0xff] }
 0x33f   :  { %4860 = vmatprep.subr.bf16.mxu0 %v4859_v8  ;;  %v1951_v8 = vld [vmem:[#allocation10 + $0x900] sm:$0xff] }
 0x353   :  { %v1208_v12 = vpop.f32.mrb[0].mxu1  ;;  %v5888_v13 = vpop.f32.mrb[6].mxu0 }
 0x354   :  { %v5435_v17 = vadd.f32 %v1208_v12, %v1034_v25  ;;  %v1210_v14 = vpop.f32.mrb[1].mxu1  ;;  %v1352_v15 = vpop.f32.mrb[7].mxu0  ;;  %v1946_v25 = vld [vmem:[#allocation10 + $0x8d8] sm:$0xff]  ;;  %v4873_v12 = vpack.c.bf16 %v1938_v7, %v1931_v34  ;;  %v4633_v34 = vpack.c.bf16 %v1992_v61, %v1985_v60  ;;  %v2056_v60 = vld [vmem:[#allocation10 + $0xc48] sm:$0xff]  ;;  %v2063_v61 = vld [vmem:[#allocation10 + $0xc80] sm:$0xff] }
 0x355   :  { %v5436_v18 = vadd.f32 %v1210_v14, %v1038_v10  ;;  %v5438_v19 = vadd.f32 %v1352_v15, %v1046_v11  ;;  %v1953_v10 = vld [vmem:[#allocation10 + $0x910] sm:$0xff]  ;;  %v4617_v11 = vpack.c.bf16 %v1936_v4, %v1929_v3  ;;  %v1950_v14 = vld [vmem:[#allocation10 + $0x8f8] sm:$0xff]  ;;  %v4619_v15 = vpack.c.bf16 %v1951_v8, %v1944_v62  ;;  %v2000_v3 = vld [vmem:[#allocation10 + $0xa88] sm:$0xff] }
 0x356   :  { %v1647_v24 = vmul.f32 0.2, %v5435_v17  ;;  %vm1639_vm7 = vcmp.gt.f32.partialorder %v5435_v17, 0.0  ;;  %v4875_v16 = vpack.c.bf16 %v1953_v10, %v1946_v25  ;;  %v2007_v4 = vld [vmem:[#allocation10 + $0xac0] sm:$0xff]  ;;  %v2006_v8 = vld [vmem:[#allocation10 + $0xab8] sm:$0xff] }
 0x357   :  { %vm1640_vm8 = vcmp.gt.f32.partialorder %v5436_v18, 0.0  ;;  %v1648_v22 = vmul.f32 0.2, %v5436_v18  ;;  %v1650_v30 = vmul.f32 0.2, %v5438_v19  ;;  %vm1642_vm9 = vcmp.gt.f32.partialorder %v5438_v19, 0.0 }
 0x358   :  { %v5895_v45 = vsel %vm1639_vm7, %v5435_v17, %v1647_v24  ;;  %v1943_v17 = vld [vmem:[#allocation10 + $0x8c0] sm:$0xff]  ;;  %v4635_v25 = vpack.c.bf16 %v2007_v4, %v2000_v3  ;;  %v2062_v4 = vld [vmem:[#allocation10 + $0xc78] sm:$0xff] }
 0x359   :  { %v5890_v40 = vsel %vm1640_vm8, %v5436_v18, %v1648_v22  ;;  %v5900_v51 = vsel %vm1642_vm9, %v5438_v19, %v1650_v30  ;;  %v1945_v18 = vld [vmem:[#allocation10 + $0x8d0] sm:$0xff]  ;;  %v1952_v19 = vld [vmem:[#allocation10 + $0x908] sm:$0xff]  ;;  %v1967_v24 = vld [vmem:[#allocation10 + $0x980] sm:$0xff]  ;;  %v4621_v26 = vpack.c.bf16 %v1950_v14, %v1943_v17 }
 0x35a   :  { %2660 = vmatprep.mubr.f32.mxu1 %v5890_v40  ;;  %2944 = vmatprep.mubr.f32.mxu0 %v5890_v40  ;;  %v4877_v27 = vpack.c.bf16 %v1952_v19, %v1945_v18  ;;  %v1957_v22 = vld [vmem:[#allocation10 + $0x930] sm:$0xff]  ;;  %v4879_v30 = vpack.c.bf16 %v1967_v24, %v1960_v23  ;;  %v1999_v62 = vld [vmem:[#allocation10 + $0xa80] sm:$0xff]  ;;  %v2014_v17 = vld [vmem:[#allocation10 + $0xaf8] sm:$0xff] }
 0x35b   :  { %2661 = vmatmul.mubr.f32.vlgmr.msra.gmra.mrb[4].mxu1 %v5895_v45  ;;  %2945 = vmatmul.mubr.f32.vlgmr.msra.gmra.mrb[10].mxu0 %v5895_v45  ;;  %v4625_v44 = vpack.c.bf16 %v1964_v28, %v1957_v22  ;;  %v2021_v14 = vld [vmem:[#allocation10 + $0xb30] sm:$0xff]  ;;  %v4637_v18 = vpack.c.bf16 %v2006_v8, %v1999_v62  ;;  %v2028_v22 = vld [vmem:[#allocation10 + $0xb68] sm:$0xff]  ;;  %v2035_v28 = vld [vmem:[#allocation10 + $0xba0] sm:$0xff] }
 0x35c   :  { %4606 = vmatpush1.bf16.msra.mxu1 %v4605_v31  ;;  %4862 = vmatpush1.bf16.msra.mxu0 %v4861_v37  ;;  %v1959_v31 = vld [vmem:[#allocation10 + $0x940] sm:$0xff]  ;;  %v1966_v37 = vld [vmem:[#allocation10 + $0x978] sm:$0xff]  ;;  %v4639_v23 = vpack.c.bf16 %v2021_v14, %v2014_v17  ;;  %v4643_v42 = vpack.c.bf16 %v2035_v28, %v2028_v22  ;;  %v2077_v8 = vld [vmem:[#allocation10 + $0xcf0] sm:$0xff] }
 0x35d   :  { %2731 = vmatprep.mubr.f32.mxu1 %v5900_v51  ;;  %3015 = vmatprep.mubr.f32.mxu0 %v5900_v51  ;;  %v2055_v3 = vld [vmem:[#allocation10 + $0xc40] sm:$0xff]  ;;  %v2070_v62 = vld [vmem:[#allocation10 + $0xcb8] sm:$0xff]  ;;  %v2069_v17 = vld [vmem:[#allocation10 + $0xcb0] sm:$0xff] }
 0x35e   :  { %4608 = vmatprep.subr.bf16.mxu1 %v4607_v46  ;;  %4864 = vmatprep.subr.bf16.mxu0 %v4863_v47  ;;  %v4881_v46 = vpack.c.bf16 %v1966_v37, %v1959_v31  ;;  %v1971_v47 = vld [vmem:[#allocation10 + $0x9a0] sm:$0xff]  ;;  %v4641_v31 = vpack.c.bf16 %v2020_v21, %v2013_v20  ;;  %v2076_v14 = vld [vmem:[#allocation10 + $0xce8] sm:$0xff]  ;;  %v2090_v28 = vld [vmem:[#allocation10 + $0xd58] sm:$0xff] }
 0x35f   :  { %v4629_v58 = vpack.c.bf16 %v1978_v48, %v1971_v47  ;;  %v2042_v47 = vld [vmem:[#allocation10 + $0xbd8] sm:$0xff]  ;;  %v2049_v48 = vld [vmem:[#allocation10 + $0xc10] sm:$0xff]  ;;  %v2084_v20 = vld [vmem:[#allocation10 + $0xd28] sm:$0xff] }
 0x360   :  { %4610 = vmatpush1.bf16.msra.mxu1 %v4609_v56  ;;  %4866 = vmatpush1.bf16.msra.mxu0 %v4865_v52  ;;  %v1973_v56 = vld [vmem:[#allocation10 + $0x9b0] sm:$0xff]  ;;  %v1980_v52 = vld [vmem:[#allocation10 + $0x9e8] sm:$0xff]  ;;  %v2091_v21 = vld [vmem:[#allocation10 + $0xd60] sm:$0xff] }
 0x361   :  { %4612 = vmatprep.subr.bf16.mxu1 %v4611_v55  ;;  %4868 = vmatprep.subr.bf16.mxu0 %v4867_v57  ;;  %v1988_v55 = vld [vmem:[#allocation10 + $0xa28] sm:$0xff]  ;;  %v1995_v57 = vld [vmem:[#allocation10 + $0xa60] sm:$0xff]  ;;  %v4885_v59 = vpack.c.bf16 %v1980_v52, %v1973_v56  ;;  %v4645_v56 = vpack.c.bf16 %v2034_v39, %v2027_v38  ;;  %v2098_v38 = vld [vmem:[#allocation10 + $0xd98] sm:$0xff]  ;;  %v1042_v39 = vrot.slane %v5880_v9, %v5854_v36 }
 0x362   :  { %v4887_v0 = vpack.c.bf16 %v1995_v57, %v1988_v55  ;;  %v4647_v55 = vpack.c.bf16 %v2049_v48, %v2042_v47  ;;  %v2083_v22 = vld [vmem:[#allocation10 + $0xd20] sm:$0xff]  ;;  %v2097_v48 = vld [vmem:[#allocation10 + $0xd90] sm:$0xff]  ;;  %v2114_v9 = vld [vmem:[#allocation10 + $0xe18] sm:$0xff] }
 0x364   :  { %4614 = vmatpush1.bf16.msra.mxu1 %v4613_v1  ;;  %4870 = vmatpush1.bf16.msra.mxu0 %v4869_v2  ;;  %v1987_v1 = vld [vmem:[#allocation10 + $0xa20] sm:$0xff]  ;;  %v1994_v2 = vld [vmem:[#allocation10 + $0xa58] sm:$0xff] }
 0x365   :  { %4616 = vmatprep.subr.bf16.mxu1 %v4615_v5  ;;  %4872 = vmatprep.subr.bf16.mxu0 %v4871_v6  ;;  %v2002_v5 = vld [vmem:[#allocation10 + $0xa98] sm:$0xff]  ;;  %v2009_v6 = vld [vmem:[#allocation10 + $0xad0] sm:$0xff]  ;;  %v4889_v7 = vpack.c.bf16 %v1994_v2, %v1987_v1  ;;  %v4649_v1 = vpack.c.bf16 %v2048_v54, %v2041_v53  ;;  %v2112_v54 = vld [vmem:[#allocation10 + $0xe08] sm:$0xff] }
 0x366   :  { %v4891_v10 = vpack.c.bf16 %v2009_v6, %v2002_v5  ;;  %v4651_v5 = vpack.c.bf16 %v2063_v61, %v2056_v60  ;;  %v2106_v53 = vld [vmem:[#allocation10 + $0xdd8] sm:$0xff]  ;;  %v2111_v61 = vld [vmem:[#allocation10 + $0xe00] sm:$0xff] }
 0x368   :  { %4618 = vmatpush1.bf16.msra.mxu1 %v4617_v11  ;;  %4874 = vmatpush1.bf16.msra.mxu0 %v4873_v12  ;;  %v2001_v11 = vld [vmem:[#allocation10 + $0xa90] sm:$0xff]  ;;  %v2008_v12 = vld [vmem:[#allocation10 + $0xac8] sm:$0xff] }
 0x369   :  { %4620 = vmatprep.subr.bf16.mxu1 %v4619_v15  ;;  %4876 = vmatprep.subr.bf16.mxu0 %v4875_v16  ;;  %v2016_v15 = vld [vmem:[#allocation10 + $0xb08] sm:$0xff]  ;;  %v2023_v16 = vld [vmem:[#allocation10 + $0xb40] sm:$0xff]  ;;  %v4893_v19 = vpack.c.bf16 %v2008_v12, %v2001_v11  ;;  %v4653_v11 = vpack.c.bf16 %v2062_v4, %v2055_v3  ;;  %v2126_v4 = vld [vmem:[#allocation10 + $0xe78] sm:$0xff] }
 0x36a   :  { %v4895_v24 = vpack.c.bf16 %v2023_v16, %v2016_v15  ;;  %v4655_v15 = vpack.c.bf16 %v2077_v8, %v2070_v62  ;;  %v2120_v3 = vld [vmem:[#allocation10 + $0xe48] sm:$0xff]  ;;  %v2125_v8 = vld [vmem:[#allocation10 + $0xe70] sm:$0xff] }
 0x36c   :  { %4622 = vmatpush1.bf16.msra.mxu1 %v4621_v26  ;;  %4878 = vmatpush1.bf16.msra.mxu0 %v4877_v27  ;;  %v2015_v26 = vld [vmem:[#allocation10 + $0xb00] sm:$0xff]  ;;  %v2022_v27 = vld [vmem:[#allocation10 + $0xb38] sm:$0xff] }
 0x36d   :  { %4624 = vmatprep.subr.bf16.mxu1 %v4623_v29  ;;  %4880 = vmatprep.subr.bf16.mxu0 %v4879_v30  ;;  %v2030_v29 = vld [vmem:[#allocation10 + $0xb78] sm:$0xff]  ;;  %v2037_v30 = vld [vmem:[#allocation10 + $0xbb0] sm:$0xff]  ;;  %v4897_v37 = vpack.c.bf16 %v2022_v27, %v2015_v26  ;;  %v4657_v26 = vpack.c.bf16 %v2076_v14, %v2069_v17  ;;  %v2140_v14 = vld [vmem:[#allocation10 + $0xee8] sm:$0xff] }
 0x36e   :  { %v4899_v43 = vpack.c.bf16 %v2037_v30, %v2030_v29  ;;  %v4659_v29 = vpack.c.bf16 %v2091_v21, %v2084_v20  ;;  %v2134_v17 = vld [vmem:[#allocation10 + $0xeb8] sm:$0xff] }
 0x370   :  { %4626 = vmatpush1.bf16.msra.mxu1 %v4625_v44  ;;  %4882 = vmatpush1.bf16.msra.mxu0 %v4881_v46  ;;  %v2029_v44 = vld [vmem:[#allocation10 + $0xb70] sm:$0xff]  ;;  %v2036_v46 = vld [vmem:[#allocation10 + $0xba8] sm:$0xff] }
 0x371   :  { %4628 = vmatprep.subr.bf16.mxu1 %v4627_v49  ;;  %4884 = vmatprep.subr.bf16.mxu0 %v4883_v50  ;;  %v2044_v49 = vld [vmem:[#allocation10 + $0xbe8] sm:$0xff]  ;;  %v2051_v50 = vld [vmem:[#allocation10 + $0xc20] sm:$0xff]  ;;  %v4901_v52 = vpack.c.bf16 %v2036_v46, %v2029_v44  ;;  %v4661_v46 = vpack.c.bf16 %v2090_v28, %v2083_v22  ;;  %v2141_v22 = vld [vmem:[#allocation10 + $0xef0] sm:$0xff] }
 0x372   :  { %v4903_v57 = vpack.c.bf16 %v2051_v50, %v2044_v49  ;;  %v2107_v44 = vld [vmem:[#allocation10 + $0xde0] sm:$0xff]  ;;  %v2104_v49 = vld [vmem:[#allocation10 + $0xdc8] sm:$0xff] }
 0x373   :  { %v2148_v28 = vld [vmem:[#allocation10 + $0xf28] sm:$0xff] }
 0x374   :  { %4630 = vmatpush1.bf16.msra.mxu1 %v4629_v58  ;;  %4886 = vmatpush1.bf16.msra.mxu0 %v4885_v59  ;;  %v2043_v58 = vld [vmem:[#allocation10 + $0xbe0] sm:$0xff]  ;;  %v2050_v59 = vld [vmem:[#allocation10 + $0xc18] sm:$0xff] }
 0x375   :  { %4632 = vmatprep.subr.bf16.mxu1 %v4631_v63  ;;  %4888 = vmatprep.subr.bf16.mxu0 %v4887_v0  ;;  %v2058_v63 = vld [vmem:[#allocation10 + $0xc58] sm:$0xff]  ;;  %v2065_v0 = vld [vmem:[#allocation10 + $0xc90] sm:$0xff]  ;;  %v4905_v2 = vpack.c.bf16 %v2050_v59, %v2043_v58  ;;  %v4665_v59 = vpack.c.bf16 %v2104_v49, %v2097_v48  ;;  %v2168_v49 = vld [vmem:[#allocation10 + $0xfc8] sm:$0xff] }
 0x376   :  { %v4907_v6 = vpack.c.bf16 %v2065_v0, %v2058_v63  ;;  %v2121_v58 = vld [vmem:[#allocation10 + $0xe50] sm:$0xff]  ;;  %v2118_v63 = vld [vmem:[#allocation10 + $0xe38] sm:$0xff] }
 0x377   :  { %v2162_v48 = vld [vmem:[#allocation10 + $0xf98] sm:$0xff] }
 0x378   :  { %4634 = vmatpush1.bf16.msra.mxu1 %v4633_v34  ;;  %4890 = vmatpush1.bf16.msra.mxu0 %v4889_v7  ;;  %v2057_v34 = vld [vmem:[#allocation10 + $0xc50] sm:$0xff]  ;;  %v2064_v7 = vld [vmem:[#allocation10 + $0xc88] sm:$0xff] }
 0x379   :  { %4636 = vmatprep.subr.bf16.mxu1 %v4635_v25  ;;  %4892 = vmatprep.subr.bf16.mxu0 %v4891_v10  ;;  %v2072_v25 = vld [vmem:[#allocation10 + $0xcc8] sm:$0xff]  ;;  %v2079_v10 = vld [vmem:[#allocation10 + $0xd00] sm:$0xff]  ;;  %v4909_v12 = vpack.c.bf16 %v2064_v7, %v2057_v34  ;;  %v4669_v7 = vpack.c.bf16 %v2118_v63, %v2111_v61  ;;  %v2182_v61 = vld [vmem:[#allocation10 + $0x1038] sm:$0xff] }
 0x37a   :  { %v4911_v16 = vpack.c.bf16 %v2079_v10, %v2072_v25  ;;  %v2128_v34 = vld [vmem:[#allocation10 + $0xe88] sm:$0xff]  ;;  %v2189_v63 = vld [vmem:[#allocation10 + $0x1070] sm:$0xff] }
 0x37b   :  { %v2132_v25 = vld [vmem:[#allocation10 + $0xea8] sm:$0xff] }
 0x37c   :  { %4638 = vmatpush1.bf16.msra.mxu1 %v4637_v18  ;;  %4894 = vmatpush1.bf16.msra.mxu0 %v4893_v19  ;;  %v2071_v18 = vld [vmem:[#allocation10 + $0xcc0] sm:$0xff]  ;;  %v2078_v19 = vld [vmem:[#allocation10 + $0xcf8] sm:$0xff]  ;;  %v4673_v20 = vpack.c.bf16 %v2132_v25, %v2125_v8 }
 0x37d   :  { %4640 = vmatprep.subr.bf16.mxu1 %v4639_v23  ;;  %4896 = vmatprep.subr.bf16.mxu0 %v4895_v24  ;;  %v2086_v23 = vld [vmem:[#allocation10 + $0xd38] sm:$0xff]  ;;  %v2093_v24 = vld [vmem:[#allocation10 + $0xd70] sm:$0xff]  ;;  %v4913_v27 = vpack.c.bf16 %v2078_v19, %v2071_v18  ;;  %v2203_v8 = vld [vmem:[#allocation10 + $0x10e0] sm:$0xff] }
 0x37e   :  { %v4915_v30 = vpack.c.bf16 %v2093_v24, %v2086_v23  ;;  %v2142_v18 = vld [vmem:[#allocation10 + $0xef8] sm:$0xff]  ;;  %v2149_v19 = vld [vmem:[#allocation10 + $0xf30] sm:$0xff]  ;;  %v2139_v23 = vld [vmem:[#allocation10 + $0xee0] sm:$0xff] }
 0x37f   :  { %v2146_v24 = vld [vmem:[#allocation10 + $0xf18] sm:$0xff] }
 0x380   :  { %4642 = vmatpush1.bf16.msra.mxu1 %v4641_v31  ;;  %4898 = vmatpush1.bf16.msra.mxu0 %v4897_v37  ;;  %v2085_v31 = vld [vmem:[#allocation10 + $0xd30] sm:$0xff]  ;;  %v2092_v37 = vld [vmem:[#allocation10 + $0xd68] sm:$0xff]  ;;  %v2198_v25 = vld [vmem:[#allocation10 + $0x10b8] sm:$0xff] }
 0x381   :  { %4644 = vmatprep.subr.bf16.mxu1 %v4643_v42  ;;  %4900 = vmatprep.subr.bf16.mxu0 %v4899_v43  ;;  %v2105_v42 = vld [vmem:[#allocation10 + $0xdd0] sm:$0xff]  ;;  %v2100_v43 = vld [vmem:[#allocation10 + $0xda8] sm:$0xff]  ;;  %v4917_v47 = vpack.c.bf16 %v2092_v37, %v2085_v31  ;;  %v2163_v37 = vld [vmem:[#allocation10 + $0xfa0] sm:$0xff] }
 0x382   :  { %v4663_v50 = vpack.c.bf16 %v2105_v42, %v2098_v38  ;;  %v2156_v31 = vld [vmem:[#allocation10 + $0xf68] sm:$0xff]  ;;  %v4677_v38 = vpack.c.bf16 %v2146_v24, %v2139_v23  ;;  %v2153_v42 = vld [vmem:[#allocation10 + $0xf50] sm:$0xff] }
 0x383   :  { %v2217_v23 = vld [vmem:[#allocation10 + $0x1150] sm:$0xff]  ;;  %v2212_v24 = vld [vmem:[#allocation10 + $0x1128] sm:$0xff] }
 0x384   :  { %4646 = vmatpush1.bf16.msra.mxu1 %v4645_v56  ;;  %4902 = vmatpush1.bf16.msra.mxu0 %v4901_v52  ;;  %v4919_v56 = vpack.c.bf16 %v2107_v44, %v2100_v43  ;;  %v2099_v52 = vld [vmem:[#allocation10 + $0xda0] sm:$0xff]  ;;  %v2160_v43 = vld [vmem:[#allocation10 + $0xf88] sm:$0xff] }
 0x385   :  { %4648 = vmatprep.subr.bf16.mxu1 %v4647_v55  ;;  %4904 = vmatprep.subr.bf16.mxu0 %v4903_v57  ;;  %v5437_v55 = vadd.f32 %v5888_v13, %v1042_v39  ;;  %v2119_v57 = vld [vmem:[#allocation10 + $0xe40] sm:$0xff]  ;;  %v4921_v60 = vpack.c.bf16 %v2106_v53, %v2099_v52  ;;  %v4933_v39 = vpack.c.bf16 %v2148_v28, %v2141_v22  ;;  %v2177_v52 = vld [vmem:[#allocation10 + $0x1010] sm:$0xff] }
 0x386   :  { %v4667_v0 = vpack.c.bf16 %v2119_v57, %v2112_v54  ;;  %v2135_v13 = vld [vmem:[#allocation10 + $0xec0] sm:$0xff]  ;;  %v4681_v53 = vpack.c.bf16 %v2160_v43, %v2153_v42  ;;  %v2174_v57 = vld [vmem:[#allocation10 + $0xff8] sm:$0xff]  ;;  %v2209_v28 = vld [vmem:[#allocation10 + $0x1110] sm:$0xff] }
 0x387   :  { %vm1641_vm10 = vcmp.gt.f32.partialorder %v5437_v55, 0.0  ;;  %v2231_v42 = vld [vmem:[#allocation10 + $0x11c0] sm:$0xff]  ;;  %v2226_v43 = vld [vmem:[#allocation10 + $0x1198] sm:$0xff] }
 0x388   :  { %4650 = vmatpush1.bf16.msra.mxu1 %v4649_v1  ;;  %4906 = vmatpush1.bf16.msra.mxu0 %v4905_v2  ;;  %v4923_v1 = vpack.c.bf16 %v2121_v58, %v2114_v9  ;;  %v2113_v2 = vld [vmem:[#allocation10 + $0xe10] sm:$0xff] }
 0x389   :  { %4652 = vmatprep.subr.bf16.mxu1 %v4651_v5  ;;  %4908 = vmatprep.subr.bf16.mxu0 %v4907_v6  ;;  %v1649_v5 = vmul.f32 0.2, %v5437_v55  ;;  %v2133_v6 = vld [vmem:[#allocation10 + $0xeb0] sm:$0xff]  ;;  %v4925_v62 = vpack.c.bf16 %v2120_v3, %v2113_v2 }
 0x38a   :  { %v4671_v10 = vpack.c.bf16 %v2133_v6, %v2126_v4  ;;  %v2181_v4 = vld [vmem:[#allocation10 + $0x1030] sm:$0xff]  ;;  %v4687_v6 = vpack.c.bf16 %v2189_v63, %v2182_v61  ;;  %v2244_v61 = vld [vmem:[#allocation10 + $0x1228] sm:$0xff] }
 0x38c   :  { %4654 = vmatpush1.bf16.msra.mxu1 %v4653_v11  ;;  %4910 = vmatpush1.bf16.msra.mxu0 %v4909_v12  ;;  %v4927_v11 = vpack.c.bf16 %v2135_v13, %v2128_v34  ;;  %v2127_v12 = vld [vmem:[#allocation10 + $0xe80] sm:$0xff] }
 0x38d   :  { %4656 = vmatprep.subr.bf16.mxu1 %v4655_v15  ;;  %4912 = vmatprep.subr.bf16.mxu0 %v4911_v16  ;;  %v5907_v15 = vsel %vm1641_vm10, %v5437_v55, %v1649_v5  ;;  %v2147_v16 = vld [vmem:[#allocation10 + $0xf20] sm:$0xff]  ;;  %v4929_v21 = vpack.c.bf16 %v2134_v17, %v2127_v12  ;;  %v2188_v5 = vld [vmem:[#allocation10 + $0x1068] sm:$0xff] }
 0x38e   :  { %v2167_v55 = vld [vmem:[#allocation10 + $0xfc0] sm:$0xff] }
 0x38f   :  { %v4685_v2 = vpack.c.bf16 %v2174_v57, %v2167_v55  ;;  %v2183_v13 = vld [vmem:[#allocation10 + $0x1040] sm:$0xff]  ;;  %v2245_v55 = vld [vmem:[#allocation10 + $0x1230] sm:$0xff]  ;;  %v2240_v57 = vld [vmem:[#allocation10 + $0x1208] sm:$0xff] }
 0x390   :  { %4658 = vmatpush1.bf16.msra.mxu1 %v4657_v26  ;;  %4914 = vmatpush1.bf16.msra.mxu0 %v4913_v27  ;;  %v4675_v26 = vpack.c.bf16 %v2147_v16, %v2140_v14  ;;  %v4931_v27 = vpack.c.bf16 %v2149_v19, %v2142_v18  ;;  %v2195_v17 = vld [vmem:[#allocation10 + $0x10a0] sm:$0xff]  ;;  %v2202_v14 = vld [vmem:[#allocation10 + $0x10d8] sm:$0xff]  ;;  %v2197_v19 = vld [vmem:[#allocation10 + $0x10b0] sm:$0xff] }
 0x391   :  { %4660 = vmatprep.subr.bf16.mxu1 %v4659_v29  ;;  %4916 = vmatprep.subr.bf16.mxu0 %v4915_v30  ;;  %v2154_v29 = vld [vmem:[#allocation10 + $0xf58] sm:$0xff]  ;;  %v2161_v30 = vld [vmem:[#allocation10 + $0xf90] sm:$0xff] }
 0x392   :  { %v4679_v44 = vpack.c.bf16 %v2161_v30, %v2154_v29  ;;  %v2216_v29 = vld [vmem:[#allocation10 + $0x1148] sm:$0xff] }
 0x394   :  { %4662 = vmatpush1.bf16.msra.mxu1 %v4661_v46  ;;  %4918 = vmatpush1.bf16.msra.mxu0 %v4917_v47  ;;  %v4935_v46 = vpack.c.bf16 %v2163_v37, %v2156_v31  ;;  %v2155_v47 = vld [vmem:[#allocation10 + $0xf60] sm:$0xff] }
 0x395   :  { %4664 = vmatprep.subr.bf16.mxu1 %v4663_v50  ;;  %4920 = vmatprep.subr.bf16.mxu0 %v4919_v56  ;;  %v2175_v50 = vld [vmem:[#allocation10 + $0x1000] sm:$0xff]  ;;  %v2170_v56 = vld [vmem:[#allocation10 + $0xfd8] sm:$0xff]  ;;  %v4937_v54 = vpack.c.bf16 %v2162_v48, %v2155_v47 }
 0x396   :  { %v4683_v9 = vpack.c.bf16 %v2175_v50, %v2168_v49  ;;  %v4939_v58 = vpack.c.bf16 %v2177_v52, %v2170_v56  ;;  %v2211_v37 = vld [vmem:[#allocation10 + $0x1120] sm:$0xff]  ;;  %v2230_v49 = vld [vmem:[#allocation10 + $0x11b8] sm:$0xff]  ;;  %v2225_v52 = vld [vmem:[#allocation10 + $0x1190] sm:$0xff] }
 0x397   :  { %v2223_v48 = vld [vmem:[#allocation10 + $0x1180] sm:$0xff] }
 0x398   :  { %4666 = vmatpush1.bf16.msra.mxu1 %v4665_v59  ;;  %4922 = vmatpush1.bf16.msra.mxu0 %v4921_v60  ;;  %v2169_v59 = vld [vmem:[#allocation10 + $0xfd0] sm:$0xff]  ;;  %v2176_v60 = vld [vmem:[#allocation10 + $0x1008] sm:$0xff] }
 0x399   :  { %4668 = vmatprep.subr.bf16.mxu1 %v4667_v0  ;;  %4924 = vmatprep.subr.bf16.mxu0 %v4923_v1  ;;  %v2184_v0 = vld [vmem:[#allocation10 + $0x1048] sm:$0xff]  ;;  %v2191_v1 = vld [vmem:[#allocation10 + $0x1080] sm:$0xff]  ;;  %v4941_v3 = vpack.c.bf16 %v2176_v60, %v2169_v59  ;;  %v2237_v60 = vld [vmem:[#allocation10 + $0x11f0] sm:$0xff] }
 0x39a   :  { %v4943_v34 = vpack.c.bf16 %v2191_v1, %v2184_v0  ;;  %v2239_v1 = vld [vmem:[#allocation10 + $0x1200] sm:$0xff] }
 0x39b   :  { %2732 = vmatmul.mubr.f32.vlgmr.msra.gmra.mrb[4].mxu1 %v5907_v15  ;;  %3016 = vmatmul.mubr.f32.vlgmr.msra.gmra.mrb[10].mxu0 %v5907_v15 }
 0x39c   :  { %4670 = vmatpush1.bf16.msra.mxu1 %v4669_v7  ;;  %4926 = vmatpush1.bf16.msra.mxu0 %v4925_v62  ;;  %v2190_v7 = vld [vmem:[#allocation10 + $0x1078] sm:$0xff]  ;;  %v2196_v62 = vld [vmem:[#allocation10 + $0x10a8] sm:$0xff] }
 0x39d   :  { %4672 = vmatprep.subr.bf16.mxu1 %v4671_v10  ;;  %4928 = vmatprep.subr.bf16.mxu0 %v4927_v11  ;;  %v2205_v10 = vld [vmem:[#allocation10 + $0x10f0] sm:$0xff]  ;;  %v4689_v11 = vpack.c.bf16 %v2188_v5, %v2181_v4  ;;  %v4945_v12 = vpack.c.bf16 %v2190_v7, %v2183_v13  ;;  %v4691_v16 = vpack.c.bf16 %v2203_v8, %v2196_v62  ;;  %v2259_v4 = vld [vmem:[#allocation10 + $0x12a0] sm:$0xff]  ;;  %v2254_v5 = vld [vmem:[#allocation10 + $0x1278] sm:$0xff] }
 0x39e   :  { %v4947_v18 = vpack.c.bf16 %v2205_v10, %v2198_v25  ;;  %v2251_v7 = vld [vmem:[#allocation10 + $0x1260] sm:$0xff]  ;;  %v2258_v62 = vld [vmem:[#allocation10 + $0x1298] sm:$0xff]  ;;  %v2253_v10 = vld [vmem:[#allocation10 + $0x1270] sm:$0xff] }
 0x3a0   :  { %4674 = vmatpush1.bf16.msra.mxu1 %v4673_v20  ;;  %4930 = vmatpush1.bf16.msra.mxu0 %v4929_v21  ;;  %v2204_v20 = vld [vmem:[#allocation10 + $0x10e8] sm:$0xff]  ;;  %v2210_v21 = vld [vmem:[#allocation10 + $0x1118] sm:$0xff] }
 0x3a1   :  { %4676 = vmatprep.subr.bf16.mxu1 %v4675_v26  ;;  %4932 = vmatprep.subr.bf16.mxu0 %v4931_v27  ;;  %v2219_v26 = vld [vmem:[#allocation10 + $0x1160] sm:$0xff]  ;;  %v4693_v27 = vpack.c.bf16 %v2202_v14, %v2195_v17  ;;  %v4949_v22 = vpack.c.bf16 %v2204_v20, %v2197_v19  ;;  %v4695_v30 = vpack.c.bf16 %v2217_v23, %v2210_v21  ;;  %v2273_v17 = vld [vmem:[#allocation10 + $0x1310] sm:$0xff]  ;;  %v2268_v14 = vld [vmem:[#allocation10 + $0x12e8] sm:$0xff] }
 0x3a2   :  { %v4951_v31 = vpack.c.bf16 %v2219_v26, %v2212_v24  ;;  %v2265_v20 = vld [vmem:[#allocation10 + $0x12d0] sm:$0xff]  ;;  %v2272_v21 = vld [vmem:[#allocation10 + $0x1308] sm:$0xff]  ;;  %v2267_v26 = vld [vmem:[#allocation10 + $0x12e0] sm:$0xff] }
 0x3a4   :  { %4678 = vmatpush1.bf16.msra.mxu1 %v4677_v38  ;;  %4934 = vmatpush1.bf16.msra.mxu0 %v4933_v39  ;;  %v2218_v38 = vld [vmem:[#allocation10 + $0x1158] sm:$0xff]  ;;  %v2224_v39 = vld [vmem:[#allocation10 + $0x1188] sm:$0xff] }
 0x3a5   :  { %4680 = vmatprep.subr.bf16.mxu1 %v4679_v44  ;;  %4936 = vmatprep.subr.bf16.mxu0 %v4935_v46  ;;  %v2233_v44 = vld [vmem:[#allocation10 + $0x11d0] sm:$0xff]  ;;  %v4697_v46 = vpack.c.bf16 %v2216_v29, %v2209_v28  ;;  %v4953_v47 = vpack.c.bf16 %v2218_v38, %v2211_v37  ;;  %v4699_v50 = vpack.c.bf16 %v2231_v42, %v2224_v39  ;;  %v2287_v28 = vld [vmem:[#allocation10 + $0x1380] sm:$0xff]  ;;  %v2282_v29 = vld [vmem:[#allocation10 + $0x1358] sm:$0xff] }
 0x3a6   :  { %v4955_v56 = vpack.c.bf16 %v2233_v44, %v2226_v43  ;;  %v2279_v38 = vld [vmem:[#allocation10 + $0x1340] sm:$0xff]  ;;  %v2286_v39 = vld [vmem:[#allocation10 + $0x1378] sm:$0xff]  ;;  %v2281_v44 = vld [vmem:[#allocation10 + $0x1350] sm:$0xff] }
 0x3a8   :  { %4682 = vmatpush1.bf16.msra.mxu1 %v4681_v53  ;;  %4938 = vmatpush1.bf16.msra.mxu0 %v4937_v54  ;;  %v2232_v53 = vld [vmem:[#allocation10 + $0x11c8] sm:$0xff]  ;;  %v2238_v54 = vld [vmem:[#allocation10 + $0x11f8] sm:$0xff] }
 0x3a9   :  { %4684 = vmatprep.subr.bf16.mxu1 %v4683_v9  ;;  %4940 = vmatprep.subr.bf16.mxu0 %v4939_v58  ;;  %v2247_v9 = vld [vmem:[#allocation10 + $0x1240] sm:$0xff]  ;;  %v4701_v58 = vpack.c.bf16 %v2230_v49, %v2223_v48  ;;  %v4957_v59 = vpack.c.bf16 %v2232_v53, %v2225_v52  ;;  %v4703_v63 = vpack.c.bf16 %v2245_v55, %v2238_v54  ;;  %v2301_v48 = vld [vmem:[#allocation10 + $0x13f0] sm:$0xff]  ;;  %v2296_v49 = vld [vmem:[#allocation10 + $0x13c8] sm:$0xff] }
 0x3aa   :  { %v4959_v0 = vpack.c.bf16 %v2247_v9, %v2240_v57  ;;  %v2293_v53 = vld [vmem:[#allocation10 + $0x13b0] sm:$0xff]  ;;  %v2300_v54 = vld [vmem:[#allocation10 + $0x13e8] sm:$0xff]  ;;  %v2295_v9 = vld [vmem:[#allocation10 + $0x13c0] sm:$0xff] }
 0x3ac   :  { %4686 = vmatpush1.bf16.msra.mxu1 %v4685_v2  ;;  %4942 = vmatpush1.bf16.msra.mxu0 %v4941_v3  ;;  %v2246_v2 = vld [vmem:[#allocation10 + $0x1238] sm:$0xff]  ;;  %v2252_v3 = vld [vmem:[#allocation10 + $0x1268] sm:$0xff] }
 0x3ad   :  { %4688 = vmatprep.subr.bf16.mxu1 %v4687_v6  ;;  %4944 = vmatprep.subr.bf16.mxu0 %v4943_v34  ;;  %v2261_v6 = vld [vmem:[#allocation10 + $0x12b0] sm:$0xff]  ;;  %v4705_v34 = vpack.c.bf16 %v2244_v61, %v2237_v60  ;;  %v4961_v13 = vpack.c.bf16 %v2246_v2, %v2239_v1  ;;  %v4707_v8 = vpack.c.bf16 %v2259_v4, %v2252_v3  ;;  %v2315_v60 = vld [vmem:[#allocation10 + $0x1460] sm:$0xff]  ;;  %v2310_v61 = vld [vmem:[#allocation10 + $0x1438] sm:$0xff]  ;;  %v1049_v2 = vsub.s32 4, %v5831_v32 }
 0x3ae   :  { %v4963_v25 = vpack.c.bf16 %v2261_v6, %v2254_v5  ;;  %v2307_v3 = vld [vmem:[#allocation10 + $0x1420] sm:$0xff]  ;;  %v2314_v4 = vld [vmem:[#allocation10 + $0x1458] sm:$0xff] }
 0x3b0   :  { %4690 = vmatpush1.bf16.msra.mxu1 %v4689_v11  ;;  %4946 = vmatpush1.bf16.msra.mxu0 %v4945_v12  ;;  %v2260_v11 = vld [vmem:[#allocation10 + $0x12a8] sm:$0xff]  ;;  %v2266_v12 = vld [vmem:[#allocation10 + $0x12d8] sm:$0xff] }
 0x3b1   :  { %4692 = vmatprep.subr.bf16.mxu1 %v4691_v16  ;;  %4948 = vmatprep.subr.bf16.mxu0 %v4947_v18  ;;  %v2275_v16 = vld [vmem:[#allocation10 + $0x1320] sm:$0xff]  ;;  %v4709_v18 = vpack.c.bf16 %v2258_v62, %v2251_v7  ;;  %v4965_v19 = vpack.c.bf16 %v2260_v11, %v2253_v10  ;;  %v4711_v23 = vpack.c.bf16 %v2273_v17, %v2266_v12  ;;  %v1053_v7 = vsub.s32 5, %v5831_v32  ;;  %v2322_v62 = vld [vmem:[#allocation10 + $0x1498] sm:$0xff]  ;;  %v2324_v10 = vld [vmem:[#allocation10 + $0x14a8] sm:$0xff] }
 0x3b2   :  { %v4967_v24 = vpack.c.bf16 %v2275_v16, %v2268_v14  ;;  %v2331_v11 = vld [vmem:[#allocation10 + $0x14e0] sm:$0xff]  ;;  %v5914_v12 = vld [vmem:[#allocation9] sm:$0xff]  ;;  %v4725_v14 = vpack.c.bf16 %v2314_v4, %v2307_v3 }
 0x3b3   :  { %v1050_v17 = vrot.slane %v5914_v12, %v1049_v2  ;;  %v2351_v4 = vld [vmem:[#allocation10 + $0x1580] sm:$0xff] }
 0x3b4   :  { %4694 = vmatpush1.bf16.msra.mxu1 %v4693_v27  ;;  %4950 = vmatpush1.bf16.msra.mxu0 %v4949_v22  ;;  %v2274_v27 = vld [vmem:[#allocation10 + $0x1318] sm:$0xff]  ;;  %v2280_v22 = vld [vmem:[#allocation10 + $0x1348] sm:$0xff] }
 0x3b5   :  { %4696 = vmatprep.subr.bf16.mxu1 %v4695_v30  ;;  %4952 = vmatprep.subr.bf16.mxu0 %v4951_v31  ;;  %v2289_v30 = vld [vmem:[#allocation10 + $0x1390] sm:$0xff]  ;;  %v4713_v31 = vpack.c.bf16 %v2272_v21, %v2265_v20  ;;  %v4969_v37 = vpack.c.bf16 %v2274_v27, %v2267_v26  ;;  %v4715_v42 = vpack.c.bf16 %v2287_v28, %v2280_v22  ;;  %v2330_v26 = vld [vmem:[#allocation10 + $0x14d8] sm:$0xff]  ;;  %v2336_v27 = vld [vmem:[#allocation10 + $0x1508] sm:$0xff] }
 0x3b6   :  { %v4971_v43 = vpack.c.bf16 %v2289_v30, %v2282_v29  ;;  %v1054_v20 = vrot.slane %v5914_v12, %v1053_v7  ;;  %v2343_v28 = vld [vmem:[#allocation10 + $0x1540] sm:$0xff]  ;;  %v2338_v29 = vld [vmem:[#allocation10 + $0x1518] sm:$0xff]  ;;  %v2345_v30 = vld [vmem:[#allocation10 + $0x1550] sm:$0xff] }
 0x3b8   :  { %4698 = vmatpush1.bf16.msra.mxu1 %v4697_v46  ;;  %4954 = vmatpush1.bf16.msra.mxu0 %v4953_v47  ;;  %v2288_v46 = vld [vmem:[#allocation10 + $0x1388] sm:$0xff]  ;;  %v2294_v47 = vld [vmem:[#allocation10 + $0x13b8] sm:$0xff] }
 0x3b9   :  { %4700 = vmatprep.subr.bf16.mxu1 %v4699_v50  ;;  %4956 = vmatprep.subr.bf16.mxu0 %v4955_v56  ;;  %v2303_v50 = vld [vmem:[#allocation10 + $0x1400] sm:$0xff]  ;;  %v4717_v56 = vpack.c.bf16 %v2286_v39, %v2279_v38  ;;  %v4973_v52 = vpack.c.bf16 %v2288_v46, %v2281_v44  ;;  %v4719_v55 = vpack.c.bf16 %v2301_v48, %v2294_v47 }
 0x3ba   :  { %v4975_v57 = vpack.c.bf16 %v2303_v50, %v2296_v49  ;;  %v2335_v44 = vld [vmem:[#allocation10 + $0x1500] sm:$0xff]  ;;  %v4731_v48 = vpack.c.bf16 %v2343_v28, %v2336_v27  ;;  %v4987_v49 = vpack.c.bf16 %v2345_v30, %v2338_v29  ;;  %v2342_v50 = vld [vmem:[#allocation10 + $0x1538] sm:$0xff]  ;;  %v2380_v27 = vld [vmem:[#allocation10 + $0x1668] sm:$0xff] }
 0x3bb   :  { %v2377_v30 = vld [vmem:[#allocation10 + $0x1650] sm:$0xff] }
 0x3bc   :  { %4702 = vmatpush1.bf16.msra.mxu1 %v4701_v58  ;;  %4958 = vmatpush1.bf16.msra.mxu0 %v4957_v59  ;;  %v2302_v58 = vld [vmem:[#allocation10 + $0x13f8] sm:$0xff]  ;;  %v2308_v59 = vld [vmem:[#allocation10 + $0x1428] sm:$0xff] }
 0x3bd   :  { %4704 = vmatprep.subr.bf16.mxu1 %v4703_v63  ;;  %4960 = vmatprep.subr.bf16.mxu0 %v4959_v0  ;;  %v2317_v63 = vld [vmem:[#allocation10 + $0x1470] sm:$0xff]  ;;  %v4721_v0 = vpack.c.bf16 %v2300_v54, %v2293_v53  ;;  %v4977_v1 = vpack.c.bf16 %v2302_v58, %v2295_v9  ;;  %v4723_v5 = vpack.c.bf16 %v2315_v60, %v2308_v59  ;;  %v2352_v58 = vld [vmem:[#allocation10 + $0x1588] sm:$0xff]  ;;  %v2359_v59 = vld [vmem:[#allocation10 + $0x15c0] sm:$0xff] }
 0x3be   :  { %v4979_v6 = vpack.c.bf16 %v2317_v63, %v2310_v61  ;;  %v4733_v61 = vpack.c.bf16 %v2342_v50, %v2335_v44  ;;  %v2392_v44 = vld [vmem:[#allocation10 + $0x16c8] sm:$0xff] }
 0x3c0   :  { %4706 = vmatpush1.bf16.msra.mxu1 %v4705_v34  ;;  %4962 = vmatpush1.bf16.msra.mxu0 %v4961_v13  ;;  %v2309_v34 = vld [vmem:[#allocation10 + $0x1430] sm:$0xff]  ;;  %v2316_v13 = vld [vmem:[#allocation10 + $0x1468] sm:$0xff] }
 0x3c1   :  { %4708 = vmatprep.subr.bf16.mxu1 %v4707_v8  ;;  %4964 = vmatprep.subr.bf16.mxu0 %v4963_v25  ;;  %v1061_v8 = vsub.s32 7, %v5831_v32  ;;  %v2329_v25 = vld [vmem:[#allocation10 + $0x14d0] sm:$0xff]  ;;  %v4981_v16 = vpack.c.bf16 %v2316_v13, %v2309_v34 }
 0x3c2   :  { %v4727_v21 = vpack.c.bf16 %v2329_v25, %v2322_v62  ;;  %v4991_v62 = vpack.c.bf16 %v2359_v59, %v2352_v58  ;;  %v2366_v25 = vld [vmem:[#allocation10 + $0x15f8] sm:$0xff]  ;;  %v2413_v58 = vld [vmem:[#allocation10 + $0x1770] sm:$0xff]  ;;  %v2408_v59 = vld [vmem:[#allocation10 + $0x1748] sm:$0xff] }
 0x3c3   :  { %v1062_v22 = vrot.slane %v5914_v12, %v1061_v8  ;;  %v2371_v8 = vld [vmem:[#allocation10 + $0x1620] sm:$0xff] }
 0x3c4   :  { %4710 = vmatpush1.bf16.msra.mxu1 %v4709_v18  ;;  %4966 = vmatpush1.bf16.msra.mxu0 %v4965_v19  ;;  %v2321_v18 = vld [vmem:[#allocation10 + $0x1490] sm:$0xff]  ;;  %v2328_v19 = vld [vmem:[#allocation10 + $0x14c8] sm:$0xff] }
 0x3c5   :  { %4712 = vmatprep.subr.bf16.mxu1 %v4711_v23  ;;  %4968 = vmatprep.subr.bf16.mxu0 %v4967_v24  ;;  %v4983_v23 = vpack.c.bf16 %v2331_v11, %v2324_v10  ;;  %v2323_v24 = vld [vmem:[#allocation10 + $0x14a0] sm:$0xff]  ;;  %v2373_v10 = vld [vmem:[#allocation10 + $0x1630] sm:$0xff] }
 0x3c8   :  { %4714 = vmatpush1.bf16.msra.mxu1 %v4713_v31  ;;  %4970 = vmatpush1.bf16.msra.mxu0 %v4969_v37 }
 0x3c9   :  { %4716 = vmatprep.subr.bf16.mxu1 %v4715_v42  ;;  %4972 = vmatprep.subr.bf16.mxu0 %v4971_v43  ;;  %v4729_v42 = vpack.c.bf16 %v2328_v19, %v2321_v18  ;;  %v4985_v43 = vpack.c.bf16 %v2330_v26, %v2323_v24  ;;  %v2370_v18 = vld [vmem:[#allocation10 + $0x1618] sm:$0xff]  ;;  %v2385_v26 = vld [vmem:[#allocation10 + $0x1690] sm:$0xff] }
 0x3ca   :  { %v2378_v24 = vld [vmem:[#allocation10 + $0x1658] sm:$0xff] }
 0x3cc   :  { %4718 = vmatpush1.bf16.msra.mxu1 %v4717_v56  ;;  %4974 = vmatpush1.bf16.msra.mxu0 %v4973_v52  ;;  %v2337_v56 = vld [vmem:[#allocation10 + $0x1510] sm:$0xff]  ;;  %v2344_v52 = vld [vmem:[#allocation10 + $0x1548] sm:$0xff] }
 0x3cd   :  { %4720 = vmatprep.subr.bf16.mxu1 %v4719_v55  ;;  %4976 = vmatprep.subr.bf16.mxu0 %v4975_v57  ;;  %v2350_v55 = vld [vmem:[#allocation10 + $0x1578] sm:$0xff]  ;;  %v2357_v57 = vld [vmem:[#allocation10 + $0x15b0] sm:$0xff]  ;;  %v4989_v63 = vpack.c.bf16 %v2344_v52, %v2337_v56  ;;  %v2391_v56 = vld [vmem:[#allocation10 + $0x16c0] sm:$0xff] }
 0x3ce   :  { %v4735_v13 = vpack.c.bf16 %v2357_v57, %v2350_v55  ;;  %v2398_v52 = vld [vmem:[#allocation10 + $0x16f8] sm:$0xff]  ;;  %v2393_v55 = vld [vmem:[#allocation10 + $0x16d0] sm:$0xff]  ;;  %v2400_v57 = vld [vmem:[#allocation10 + $0x1708] sm:$0xff] }
 0x3d0   :  { %4722 = vmatpush1.bf16.msra.mxu1 %v4721_v0  ;;  %4978 = vmatpush1.bf16.msra.mxu0 %v4977_v1  ;;  %v2349_v0 = vld [vmem:[#allocation10 + $0x1570] sm:$0xff]  ;;  %v2356_v1 = vld [vmem:[#allocation10 + $0x15a8] sm:$0xff] }
 0x3d1   :  { %4724 = vmatprep.subr.bf16.mxu1 %v4723_v5  ;;  %4980 = vmatprep.subr.bf16.mxu0 %v4979_v6  ;;  %v2358_v5 = vld [vmem:[#allocation10 + $0x15b8] sm:$0xff]  ;;  %v2364_v6 = vld [vmem:[#allocation10 + $0x15e8] sm:$0xff] }
 0x3d2   :  { %v4739_v19 = vpack.c.bf16 %v2371_v8, %v2364_v6  ;;  %v2407_v6 = vld [vmem:[#allocation10 + $0x1740] sm:$0xff] }
 0x3d3   :  { %v1492_v31 = vpop.f32.mrb[2].mxu1  ;;  %v2427_v8 = vld [vmem:[#allocation10 + $0x17e0] sm:$0xff] }
 0x3d4   :  { %v5439_v37 = vadd.f32 %v1492_v31, %v1050_v17  ;;  %v5923_v38 = vpop.f32.mrb[8].mxu0  ;;  %4726 = vmatpush1.bf16.msra.mxu1 %v4725_v14  ;;  %4982 = vmatpush1.bf16.msra.mxu0 %v4981_v16  ;;  %v1494_v39 = vpop.f32.mrb[3].mxu1  ;;  %v4737_v17 = vpack.c.bf16 %v2356_v1, %v2349_v0  ;;  %v4993_v14 = vpack.c.bf16 %v2358_v5, %v2351_v4  ;;  %v2363_v16 = vld [vmem:[#allocation10 + $0x15e0] sm:$0xff]  ;;  %v2384_v31 = vld [vmem:[#allocation10 + $0x1688] sm:$0xff]  ;;  %v2405_v0 = vld [vmem:[#allocation10 + $0x1730] sm:$0xff] }
 0x3d5   :  { %v5440_v46 = vadd.f32 %v1494_v39, %v1054_v20  ;;  %v1636_v47 = vpop.f32.mrb[9].mxu0  ;;  %4728 = vmatprep.subr.bf16.mxu1 %v4727_v21  ;;  %4984 = vmatprep.subr.bf16.mxu0 %v4983_v23  ;;  %v4995_v20 = vpack.c.bf16 %v2373_v10, %v2366_v25  ;;  %v2365_v21 = vld [vmem:[#allocation10 + $0x15f0] sm:$0xff]  ;;  %v2372_v23 = vld [vmem:[#allocation10 + $0x1628] sm:$0xff]  ;;  %v4741_v28 = vpack.c.bf16 %v2370_v18, %v2363_v16  ;;  %v2422_v25 = vld [vmem:[#allocation10 + $0x17b8] sm:$0xff] }
 0x3d6   :  { %v1651_v53 = vmul.f32 0.2, %v5439_v37  ;;  %v5442_v54 = vadd.f32 %v1636_v47, %v1062_v22  ;;  %vm1643_vm11 = vcmp.gt.f32.partialorder %v5439_v37, 0.0  ;;  %v2387_v22 = vld [vmem:[#allocation10 + $0x16a0] sm:$0xff]  ;;  %v4997_v29 = vpack.c.bf16 %v2372_v23, %v2365_v21  ;;  %v2394_v47 = vld [vmem:[#allocation10 + $0x16d8] sm:$0xff]  ;;  %v2412_v1 = vld [vmem:[#allocation10 + $0x1768] sm:$0xff] }
 0x3d7   :  { %vm1644_vm12 = vcmp.gt.f32.partialorder %v5440_v46, 0.0  ;;  %v1652_v9 = vmul.f32 0.2, %v5440_v46  ;;  %v4999_v39 = vpack.c.bf16 %v2387_v22, %v2380_v27  ;;  %v2429_v10 = vld [vmem:[#allocation10 + $0x17f0] sm:$0xff]  ;;  %v2419_v16 = vld [vmem:[#allocation10 + $0x17a0] sm:$0xff]  ;;  %v2426_v18 = vld [vmem:[#allocation10 + $0x17d8] sm:$0xff] }
 0x3d8   :  { %v1654_v60 = vmul.f32 0.2, %v5442_v54  ;;  %4730 = vmatpush1.bf16.msra.mxu1 %v4729_v42  ;;  %4986 = vmatpush1.bf16.msra.mxu0 %v4985_v43  ;;  %vm1646_vm13 = vcmp.gt.f32.partialorder %v5442_v54, 0.0  ;;  %v5930_v34 = vsel %vm1643_vm11, %v5439_v37, %v1651_v53  ;;  %v4743_v37 = vpack.c.bf16 %v2385_v26, %v2378_v24  ;;  %v2379_v42 = vld [vmem:[#allocation10 + $0x1660] sm:$0xff]  ;;  %v2386_v43 = vld [vmem:[#allocation10 + $0x1698] sm:$0xff]  ;;  %v2421_v21 = vld [vmem:[#allocation10 + $0x17b0] sm:$0xff] }
 0x3d9   :  { %v5925_v3 = vsel %vm1644_vm12, %v5440_v46, %v1652_v9  ;;  %4732 = vmatprep.subr.bf16.mxu1 %v4731_v48  ;;  %4988 = vmatprep.subr.bf16.mxu0 %v4987_v49  ;;  %v2399_v46 = vld [vmem:[#allocation10 + $0x1700] sm:$0xff]  ;;  %v2401_v48 = vld [vmem:[#allocation10 + $0x1710] sm:$0xff]  ;;  %v4745_v49 = vpack.c.bf16 %v2384_v31, %v2377_v30  ;;  %v5001_v50 = vpack.c.bf16 %v2386_v43, %v2379_v42  ;;  %v2406_v9 = vld [vmem:[#allocation10 + $0x1738] sm:$0xff] }
 0x3da   :  { %2802 = vmatprep.mubr.f32.mxu1 %v5925_v3  ;;  %3086 = vmatprep.mubr.f32.mxu0 %v5925_v3  ;;  %v5935_v11 = vsel %vm1646_vm13, %v5442_v54, %v1654_v60  ;;  %v4747_v53 = vpack.c.bf16 %v2399_v46, %v2392_v44  ;;  %v5003_v54 = vpack.c.bf16 %v2401_v48, %v2394_v47  ;;  %v2415_v60 = vld [vmem:[#allocation10 + $0x1780] sm:$0xff]  ;;  %v2428_v23 = vld [vmem:[#allocation10 + $0x17e8] sm:$0xff]  ;;  %v2434_v24 = vld [vmem:[#allocation10 + $0x1818] sm:$0xff] }
 0x3db   :  { %2803 = vmatmul.mubr.f32.vlgmr.msra.gmra.mrb[4].mxu1 %v5930_v34  ;;  %3087 = vmatmul.mubr.f32.vlgmr.msra.gmra.mrb[10].mxu0 %v5930_v34  ;;  %v4751_v4 = vpack.c.bf16 %v2413_v58, %v2406_v9  ;;  %v5007_v5 = vpack.c.bf16 %v2415_v60, %v2408_v59  ;;  %v2441_v26 = vld [vmem:[#allocation10 + $0x1850] sm:$0xff]  ;;  %v2436_v27 = vld [vmem:[#allocation10 + $0x1828] sm:$0xff]  ;;  %v2443_v22 = vld [vmem:[#allocation10 + $0x1860] sm:$0xff] }
 0x3dc   :  { %4734 = vmatpush1.bf16.msra.mxu1 %v4733_v61  ;;  %4990 = vmatpush1.bf16.msra.mxu0 %v4989_v63  ;;  %v4749_v61 = vpack.c.bf16 %v2398_v52, %v2391_v56  ;;  %v5005_v63 = vpack.c.bf16 %v2400_v57, %v2393_v55  ;;  %v2433_v30 = vld [vmem:[#allocation10 + $0x1810] sm:$0xff]  ;;  %v2440_v31 = vld [vmem:[#allocation10 + $0x1848] sm:$0xff]  ;;  %v2435_v42 = vld [vmem:[#allocation10 + $0x1820] sm:$0xff] }
 0x3dd   :  { %2873 = vmatprep.mubr.f32.mxu1 %v5935_v11  ;;  %3157 = vmatprep.mubr.f32.mxu0 %v5935_v11  ;;  %v2442_v43 = vld [vmem:[#allocation10 + $0x1858] sm:$0xff]  ;;  %v2448_v44 = vld [vmem:[#allocation10 + $0x1888] sm:$0xff]  ;;  %v2455_v46 = vld [vmem:[#allocation10 + $0x18c0] sm:$0xff] }
 0x3de   :  { %4736 = vmatprep.subr.bf16.mxu1 %v4735_v13  ;;  %4992 = vmatprep.subr.bf16.mxu0 %v4991_v62  ;;  %v2414_v13 = vld [vmem:[#allocation10 + $0x1778] sm:$0xff]  ;;  %v2420_v62 = vld [vmem:[#allocation10 + $0x17a8] sm:$0xff]  ;;  %v2457_v48 = vld [vmem:[#allocation10 + $0x18d0] sm:$0xff] }
 0x3df   :  { %v2450_v47 = vld [vmem:[#allocation10 + $0x1898] sm:$0xff]  ;;  %v2447_v56 = vld [vmem:[#allocation10 + $0x1880] sm:$0xff]  ;;  %v2449_v55 = vld [vmem:[#allocation10 + $0x1890] sm:$0xff] }
 0x3e0   :  { %4738 = vmatpush1.bf16.msra.mxu1 %v4737_v17  ;;  %4994 = vmatpush1.bf16.msra.mxu0 %v4993_v14  ;;  %v4753_v17 = vpack.c.bf16 %v2412_v1, %v2405_v0  ;;  %v5009_v14 = vpack.c.bf16 %v2414_v13, %v2407_v6  ;;  %v2454_v52 = vld [vmem:[#allocation10 + $0x18b8] sm:$0xff]  ;;  %v2456_v57 = vld [vmem:[#allocation10 + $0x18c8] sm:$0xff]  ;;  %v2469_v58 = vld [vmem:[#allocation10 + $0x1930] sm:$0xff] }
 0x3e1   :  { %4740 = vmatprep.subr.bf16.mxu1 %v4739_v19  ;;  %4996 = vmatprep.subr.bf16.mxu0 %v4995_v20  ;;  %v4755_v19 = vpack.c.bf16 %v2427_v8, %v2420_v62  ;;  %v5011_v20 = vpack.c.bf16 %v2429_v10, %v2422_v25  ;;  %v2462_v9 = vld [vmem:[#allocation10 + $0x18f8] sm:$0xff]  ;;  %v2464_v59 = vld [vmem:[#allocation10 + $0x1908] sm:$0xff]  ;;  %v2471_v60 = vld [vmem:[#allocation10 + $0x1940] sm:$0xff] }
 0x3e2   :  { %v2461_v0 = vld [vmem:[#allocation10 + $0x18f0] sm:$0xff]  ;;  %v2468_v1 = vld [vmem:[#allocation10 + $0x1928] sm:$0xff]  ;;  %v2463_v6 = vld [vmem:[#allocation10 + $0x1900] sm:$0xff] }
 0x3e3   :  { %v2470_v13 = vld [vmem:[#allocation10 + $0x1938] sm:$0xff]  ;;  %v2476_v62 = vld [vmem:[#allocation10 + $0x1968] sm:$0xff]  ;;  %v2483_v8 = vld [vmem:[#allocation10 + $0x19a0] sm:$0xff] }
 0x3e4   :  { %4742 = vmatpush1.bf16.msra.mxu1 %v4741_v28  ;;  %4998 = vmatpush1.bf16.msra.mxu0 %v4997_v29  ;;  %v4757_v28 = vpack.c.bf16 %v2426_v18, %v2419_v16  ;;  %v5013_v29 = vpack.c.bf16 %v2428_v23, %v2421_v21  ;;  %v2478_v25 = vld [vmem:[#allocation10 + $0x1978] sm:$0xff]  ;;  %v2485_v10 = vld [vmem:[#allocation10 + $0x19b0] sm:$0xff]  ;;  %v2475_v16 = vld [vmem:[#allocation10 + $0x1960] sm:$0xff] }
 0x3e5   :  { %4744 = vmatprep.subr.bf16.mxu1 %v4743_v37  ;;  %5000 = vmatprep.subr.bf16.mxu0 %v4999_v39  ;;  %v4759_v37 = vpack.c.bf16 %v2441_v26, %v2434_v24  ;;  %v5015_v39 = vpack.c.bf16 %v2443_v22, %v2436_v27  ;;  %v2482_v18 = vld [vmem:[#allocation10 + $0x1998] sm:$0xff]  ;;  %v2477_v21 = vld [vmem:[#allocation10 + $0x1970] sm:$0xff]  ;;  %v2484_v23 = vld [vmem:[#allocation10 + $0x19a8] sm:$0xff] }
 0x3e6   :  { %v2490_v24 = vld [vmem:[#allocation10 + $0x19d8] sm:$0xff]  ;;  %v2497_v26 = vld [vmem:[#allocation10 + $0x1a10] sm:$0xff]  ;;  %v2492_v27 = vld [vmem:[#allocation10 + $0x19e8] sm:$0xff] }
 0x3e7   :  { %v2499_v22 = vld [vmem:[#allocation10 + $0x1a20] sm:$0xff] }
 0x3e8   :  { %4746 = vmatpush1.bf16.msra.mxu1 %v4745_v49  ;;  %5002 = vmatpush1.bf16.msra.mxu0 %v5001_v50  ;;  %v4761_v49 = vpack.c.bf16 %v2440_v31, %v2433_v30  ;;  %v5017_v50 = vpack.c.bf16 %v2442_v43, %v2435_v42  ;;  %v2489_v30 = vld [vmem:[#allocation10 + $0x19d0] sm:$0xff]  ;;  %v2496_v31 = vld [vmem:[#allocation10 + $0x1a08] sm:$0xff]  ;;  %v2491_v42 = vld [vmem:[#allocation10 + $0x19e0] sm:$0xff] }
 0x3e9   :  { %4748 = vmatprep.subr.bf16.mxu1 %v4747_v53  ;;  %5004 = vmatprep.subr.bf16.mxu0 %v5003_v54  ;;  %v4763_v53 = vpack.c.bf16 %v2455_v46, %v2448_v44  ;;  %v5019_v54 = vpack.c.bf16 %v2457_v48, %v2450_v47  ;;  %v2498_v43 = vld [vmem:[#allocation10 + $0x1a18] sm:$0xff]  ;;  %v2504_v44 = vld [vmem:[#allocation10 + $0x1a48] sm:$0xff]  ;;  %v2511_v46 = vld [vmem:[#allocation10 + $0x1a80] sm:$0xff] }
 0x3ea   :  { %v2506_v47 = vld [vmem:[#allocation10 + $0x1a58] sm:$0xff]  ;;  %v2513_v48 = vld [vmem:[#allocation10 + $0x1a90] sm:$0xff] }
 0x3ec   :  { %4750 = vmatpush1.bf16.msra.mxu1 %v4749_v61  ;;  %5006 = vmatpush1.bf16.msra.mxu0 %v5005_v63  ;;  %v4765_v61 = vpack.c.bf16 %v2454_v52, %v2447_v56  ;;  %v5021_v63 = vpack.c.bf16 %v2456_v57, %v2449_v55  ;;  %v2503_v56 = vld [vmem:[#allocation10 + $0x1a40] sm:$0xff]  ;;  %v2510_v52 = vld [vmem:[#allocation10 + $0x1a78] sm:$0xff]  ;;  %v2505_v55 = vld [vmem:[#allocation10 + $0x1a50] sm:$0xff] }
 0x3ed   :  { %4752 = vmatprep.subr.bf16.mxu1 %v4751_v4  ;;  %5008 = vmatprep.subr.bf16.mxu0 %v5007_v5  ;;  %v4767_v4 = vpack.c.bf16 %v2469_v58, %v2462_v9  ;;  %v5023_v5 = vpack.c.bf16 %v2471_v60, %v2464_v59  ;;  %v2512_v57 = vld [vmem:[#allocation10 + $0x1a88] sm:$0xff]  ;;  %v2518_v9 = vld [vmem:[#allocation10 + $0x1ab8] sm:$0xff]  ;;  %v2525_v58 = vld [vmem:[#allocation10 + $0x1af0] sm:$0xff] }
 0x3ee   :  { %v2520_v59 = vld [vmem:[#allocation10 + $0x1ac8] sm:$0xff]  ;;  %v2527_v60 = vld [vmem:[#allocation10 + $0x1b00] sm:$0xff] }
 0x3f0   :  { %4754 = vmatpush1.bf16.msra.mxu1 %v4753_v17  ;;  %5010 = vmatpush1.bf16.msra.mxu0 %v5009_v14  ;;  %v4769_v17 = vpack.c.bf16 %v2468_v1, %v2461_v0  ;;  %v5025_v14 = vpack.c.bf16 %v2470_v13, %v2463_v6  ;;  %v2517_v0 = vld [vmem:[#allocation10 + $0x1ab0] sm:$0xff]  ;;  %v2524_v1 = vld [vmem:[#allocation10 + $0x1ae8] sm:$0xff]  ;;  %v2519_v6 = vld [vmem:[#allocation10 + $0x1ac0] sm:$0xff] }
 0x3f1   :  { %4756 = vmatprep.subr.bf16.mxu1 %v4755_v19  ;;  %5012 = vmatprep.subr.bf16.mxu0 %v5011_v20  ;;  %v4771_v19 = vpack.c.bf16 %v2483_v8, %v2476_v62  ;;  %v5027_v20 = vpack.c.bf16 %v2485_v10, %v2478_v25  ;;  %v2526_v13 = vld [vmem:[#allocation10 + $0x1af8] sm:$0xff]  ;;  %v2532_v62 = vld [vmem:[#allocation10 + $0x1b28] sm:$0xff]  ;;  %v1057_v8 = vsub.s32 6, %v5831_v32  ;;  %v2539_v25 = vld [vmem:[#allocation10 + $0x1b60] sm:$0xff] }
 0x3f2   :  { %v2534_v10 = vld [vmem:[#allocation10 + $0x1b38] sm:$0xff] }
 0x3f4   :  { %4758 = vmatpush1.bf16.msra.mxu1 %v4757_v28  ;;  %5014 = vmatpush1.bf16.msra.mxu0 %v5013_v29  ;;  %v4773_v28 = vpack.c.bf16 %v2482_v18, %v2475_v16  ;;  %v5029_v29 = vpack.c.bf16 %v2484_v23, %v2477_v21  ;;  %v5041_v16 = vpack.c.bf16 %v2526_v13, %v2519_v6  ;;  %v2531_v18 = vld [vmem:[#allocation10 + $0x1b20] sm:$0xff]  ;;  %v2533_v23 = vld [vmem:[#allocation10 + $0x1b30] sm:$0xff] }
 0x3f5   :  { %4760 = vmatprep.subr.bf16.mxu1 %v4759_v37  ;;  %5016 = vmatprep.subr.bf16.mxu0 %v5015_v39  ;;  %v4775_v37 = vpack.c.bf16 %v2497_v26, %v2490_v24  ;;  %v5031_v39 = vpack.c.bf16 %v2499_v22, %v2492_v27  ;;  %v2540_v24 = vld [vmem:[#allocation10 + $0x1b68] sm:$0xff]  ;;  %v2546_v26 = vld [vmem:[#allocation10 + $0x1b98] sm:$0xff]  ;;  %v1058_v27 = vrot.slane %v5914_v12, %v1057_v8  ;;  %v2553_v22 = vld [vmem:[#allocation10 + $0x1bd0] sm:$0xff] }
 0x3f6   :  { %v1781_v12 = vld [vmem:[#allocation10 + $0x3b0] sm:$0xff]  ;;  %v1683_v6 = vld [vmem:[#allocation10 + $0xa0] sm:$0xff] }
 0x3f8   :  { %4762 = vmatpush1.bf16.msra.mxu1 %v4761_v49  ;;  %5018 = vmatpush1.bf16.msra.mxu0 %v5017_v50  ;;  %v4777_v49 = vpack.c.bf16 %v2496_v31, %v2489_v30  ;;  %v5033_v50 = vpack.c.bf16 %v2498_v43, %v2491_v42  ;;  %v5045_v31 = vpack.c.bf16 %v2540_v24, %v2533_v23  ;;  %v1695_v23 = vld [vmem:[#allocation10 + $0x100] sm:$0xff]  ;;  %v1702_v24 = vld [vmem:[#allocation10 + $0x138] sm:$0xff] }
 0x3f9   :  { %4764 = vmatprep.subr.bf16.mxu1 %v4763_v53  ;;  %5020 = vmatprep.subr.bf16.mxu0 %v5019_v54  ;;  %v4779_v53 = vpack.c.bf16 %v2511_v46, %v2504_v44  ;;  %v5035_v54 = vpack.c.bf16 %v2513_v48, %v2506_v47  ;;  %v4791_v42 = vpack.c.bf16 %v2553_v22, %v2546_v26  ;;  %v2547_v44 = vld [vmem:[#allocation10 + $0x1ba0] sm:$0xff]  ;;  %v2554_v46 = vld [vmem:[#allocation10 + $0x1bd8] sm:$0xff]  ;;  %v1668_v47 = vld [vmem:[#allocation10 + $0x28] sm:$0xff] }
 0x3fa   :  { %v5441_v48 = vadd.f32 %v5923_v38, %v1058_v27  ;;  %v1795_v38 = vld [vmem:[#allocation10 + $0x420] sm:$0xff]  ;;  %v1697_v26 = vld [vmem:[#allocation10 + $0x110] sm:$0xff]  ;;  %v1704_v22 = vld [vmem:[#allocation10 + $0x148] sm:$0xff] }
 0x3fc   :  { %4766 = vmatpush1.bf16.msra.mxu1 %v4765_v61  ;;  %5022 = vmatpush1.bf16.msra.mxu0 %v5021_v63  ;;  %v4781_v61 = vpack.c.bf16 %v2510_v52, %v2503_v56  ;;  %v5037_v63 = vpack.c.bf16 %v2512_v57, %v2505_v55  ;;  %v5049_v52 = vpack.c.bf16 %v2554_v46, %v2547_v44  ;;  %v1667_v55 = vld [vmem:[#allocation10 + $0x20] sm:$0xff]  ;;  %v1674_v57 = vld [vmem:[#allocation10 + $0x58] sm:$0xff]  ;;  %vm1645_vm14 = vcmp.gt.f32.partialorder %v5441_v48, 0.0 }
 0x3fd   :  { %4768 = vmatprep.subr.bf16.mxu1 %v4767_v4  ;;  %5024 = vmatprep.subr.bf16.mxu0 %v5023_v5  ;;  %v4783_v4 = vpack.c.bf16 %v2525_v58, %v2518_v9  ;;  %v5039_v5 = vpack.c.bf16 %v2527_v60, %v2520_v59  ;;  %v1653_v9 = vmul.f32 0.2, %v5441_v48  ;;  %v1669_v58 = vld [vmem:[#allocation10 + $0x30] sm:$0xff]  ;;  %v1676_v59 = vld [vmem:[#allocation10 + $0x68] sm:$0xff]  ;;  %v1682_v60 = vld [vmem:[#allocation10 + $0x98] sm:$0xff] }
 0x3fe   :  { %v1711_v44 = vld [vmem:[#allocation10 + $0x180] sm:$0xff] }
 0x3ff   :  { %v5944_v13 = vsel %vm1645_vm14, %v5441_v48, %v1653_v9  ;;  %v1724_v48 = vld [vmem:[#allocation10 + $0x1e8] sm:$0xff] }
 0x400   :  { %4770 = vmatpush1.bf16.msra.mxu1 %v4769_v17  ;;  %5026 = vmatpush1.bf16.msra.mxu0 %v5025_v14  ;;  %v2541_v17 = vld [vmem:[#allocation10 + $0x1b70] sm:$0xff]  ;;  %v4785_v14 = vpack.c.bf16 %v2524_v1, %v2517_v0  ;;  %v5053_v0 = vpack.c.bf16 %v1674_v57, %v1667_v55  ;;  %v5309_v1 = vpack.c.bf16 %v1676_v59, %v1669_v58  ;;  %v1730_v55 = vld [vmem:[#allocation10 + $0x218] sm:$0xff]  ;;  %v1732_v58 = vld [vmem:[#allocation10 + $0x228] sm:$0xff] }
 0x401   :  { %4772 = vmatprep.subr.bf16.mxu1 %v4771_v19  ;;  %5028 = vmatprep.subr.bf16.mxu0 %v5027_v20  ;;  %v2538_v19 = vld [vmem:[#allocation10 + $0x1b58] sm:$0xff]  ;;  %v4787_v20 = vpack.c.bf16 %v2539_v25, %v2532_v62  ;;  %v5043_v21 = vpack.c.bf16 %v2541_v17, %v2534_v10  ;;  %v1696_v17 = vld [vmem:[#allocation10 + $0x108] sm:$0xff]  ;;  %v1725_v57 = vld [vmem:[#allocation10 + $0x1f0] sm:$0xff] }
 0x402   :  { %v4789_v30 = vpack.c.bf16 %v2538_v19, %v2531_v18  ;;  %v1690_v10 = vld [vmem:[#allocation10 + $0xd8] sm:$0xff]  ;;  %v1816_v18 = vld [vmem:[#allocation10 + $0x4c8] sm:$0xff] }
 0x403   :  { %v1738_v59 = vld [vmem:[#allocation10 + $0x258] sm:$0xff] }
 0x404   :  { %4774 = vmatpush1.bf16.msra.mxu1 %v4773_v28  ;;  %5030 = vmatpush1.bf16.msra.mxu0 %v5029_v29  ;;  %v2548_v28 = vld [vmem:[#allocation10 + $0x1ba8] sm:$0xff]  ;;  %v2555_v29 = vld [vmem:[#allocation10 + $0x1be0] sm:$0xff] }
 0x405   :  { %4776 = vmatprep.subr.bf16.mxu1 %v4775_v37  ;;  %5032 = vmatprep.subr.bf16.mxu0 %v5031_v39  ;;  %v2545_v37 = vld [vmem:[#allocation10 + $0x1b90] sm:$0xff]  ;;  %v2552_v39 = vld [vmem:[#allocation10 + $0x1bc8] sm:$0xff]  ;;  %v5047_v43 = vpack.c.bf16 %v2555_v29, %v2548_v28  ;;  %v1710_v28 = vld [vmem:[#allocation10 + $0x178] sm:$0xff] }
 0x406   :  { %v4793_v56 = vpack.c.bf16 %v2552_v39, %v2545_v37  ;;  %v1717_v29 = vld [vmem:[#allocation10 + $0x1b0] sm:$0xff]  ;;  %v5061_v37 = vpack.c.bf16 %v1702_v24, %v1695_v23  ;;  %v5317_v39 = vpack.c.bf16 %v1704_v22, %v1697_v26  ;;  %v1758_v23 = vld [vmem:[#allocation10 + $0x2f8] sm:$0xff] }
 0x407   :  { %v1753_v24 = vld [vmem:[#allocation10 + $0x2d0] sm:$0xff]  ;;  %v1766_v22 = vld [vmem:[#allocation10 + $0x338] sm:$0xff] }
 0x408   :  { %4778 = vmatpush1.bf16.msra.mxu1 %v4777_v49  ;;  %5034 = vmatpush1.bf16.msra.mxu0 %v5033_v50  ;;  %v1675_v49 = vld [vmem:[#allocation10 + $0x60] sm:$0xff]  ;;  %v1788_v50 = vld [vmem:[#allocation10 + $0x3e8] sm:$0xff] }
 0x409   :  { %4780 = vmatprep.subr.bf16.mxu1 %v4779_v53  ;;  %5036 = vmatprep.subr.bf16.mxu0 %v5035_v54  ;;  %v5051_v53 = vpack.c.bf16 %v1675_v49, %v1668_v47  ;;  %v5307_v54 = vpack.c.bf16 %v1788_v50, %v1781_v12  ;;  %v1718_v47 = vld [vmem:[#allocation10 + $0x1b8] sm:$0xff]  ;;  %v1731_v49 = vld [vmem:[#allocation10 + $0x220] sm:$0xff]  ;;  %v1837_v12 = vld [vmem:[#allocation10 + $0x570] sm:$0xff] }
 0x40a   :  { %v1844_v50 = vld [vmem:[#allocation10 + $0x5a8] sm:$0xff] }
 0x40b   :  { %v5323_v9 = vpack.c.bf16 %v1844_v50, %v1837_v12  ;;  %v2012_v12 = vld [vmem:[#allocation10 + $0xae8] sm:$0xff] }
 0x40c   :  { %4782 = vmatpush1.bf16.msra.mxu1 %v4781_v61  ;;  %5038 = vmatpush1.bf16.msra.mxu0 %v5037_v63  ;;  %v1689_v61 = vld [vmem:[#allocation10 + $0xd0] sm:$0xff]  ;;  %v1802_v63 = vld [vmem:[#allocation10 + $0x458] sm:$0xff] }
 0x40d   :  { %4784 = vmatprep.subr.bf16.mxu1 %v4783_v4  ;;  %5040 = vmatprep.subr.bf16.mxu0 %v5039_v5  ;;  %v1681_v4 = vld [vmem:[#allocation10 + $0x90] sm:$0xff]  ;;  %v1688_v5 = vld [vmem:[#allocation10 + $0xc8] sm:$0xff]  ;;  %v5055_v62 = vpack.c.bf16 %v1689_v61, %v1682_v60  ;;  %v5311_v25 = vpack.c.bf16 %v1802_v63, %v1795_v38  ;;  %v1851_v61 = vld [vmem:[#allocation10 + $0x5e0] sm:$0xff] }
 0x40e   :  { %v5057_v19 = vpack.c.bf16 %v1688_v5, %v1681_v4  ;;  %v1745_v60 = vld [vmem:[#allocation10 + $0x290] sm:$0xff]  ;;  %v1858_v38 = vld [vmem:[#allocation10 + $0x618] sm:$0xff]  ;;  %v1744_v5 = vld [vmem:[#allocation10 + $0x288] sm:$0xff] }
 0x40f   :  { %v1737_v4 = vld [vmem:[#allocation10 + $0x250] sm:$0xff] }
 0x410   :  { %4786 = vmatpush1.bf16.msra.mxu1 %v4785_v14  ;;  %5042 = vmatpush1.bf16.msra.mxu0 %v5041_v16  ;;  %v1703_v14 = vld [vmem:[#allocation10 + $0x140] sm:$0xff]  ;;  %v1809_v16 = vld [vmem:[#allocation10 + $0x490] sm:$0xff] }
 0x411   :  { %4788 = vmatprep.subr.bf16.mxu1 %v4787_v20  ;;  %5044 = vmatprep.subr.bf16.mxu0 %v5043_v21  ;;  %v5313_v20 = vpack.c.bf16 %v1690_v10, %v1683_v6  ;;  %v5059_v21 = vpack.c.bf16 %v1703_v14, %v1696_v17  ;;  %v5315_v27 = vpack.c.bf16 %v1816_v18, %v1809_v16  ;;  %v1739_v6 = vld [vmem:[#allocation10 + $0x260] sm:$0xff]  ;;  %v1752_v10 = vld [vmem:[#allocation10 + $0x2c8] sm:$0xff]  ;;  %v1865_v14 = vld [vmem:[#allocation10 + $0x650] sm:$0xff] }
 0x412   :  { %v1759_v17 = vld [vmem:[#allocation10 + $0x300] sm:$0xff]  ;;  %v1872_v16 = vld [vmem:[#allocation10 + $0x688] sm:$0xff]  ;;  %v5073_v18 = vpack.c.bf16 %v1744_v5, %v1737_v4 }
 0x413   :  { %v5331_v26 = vpack.c.bf16 %v1872_v16, %v1865_v14  ;;  %v1907_v4 = vld [vmem:[#allocation10 + $0x7a0] sm:$0xff]  ;;  %v2040_v14 = vld [vmem:[#allocation10 + $0xbc8] sm:$0xff] }
 0x414   :  { %4790 = vmatpush1.bf16.msra.mxu1 %v4789_v30  ;;  %5046 = vmatpush1.bf16.msra.mxu0 %v5045_v31  ;;  %v1823_v30 = vld [vmem:[#allocation10 + $0x500] sm:$0xff]  ;;  %v1830_v31 = vld [vmem:[#allocation10 + $0x538] sm:$0xff] }
 0x415   :  { %4792 = vmatprep.subr.bf16.mxu1 %v4791_v42  ;;  %5048 = vmatprep.subr.bf16.mxu0 %v5047_v43  ;;  %v5063_v42 = vpack.c.bf16 %v1717_v29, %v1710_v28  ;;  %v1716_v43 = vld [vmem:[#allocation10 + $0x1a8] sm:$0xff]  ;;  %v5319_v46 = vpack.c.bf16 %v1830_v31, %v1823_v30  ;;  %v1773_v28 = vld [vmem:[#allocation10 + $0x370] sm:$0xff]  ;;  %v1879_v29 = vld [vmem:[#allocation10 + $0x6c0] sm:$0xff] }
 0x416   :  { %v1886_v30 = vld [vmem:[#allocation10 + $0x6f8] sm:$0xff] }
 0x418   :  { %4794 = vmatpush1.bf16.msra.mxu1 %v4793_v56  ;;  %5050 = vmatpush1.bf16.msra.mxu0 %v5049_v52  ;;  %v5321_v52 = vpack.c.bf16 %v1718_v47, %v1711_v44  ;;  %v5335_v44 = vpack.c.bf16 %v1886_v30, %v1879_v29  ;;  %v1780_v47 = vld [vmem:[#allocation10 + $0x3a8] sm:$0xff]  ;;  %v2054_v29 = vld [vmem:[#allocation10 + $0xc38] sm:$0xff] }
 0x419   :  { %5052 = vmatprep.subr.bf16.mxu1 %v5051_v53  ;;  %5308 = vmatprep.subr.bf16.mxu0 %v5307_v54  ;;  %v5067_v53 = vpack.c.bf16 %v1731_v49, %v1724_v48  ;;  %v1723_v54 = vld [vmem:[#allocation10 + $0x1e0] sm:$0xff]  ;;  %v2005_v49 = vld [vmem:[#allocation10 + $0xab0] sm:$0xff] }
 0x41a   :  { %v5069_v63 = vpack.c.bf16 %v1730_v55, %v1723_v54  ;;  %v1787_v48 = vld [vmem:[#allocation10 + $0x3e0] sm:$0xff]  ;;  %v1786_v54 = vld [vmem:[#allocation10 + $0x3d8] sm:$0xff]  ;;  %v5339_v55 = vpack.c.bf16 %v2012_v12, %v2005_v49  ;;  %v2068_v49 = vld [vmem:[#allocation10 + $0xca8] sm:$0xff] }
 0x41b   :  { %2874 = vmatmul.mubr.f32.vlgmr.msra.gmra.mrb[4].mxu1 %v5944_v13  ;;  %3158 = vmatmul.mubr.f32.vlgmr.msra.gmra.mrb[10].mxu0 %v5944_v13 }
 0x41c   :  { %5054 = vmatpush1.bf16.msra.mxu1 %v5053_v0  ;;  %3228 = vmatprep.mubr.f32.mxu1 %v5890_v40  ;;  %v5325_v0 = vpack.c.bf16 %v1732_v58, %v1725_v57  ;;  %v1893_v57 = vld [vmem:[#allocation10 + $0x730] sm:$0xff]  ;;  %v1794_v58 = vld [vmem:[#allocation10 + $0x418] sm:$0xff] }
 0x41d   :  { %5310 = vmatpush3.bf16.msra.mxu0 %v5309_v1  ;;  %3512 = vmatprep.mubr.f32.mxu0 %v5890_v40  ;;  %v1709_v40 = vld [vmem:[#allocation10 + $0x170] sm:$0xff]  ;;  %v5071_v1 = vpack.c.bf16 %v1745_v60, %v1738_v59  ;;  %v2019_v60 = vld [vmem:[#allocation10 + $0xb20] sm:$0xff] }
 0x41e   :  { %5056 = vmatprep.subr.bf16.mxu1 %v5055_v62  ;;  %5312 = vmatprep.subr.bf16.mxu0 %v5311_v25  ;;  %v5065_v56 = vpack.c.bf16 %v1716_v43, %v1709_v40  ;;  %v5327_v62 = vpack.c.bf16 %v1858_v38, %v1851_v61  ;;  %v1746_v25 = vld [vmem:[#allocation10 + $0x298] sm:$0xff]  ;;  %v1772_v40 = vld [vmem:[#allocation10 + $0x368] sm:$0xff]  ;;  %v1767_v43 = vld [vmem:[#allocation10 + $0x340] sm:$0xff] }
 0x41f   :  { %v1801_v59 = vld [vmem:[#allocation10 + $0x450] sm:$0xff]  ;;  %v2026_v61 = vld [vmem:[#allocation10 + $0xb58] sm:$0xff] }
 0x420   :  { %5058 = vmatpush1.bf16.msra.mxu1 %v5057_v19  ;;  %v5329_v19 = vpack.c.bf16 %v1746_v25, %v1739_v6  ;;  %v5087_v5 = vpack.c.bf16 %v1801_v59, %v1794_v58  ;;  %v5343_v6 = vpack.c.bf16 %v2026_v61, %v2019_v60  ;;  %v1808_v25 = vld [vmem:[#allocation10 + $0x488] sm:$0xff]  ;;  %v1857_v58 = vld [vmem:[#allocation10 + $0x610] sm:$0xff]  ;;  %v2075_v59 = vld [vmem:[#allocation10 + $0xce0] sm:$0xff] }
 0x421   :  { %5314 = vmatpush3.bf16.msra.mxu0 %v5313_v20  ;;  %5060 = vmatprep.subr.bf16.mxu1 %v5059_v21  ;;  %v5075_v20 = vpack.c.bf16 %v1759_v17, %v1752_v10  ;;  %v1751_v21 = vld [vmem:[#allocation10 + $0x2c0] sm:$0xff]  ;;  %v2033_v17 = vld [vmem:[#allocation10 + $0xb90] sm:$0xff]  ;;  %v2082_v60 = vld [vmem:[#allocation10 + $0xd18] sm:$0xff] }
 0x422   :  { %5316 = vmatprep.subr.bf16.mxu0 %v5315_v27  ;;  %v1760_v27 = vld [vmem:[#allocation10 + $0x308] sm:$0xff]  ;;  %v5077_v31 = vpack.c.bf16 %v1758_v23, %v1751_v21  ;;  %v1815_v10 = vld [vmem:[#allocation10 + $0x4c0] sm:$0xff]  ;;  %v1814_v21 = vld [vmem:[#allocation10 + $0x4b8] sm:$0xff] }
 0x423   :  { %v1921_v23 = vld [vmem:[#allocation10 + $0x810] sm:$0xff] }
 0x424   :  { %5062 = vmatpush1.bf16.msra.mxu1 %v5061_v37  ;;  %v5333_v37 = vpack.c.bf16 %v1760_v27, %v1753_v24  ;;  %v5347_v24 = vpack.c.bf16 %v2040_v14, %v2033_v17  ;;  %v1822_v27 = vld [vmem:[#allocation10 + $0x4f8] sm:$0xff]  ;;  %v2096_v17 = vld [vmem:[#allocation10 + $0xd88] sm:$0xff] }
 0x425   :  { %5318 = vmatpush3.bf16.msra.mxu0 %v5317_v39  ;;  %5064 = vmatprep.subr.bf16.mxu1 %v5063_v42  ;;  %v5079_v39 = vpack.c.bf16 %v1773_v28, %v1766_v22  ;;  %v1765_v42 = vld [vmem:[#allocation10 + $0x330] sm:$0xff]  ;;  %v2047_v28 = vld [vmem:[#allocation10 + $0xc00] sm:$0xff] }
 0x426   :  { %5320 = vmatprep.subr.bf16.mxu0 %v5319_v46  ;;  %v1774_v46 = vld [vmem:[#allocation10 + $0x378] sm:$0xff]  ;;  %v5081_v50 = vpack.c.bf16 %v1772_v40, %v1765_v42  ;;  %v1829_v22 = vld [vmem:[#allocation10 + $0x530] sm:$0xff]  ;;  %v1828_v42 = vld [vmem:[#allocation10 + $0x528] sm:$0xff] }
 0x427   :  { %v1935_v40 = vld [vmem:[#allocation10 + $0x880] sm:$0xff] }
 0x428   :  { %5066 = vmatpush1.bf16.msra.mxu1 %v5065_v56  ;;  %v5337_v56 = vpack.c.bf16 %v1774_v46, %v1767_v43  ;;  %v5351_v43 = vpack.c.bf16 %v2054_v29, %v2047_v28  ;;  %v1836_v46 = vld [vmem:[#allocation10 + $0x568] sm:$0xff]  ;;  %v2110_v28 = vld [vmem:[#allocation10 + $0xdf8] sm:$0xff] }
 0x429   :  { %5322 = vmatpush3.bf16.msra.mxu0 %v5321_v52  ;;  %5068 = vmatprep.subr.bf16.mxu1 %v5067_v53  ;;  %v5083_v52 = vpack.c.bf16 %v1787_v48, %v1780_v47  ;;  %v1779_v53 = vld [vmem:[#allocation10 + $0x3a0] sm:$0xff]  ;;  %v2061_v48 = vld [vmem:[#allocation10 + $0xc70] sm:$0xff] }
 0x42a   :  { %5324 = vmatprep.subr.bf16.mxu0 %v5323_v9  ;;  %v1900_v9 = vld [vmem:[#allocation10 + $0x768] sm:$0xff]  ;;  %v5085_v38 = vpack.c.bf16 %v1786_v54, %v1779_v53  ;;  %v1843_v47 = vld [vmem:[#allocation10 + $0x5a0] sm:$0xff]  ;;  %v1842_v53 = vld [vmem:[#allocation10 + $0x598] sm:$0xff] }
 0x42b   :  { %v1949_v54 = vld [vmem:[#allocation10 + $0x8f0] sm:$0xff] }
 0x42c   :  { %5070 = vmatpush1.bf16.msra.mxu1 %v5069_v63  ;;  %v5341_v63 = vpack.c.bf16 %v1900_v9, %v1893_v57  ;;  %v1956_v57 = vld [vmem:[#allocation10 + $0x928] sm:$0xff]  ;;  %v1850_v9 = vld [vmem:[#allocation10 + $0x5d8] sm:$0xff] }
 0x42d   :  { %5326 = vmatpush3.bf16.msra.mxu0 %v5325_v0  ;;  %5072 = vmatprep.subr.bf16.mxu1 %v5071_v1  ;;  %v1793_v0 = vld [vmem:[#allocation10 + $0x410] sm:$0xff]  ;;  %v1800_v1 = vld [vmem:[#allocation10 + $0x448] sm:$0xff] }
 0x42e   :  { %5328 = vmatprep.subr.bf16.mxu0 %v5327_v62  ;;  %v1914_v62 = vld [vmem:[#allocation10 + $0x7d8] sm:$0xff]  ;;  %v5089_v16 = vpack.c.bf16 %v1800_v1, %v1793_v0  ;;  %v1849_v0 = vld [vmem:[#allocation10 + $0x5d0] sm:$0xff]  ;;  %v1856_v1 = vld [vmem:[#allocation10 + $0x608] sm:$0xff] }
 0x42f   :  { %v5105_v14 = vpack.c.bf16 %v1856_v1, %v1849_v0  ;;  %v2131_v0 = vld [vmem:[#allocation10 + $0xea0] sm:$0xff] }
 0x430   :  { %5074 = vmatpush1.bf16.msra.mxu1 %v5073_v18  ;;  %v5345_v18 = vpack.c.bf16 %v1914_v62, %v1907_v4  ;;  %v1963_v4 = vld [vmem:[#allocation10 + $0x960] sm:$0xff]  ;;  %v1864_v62 = vld [vmem:[#allocation10 + $0x648] sm:$0xff] }
 0x431   :  { %5330 = vmatpush3.bf16.msra.mxu0 %v5329_v19  ;;  %5076 = vmatprep.subr.bf16.mxu1 %v5075_v20  ;;  %v5091_v19 = vpack.c.bf16 %v1815_v10, %v1808_v25  ;;  %v1807_v20 = vld [vmem:[#allocation10 + $0x480] sm:$0xff]  ;;  %v2089_v10 = vld [vmem:[#allocation10 + $0xd50] sm:$0xff] }
 0x432   :  { %5332 = vmatprep.subr.bf16.mxu0 %v5331_v26  ;;  %v1928_v26 = vld [vmem:[#allocation10 + $0x848] sm:$0xff]  ;;  %v5093_v30 = vpack.c.bf16 %v1814_v21, %v1807_v20  ;;  %v1871_v25 = vld [vmem:[#allocation10 + $0x680] sm:$0xff]  ;;  %v1870_v20 = vld [vmem:[#allocation10 + $0x678] sm:$0xff] }
 0x433   :  { %v1977_v21 = vld [vmem:[#allocation10 + $0x9d0] sm:$0xff] }
 0x434   :  { %5078 = vmatpush1.bf16.msra.mxu1 %v5077_v31  ;;  %v5349_v31 = vpack.c.bf16 %v1928_v26, %v1921_v23  ;;  %v5363_v23 = vpack.c.bf16 %v2096_v17, %v2089_v10  ;;  %v1878_v26 = vld [vmem:[#allocation10 + $0x6b8] sm:$0xff]  ;;  %v2264_v10 = vld [vmem:[#allocation10 + $0x12c8] sm:$0xff] }
 0x435   :  { %5334 = vmatpush3.bf16.msra.mxu0 %v5333_v37  ;;  %5080 = vmatprep.subr.bf16.mxu1 %v5079_v39  ;;  %v5095_v37 = vpack.c.bf16 %v1829_v22, %v1822_v27  ;;  %v1821_v39 = vld [vmem:[#allocation10 + $0x4f0] sm:$0xff]  ;;  %v2103_v22 = vld [vmem:[#allocation10 + $0xdc0] sm:$0xff] }
 0x436   :  { %5336 = vmatprep.subr.bf16.mxu0 %v5335_v44  ;;  %v1942_v44 = vld [vmem:[#allocation10 + $0x8b8] sm:$0xff]  ;;  %v5097_v12 = vpack.c.bf16 %v1828_v42, %v1821_v39  ;;  %v1885_v27 = vld [vmem:[#allocation10 + $0x6f0] sm:$0xff]  ;;  %v1884_v39 = vld [vmem:[#allocation10 + $0x6e8] sm:$0xff] }
 0x437   :  { %v1991_v42 = vld [vmem:[#allocation10 + $0xa40] sm:$0xff] }
 0x438   :  { %5082 = vmatpush1.bf16.msra.mxu1 %v5081_v50  ;;  %v5353_v50 = vpack.c.bf16 %v1942_v44, %v1935_v40  ;;  %v5367_v40 = vpack.c.bf16 %v2110_v28, %v2103_v22  ;;  %v1892_v44 = vld [vmem:[#allocation10 + $0x728] sm:$0xff] }
 0x439   :  { %5338 = vmatpush3.bf16.msra.mxu0 %v5337_v56  ;;  %5084 = vmatprep.subr.bf16.mxu1 %v5083_v52  ;;  %v5099_v56 = vpack.c.bf16 %v1843_v47, %v1836_v46  ;;  %v1835_v52 = vld [vmem:[#allocation10 + $0x560] sm:$0xff]  ;;  %v2229_v47 = vld [vmem:[#allocation10 + $0x11b0] sm:$0xff] }
 0x43a   :  { %5340 = vmatprep.subr.bf16.mxu0 %v5339_v55  ;;  %v5355_v55 = vpack.c.bf16 %v2068_v49, %v2061_v48  ;;  %v5101_v61 = vpack.c.bf16 %v1842_v53, %v1835_v52  ;;  %v1899_v46 = vld [vmem:[#allocation10 + $0x760] sm:$0xff]  ;;  %v2236_v48 = vld [vmem:[#allocation10 + $0x11e8] sm:$0xff]  ;;  %v1898_v52 = vld [vmem:[#allocation10 + $0x758] sm:$0xff] }
 0x43b   :  { %v5371_v53 = vpack.c.bf16 %v2236_v48, %v2229_v47 }
 0x43c   :  { %3513 = vmatmul.mubr.f32.vlgmr.msra.gmra.mrb[12].mxu0 %v5895_v45  ;;  %5086 = vmatpush1.bf16.msra.mxu1 %v5085_v38  ;;  %v5357_v38 = vpack.c.bf16 %v1956_v57, %v1949_v54  ;;  %v2117_v54 = vld [vmem:[#allocation10 + $0xe30] sm:$0xff]  ;;  %v1906_v57 = vld [vmem:[#allocation10 + $0x798] sm:$0xff] }
 0x43d   :  { %5342 = vmatpush3.bf16.msra.mxu0 %v5341_v63  ;;  %3582 = vmatprep.mubr.f32.mxu0 %v5900_v51  ;;  %v5103_v63 = vpack.c.bf16 %v1857_v58, %v1850_v9  ;;  %v1913_v9 = vld [vmem:[#allocation10 + $0x7d0] sm:$0xff] }
 0x43e   :  { %5088 = vmatprep.subr.bf16.mxu1 %v5087_v5  ;;  %5344 = vmatprep.subr.bf16.mxu0 %v5343_v6  ;;  %v5359_v5 = vpack.c.bf16 %v2082_v60, %v2075_v59  ;;  %v1970_v6 = vld [vmem:[#allocation10 + $0x998] sm:$0xff]  ;;  %v2243_v59 = vld [vmem:[#allocation10 + $0x1220] sm:$0xff]  ;;  %v5119_v1 = vpack.c.bf16 %v1913_v9, %v1906_v57 }
 0x43f   :  { %v2250_v60 = vld [vmem:[#allocation10 + $0x1258] sm:$0xff] }
 0x440   :  { %5090 = vmatpush1.bf16.msra.mxu1 %v5089_v16  ;;  %v5361_v16 = vpack.c.bf16 %v1970_v6, %v1963_v4  ;;  %v2138_v4 = vld [vmem:[#allocation10 + $0xed8] sm:$0xff]  ;;  %v1927_v6 = vld [vmem:[#allocation10 + $0x840] sm:$0xff] }
 0x441   :  { %5346 = vmatpush3.bf16.msra.mxu0 %v5345_v18  ;;  %5092 = vmatprep.subr.bf16.mxu1 %v5091_v19  ;;  %v5107_v18 = vpack.c.bf16 %v1871_v25, %v1864_v62  ;;  %v1863_v19 = vld [vmem:[#allocation10 + $0x640] sm:$0xff]  ;;  %v5375_v62 = vpack.c.bf16 %v2250_v60, %v2243_v59  ;;  %v2257_v25 = vld [vmem:[#allocation10 + $0x1290] sm:$0xff]  ;;  %v2306_v57 = vld [vmem:[#allocation10 + $0x1418] sm:$0xff] }
 0x442   :  { %5348 = vmatprep.subr.bf16.mxu0 %v5347_v24  ;;  %v1984_v24 = vld [vmem:[#allocation10 + $0xa08] sm:$0xff]  ;;  %v5109_v29 = vpack.c.bf16 %v1870_v20, %v1863_v19  ;;  %v1926_v19 = vld [vmem:[#allocation10 + $0x838] sm:$0xff]  ;;  %v2145_v20 = vld [vmem:[#allocation10 + $0xf10] sm:$0xff] }
 0x443   :  { %v1961_v60 = vld [vmem:[#allocation10 + $0x950] sm:$0xff] }
 0x444   :  { %5094 = vmatpush1.bf16.msra.mxu1 %v5093_v30  ;;  %v5365_v30 = vpack.c.bf16 %v1984_v24, %v1977_v21  ;;  %v5379_v21 = vpack.c.bf16 %v2264_v10, %v2257_v25  ;;  %v1941_v24 = vld [vmem:[#allocation10 + $0x8b0] sm:$0xff] }
 0x445   :  { %5350 = vmatpush3.bf16.msra.mxu0 %v5349_v31  ;;  %5096 = vmatprep.subr.bf16.mxu1 %v5095_v37  ;;  %v5111_v31 = vpack.c.bf16 %v1885_v27, %v1878_v26  ;;  %v1877_v37 = vld [vmem:[#allocation10 + $0x6b0] sm:$0xff]  ;;  %v2271_v26 = vld [vmem:[#allocation10 + $0x1300] sm:$0xff]  ;;  %v2278_v27 = vld [vmem:[#allocation10 + $0x1338] sm:$0xff] }
 0x446   :  { %5352 = vmatprep.subr.bf16.mxu0 %v5351_v43  ;;  %v1998_v43 = vld [vmem:[#allocation10 + $0xa78] sm:$0xff]  ;;  %v5113_v49 = vpack.c.bf16 %v1884_v39, %v1877_v37  ;;  %v5383_v37 = vpack.c.bf16 %v2278_v27, %v2271_v26 }
 0x447   :  { %v2166_v39 = vld [vmem:[#allocation10 + $0xfb8] sm:$0xff] }
 0x448   :  { %5098 = vmatpush1.bf16.msra.mxu1 %v5097_v12  ;;  %v5369_v12 = vpack.c.bf16 %v1998_v43, %v1991_v42  ;;  %v1948_v42 = vld [vmem:[#allocation10 + $0x8e8] sm:$0xff]  ;;  %v2285_v43 = vld [vmem:[#allocation10 + $0x1370] sm:$0xff] }
 0x449   :  { %5354 = vmatpush3.bf16.msra.mxu0 %v5353_v50  ;;  %5100 = vmatprep.subr.bf16.mxu1 %v5099_v56  ;;  %v5115_v50 = vpack.c.bf16 %v1899_v46, %v1892_v44  ;;  %v1891_v56 = vld [vmem:[#allocation10 + $0x720] sm:$0xff]  ;;  %v2292_v44 = vld [vmem:[#allocation10 + $0x13a8] sm:$0xff] }
 0x44a   :  { %5356 = vmatprep.subr.bf16.mxu0 %v5355_v55  ;;  %v2124_v55 = vld [vmem:[#allocation10 + $0xe68] sm:$0xff]  ;;  %v5117_v58 = vpack.c.bf16 %v1898_v52, %v1891_v56  ;;  %v5387_v56 = vpack.c.bf16 %v2292_v44, %v2285_v43 }
 0x44b   :  { %v2180_v52 = vld [vmem:[#allocation10 + $0x1028] sm:$0xff] }
 0x44c   :  { %5102 = vmatpush1.bf16.msra.mxu1 %v5101_v61  ;;  %v5373_v61 = vpack.c.bf16 %v2124_v55, %v2117_v54  ;;  %v1969_v54 = vld [vmem:[#allocation10 + $0x990] sm:$0xff]  ;;  %v2299_v55 = vld [vmem:[#allocation10 + $0x13e0] sm:$0xff] }
 0x44d   :  { %5358 = vmatpush3.bf16.msra.mxu0 %v5357_v38  ;;  %5104 = vmatprep.subr.bf16.mxu1 %v5103_v63  ;;  %v1905_v38 = vld [vmem:[#allocation10 + $0x790] sm:$0xff]  ;;  %v1912_v63 = vld [vmem:[#allocation10 + $0x7c8] sm:$0xff] }
 0x44e   :  { %5360 = vmatprep.subr.bf16.mxu0 %v5359_v5  ;;  %v1920_v5 = vld [vmem:[#allocation10 + $0x808] sm:$0xff]  ;;  %v5121_v17 = vpack.c.bf16 %v1912_v63, %v1905_v38  ;;  %v2187_v38 = vld [vmem:[#allocation10 + $0x1060] sm:$0xff]  ;;  %v5391_v63 = vpack.c.bf16 %v2306_v57, %v2299_v55  ;;  %v2017_v57 = vld [vmem:[#allocation10 + $0xb10] sm:$0xff] }
 0x450   :  { %5106 = vmatpush1.bf16.msra.mxu1 %v5105_v14  ;;  %v5377_v14 = vpack.c.bf16 %v2138_v4, %v2131_v0  ;;  %v2194_v0 = vld [vmem:[#allocation10 + $0x1098] sm:$0xff]  ;;  %v1983_v4 = vld [vmem:[#allocation10 + $0xa00] sm:$0xff] }
 0x451   :  { %5362 = vmatpush3.bf16.msra.mxu0 %v5361_v16  ;;  %5108 = vmatprep.subr.bf16.mxu1 %v5107_v18  ;;  %v5123_v16 = vpack.c.bf16 %v1927_v6, %v1920_v5  ;;  %v1919_v18 = vld [vmem:[#allocation10 + $0x800] sm:$0xff]  ;;  %v2313_v5 = vld [vmem:[#allocation10 + $0x1450] sm:$0xff]  ;;  %v2320_v6 = vld [vmem:[#allocation10 + $0x1488] sm:$0xff]  ;;  %v5393_v25 = vpack.c.bf16 %v2194_v0, %v2187_v38 }
 0x452   :  { %5364 = vmatprep.subr.bf16.mxu0 %v5363_v23  ;;  %v1934_v23 = vld [vmem:[#allocation10 + $0x878] sm:$0xff]  ;;  %v5125_v22 = vpack.c.bf16 %v1926_v19, %v1919_v18  ;;  %v5395_v18 = vpack.c.bf16 %v2320_v6, %v2313_v5  ;;  %v2208_v19 = vld [vmem:[#allocation10 + $0x1108] sm:$0xff]  ;;  %v2481_v0 = vld [vmem:[#allocation10 + $0x1990] sm:$0xff] }
 0x453   :  { %v5127_v28 = vpack.c.bf16 %v1941_v24, %v1934_v23  ;;  %v2334_v23 = vld [vmem:[#allocation10 + $0x14f8] sm:$0xff]  ;;  %v2032_v38 = vld [vmem:[#allocation10 + $0xb88] sm:$0xff] }
 0x454   :  { %5110 = vmatpush1.bf16.msra.mxu1 %v5109_v29  ;;  %v1933_v29 = vld [vmem:[#allocation10 + $0x870] sm:$0xff] }
 0x455   :  { %5366 = vmatpush3.bf16.msra.mxu0 %v5365_v30  ;;  %5112 = vmatprep.subr.bf16.mxu1 %v5111_v31  ;;  %v1940_v30 = vld [vmem:[#allocation10 + $0x8a8] sm:$0xff]  ;;  %v2159_v31 = vld [vmem:[#allocation10 + $0xf80] sm:$0xff] }
 0x456   :  { %5368 = vmatprep.subr.bf16.mxu0 %v5367_v40  ;;  %v1955_v40 = vld [vmem:[#allocation10 + $0x920] sm:$0xff]  ;;  %v5129_v46 = vpack.c.bf16 %v1940_v30, %v1933_v29  ;;  %v5385_v47 = vpack.c.bf16 %v2166_v39, %v2159_v31  ;;  %v2222_v30 = vld [vmem:[#allocation10 + $0x1178] sm:$0xff]  ;;  %v2004_v31 = vld [vmem:[#allocation10 + $0xaa8] sm:$0xff] }
 0x457   :  { %v5131_v48 = vpack.c.bf16 %v1955_v40, %v1948_v42  ;;  %v2453_v39 = vld [vmem:[#allocation10 + $0x18b0] sm:$0xff]  ;;  %v2460_v42 = vld [vmem:[#allocation10 + $0x18e8] sm:$0xff] }
 0x458   :  { %5114 = vmatpush1.bf16.msra.mxu1 %v5113_v49  ;;  %v1947_v49 = vld [vmem:[#allocation10 + $0x8e0] sm:$0xff] }
 0x459   :  { %5370 = vmatpush3.bf16.msra.mxu0 %v5369_v12  ;;  %5116 = vmatprep.subr.bf16.mxu1 %v5115_v50  ;;  %v1954_v12 = vld [vmem:[#allocation10 + $0x918] sm:$0xff]  ;;  %v2173_v50 = vld [vmem:[#allocation10 + $0xff0] sm:$0xff] }
 0x45a   :  { %5372 = vmatprep.subr.bf16.mxu0 %v5371_v53  ;;  %v1962_v53 = vld [vmem:[#allocation10 + $0x958] sm:$0xff]  ;;  %v5133_v9 = vpack.c.bf16 %v1954_v12, %v1947_v49  ;;  %v2341_v49 = vld [vmem:[#allocation10 + $0x1530] sm:$0xff]  ;;  %v2348_v12 = vld [vmem:[#allocation10 + $0x1568] sm:$0xff] }
 0x45b   :  { %3229 = vmatmul.mubr.f32.vlgmr.msra.gmra.mrb[6].mxu1 %v5895_v45  ;;  %v2152_v45 = vld [vmem:[#allocation10 + $0xf48] sm:$0xff]  ;;  %v5135_v59 = vpack.c.bf16 %v1969_v54, %v1962_v53  ;;  %v2474_v53 = vld [vmem:[#allocation10 + $0x1958] sm:$0xff]  ;;  %v5405_v55 = vpack.c.bf16 %v2348_v12, %v2341_v49  ;;  %v2081_v49 = vld [vmem:[#allocation10 + $0xd10] sm:$0xff] }
 0x45c   :  { %3583 = vmatmul.mubr.f32.vlgmr.msra.gmra.mrb[14].mxu0 %v5907_v15  ;;  %5118 = vmatpush1.bf16.msra.mxu1 %v5117_v58  ;;  %v5389_v58 = vpack.c.bf16 %v2180_v52, %v2173_v50  ;;  %v2018_v50 = vld [vmem:[#allocation10 + $0xb18] sm:$0xff]  ;;  %v2467_v52 = vld [vmem:[#allocation10 + $0x1920] sm:$0xff] }
 0x45d   :  { %3299 = vmatprep.mubr.f32.mxu1 %v5900_v51  ;;  %5374 = vmatpush3.bf16.msra.mxu0 %v5373_v61  ;;  %v5381_v51 = vpack.c.bf16 %v2152_v45, %v2145_v20  ;;  %v1968_v61 = vld [vmem:[#allocation10 + $0x988] sm:$0xff]  ;;  %v1990_v20 = vld [vmem:[#allocation10 + $0xa38] sm:$0xff]  ;;  %v2327_v45 = vld [vmem:[#allocation10 + $0x14c0] sm:$0xff] }
 0x45e   :  { %3652 = vmatprep.mubr.f32.mxu0 %v5925_v3  ;;  %5120 = vmatprep.subr.bf16.mxu1 %v5119_v1  ;;  %v1976_v1 = vld [vmem:[#allocation10 + $0x9c8] sm:$0xff]  ;;  %v5399_v29 = vpack.c.bf16 %v2334_v23, %v2327_v45  ;;  %v2523_v12 = vld [vmem:[#allocation10 + $0x1ae0] sm:$0xff] }
 0x45f   :  { %5376 = vmatprep.subr.bf16.mxu0 %v5375_v62  ;;  %v5137_v62 = vpack.c.bf16 %v1968_v61, %v1961_v60  ;;  %v5139_v10 = vpack.c.bf16 %v1983_v4, %v1976_v1  ;;  %v5407_v60 = vpack.c.bf16 %v2474_v53, %v2467_v52  ;;  %v2362_v61 = vld [vmem:[#allocation10 + $0x15d8] sm:$0xff]  ;;  %v2488_v1 = vld [vmem:[#allocation10 + $0x19c8] sm:$0xff] }
 0x460   :  { %5122 = vmatpush1.bf16.msra.mxu1 %v5121_v17  ;;  %v1975_v17 = vld [vmem:[#allocation10 + $0x9c0] sm:$0xff] }
 0x461   :  { %5378 = vmatpush3.bf16.msra.mxu0 %v5377_v14  ;;  %5124 = vmatprep.subr.bf16.mxu1 %v5123_v16  ;;  %v1982_v14 = vld [vmem:[#allocation10 + $0x9f8] sm:$0xff]  ;;  %v2201_v16 = vld [vmem:[#allocation10 + $0x10d0] sm:$0xff] }
 0x462   :  { %5380 = vmatprep.subr.bf16.mxu0 %v5379_v21  ;;  %v1997_v21 = vld [vmem:[#allocation10 + $0xa70] sm:$0xff]  ;;  %v5141_v24 = vpack.c.bf16 %v1982_v14, %v1975_v17  ;;  %v5397_v26 = vpack.c.bf16 %v2208_v19, %v2201_v16  ;;  %v5411_v17 = vpack.c.bf16 %v2488_v1, %v2481_v0  ;;  %v2376_v14 = vld [vmem:[#allocation10 + $0x1648] sm:$0xff]  ;;  %v2046_v16 = vld [vmem:[#allocation10 + $0xbf8] sm:$0xff] }
 0x463   :  { %v5143_v27 = vpack.c.bf16 %v1997_v21, %v1990_v20  ;;  %v2495_v19 = vld [vmem:[#allocation10 + $0x1a00] sm:$0xff]  ;;  %v2502_v20 = vld [vmem:[#allocation10 + $0x1a38] sm:$0xff] }
 0x464   :  { %5126 = vmatpush1.bf16.msra.mxu1 %v5125_v22  ;;  %v1989_v22 = vld [vmem:[#allocation10 + $0xa30] sm:$0xff] }
 0x465   :  { %5382 = vmatpush3.bf16.msra.mxu0 %v5381_v51  ;;  %5128 = vmatprep.subr.bf16.mxu1 %v5127_v28  ;;  %v1996_v51 = vld [vmem:[#allocation10 + $0xa68] sm:$0xff]  ;;  %v2215_v28 = vld [vmem:[#allocation10 + $0x1140] sm:$0xff] }
 0x466   :  { %5384 = vmatprep.subr.bf16.mxu0 %v5383_v37  ;;  %v2011_v37 = vld [vmem:[#allocation10 + $0xae0] sm:$0xff]  ;;  %v5145_v40 = vpack.c.bf16 %v1996_v51, %v1989_v22  ;;  %v5401_v43 = vpack.c.bf16 %v2222_v30, %v2215_v28  ;;  %v5415_v22 = vpack.c.bf16 %v2502_v20, %v2495_v19  ;;  %v2390_v51 = vld [vmem:[#allocation10 + $0x16b8] sm:$0xff]  ;;  %v2060_v28 = vld [vmem:[#allocation10 + $0xc68] sm:$0xff] }
 0x467   :  { %v5147_v44 = vpack.c.bf16 %v2011_v37, %v2004_v31  ;;  %v2509_v30 = vld [vmem:[#allocation10 + $0x1a70] sm:$0xff]  ;;  %v2516_v31 = vld [vmem:[#allocation10 + $0x1aa8] sm:$0xff] }
 0x468   :  { %5130 = vmatpush1.bf16.msra.mxu1 %v5129_v46  ;;  %v2003_v46 = vld [vmem:[#allocation10 + $0xaa0] sm:$0xff] }
 0x469   :  { %5386 = vmatpush3.bf16.msra.mxu0 %v5385_v47  ;;  %5132 = vmatprep.subr.bf16.mxu1 %v5131_v48  ;;  %v2010_v47 = vld [vmem:[#allocation10 + $0xad8] sm:$0xff]  ;;  %v5403_v48 = vpack.c.bf16 %v2460_v42, %v2453_v39 }
 0x46a   :  { %5388 = vmatprep.subr.bf16.mxu0 %v5387_v56  ;;  %v2025_v56 = vld [vmem:[#allocation10 + $0xb50] sm:$0xff]  ;;  %v5149_v54 = vpack.c.bf16 %v2010_v47, %v2003_v46  ;;  %v5419_v46 = vpack.c.bf16 %v2516_v31, %v2509_v30  ;;  %v2404_v47 = vld [vmem:[#allocation10 + $0x1728] sm:$0xff]  ;;  %v2115_v30 = vld [vmem:[#allocation10 + $0xe20] sm:$0xff] }
 0x46b   :  { %v2122_v31 = vld [vmem:[#allocation10 + $0xe58] sm:$0xff] }
 0x46c   :  { %5134 = vmatpush1.bf16.msra.mxu1 %v5133_v9  ;;  %v2024_v9 = vld [vmem:[#allocation10 + $0xb48] sm:$0xff] }
 0x46d   :  { %5390 = vmatpush3.bf16.msra.mxu0 %v5389_v58  ;;  %5136 = vmatprep.subr.bf16.mxu1 %v5135_v59  ;;  %v2355_v58 = vld [vmem:[#allocation10 + $0x15a0] sm:$0xff]  ;;  %v5151_v59 = vpack.c.bf16 %v2025_v56, %v2018_v50  ;;  %v5153_v4 = vpack.c.bf16 %v2024_v9, %v2017_v57  ;;  %v2530_v50 = vld [vmem:[#allocation10 + $0x1b18] sm:$0xff] }
 0x46e   :  { %5392 = vmatprep.subr.bf16.mxu0 %v5391_v63  ;;  %v2039_v63 = vld [vmem:[#allocation10 + $0xbc0] sm:$0xff]  ;;  %v5409_v5 = vpack.c.bf16 %v2362_v61, %v2355_v58  ;;  %v5423_v9 = vpack.c.bf16 %v2530_v50, %v2523_v12  ;;  %v2418_v58 = vld [vmem:[#allocation10 + $0x1798] sm:$0xff]  ;;  %v2537_v61 = vld [vmem:[#allocation10 + $0x1b50] sm:$0xff] }
 0x46f   :  { %v5155_v6 = vpack.c.bf16 %v2039_v63, %v2032_v38  ;;  %v2411_v57 = vld [vmem:[#allocation10 + $0x1760] sm:$0xff]  ;;  %v2544_v38 = vld [vmem:[#allocation10 + $0x1b88] sm:$0xff]  ;;  %v2150_v50 = vld [vmem:[#allocation10 + $0xf38] sm:$0xff] }
 0x470   :  { %5138 = vmatpush1.bf16.msra.mxu1 %v5137_v62  ;;  %v2031_v62 = vld [vmem:[#allocation10 + $0xb80] sm:$0xff]  ;;  %v5425_v0 = vpack.c.bf16 %v2418_v58, %v2411_v57  ;;  %v2164_v57 = vld [vmem:[#allocation10 + $0xfa8] sm:$0xff] }
 0x471   :  { %5394 = vmatpush3.bf16.msra.mxu0 %v5393_v25  ;;  %5140 = vmatprep.subr.bf16.mxu1 %v5139_v10  ;;  %v2038_v25 = vld [vmem:[#allocation10 + $0xbb8] sm:$0xff]  ;;  %v2369_v10 = vld [vmem:[#allocation10 + $0x1610] sm:$0xff]  ;;  %v2143_v12 = vld [vmem:[#allocation10 + $0xf00] sm:$0xff] }
 0x472   :  { %5396 = vmatprep.subr.bf16.mxu0 %v5395_v18  ;;  %v2053_v18 = vld [vmem:[#allocation10 + $0xc30] sm:$0xff]  ;;  %v5157_v21 = vpack.c.bf16 %v2038_v25, %v2031_v62  ;;  %v5413_v45 = vpack.c.bf16 %v2376_v14, %v2369_v10  ;;  %v5427_v62 = vpack.c.bf16 %v2544_v38, %v2537_v61  ;;  %v2432_v25 = vld [vmem:[#allocation10 + $0x1808] sm:$0xff]  ;;  %v2102_v10 = vld [vmem:[#allocation10 + $0xdb8] sm:$0xff] }
 0x473   :  { %v5159_v23 = vpack.c.bf16 %v2053_v18, %v2046_v16  ;;  %v2551_v14 = vld [vmem:[#allocation10 + $0x1bc0] sm:$0xff]  ;;  %v2558_v16 = vld [vmem:[#allocation10 + $0x1bf8] sm:$0xff]  ;;  %v2193_v38 = vld [vmem:[#allocation10 + $0x1090] sm:$0xff] }
 0x474   :  { %5142 = vmatpush1.bf16.msra.mxu1 %v5141_v24  ;;  %v2045_v24 = vld [vmem:[#allocation10 + $0xbf0] sm:$0xff]  ;;  %v2186_v61 = vld [vmem:[#allocation10 + $0x1058] sm:$0xff] }
 0x475   :  { %5398 = vmatpush3.bf16.msra.mxu0 %v5397_v26  ;;  %5144 = vmatprep.subr.bf16.mxu1 %v5143_v27  ;;  %v2052_v26 = vld [vmem:[#allocation10 + $0xc28] sm:$0xff]  ;;  %v2383_v27 = vld [vmem:[#allocation10 + $0x1680] sm:$0xff] }
 0x476   :  { %5400 = vmatprep.subr.bf16.mxu0 %v5399_v29  ;;  %v2067_v29 = vld [vmem:[#allocation10 + $0xca0] sm:$0xff]  ;;  %v5161_v37 = vpack.c.bf16 %v2052_v26, %v2045_v24  ;;  %v5417_v39 = vpack.c.bf16 %v2390_v51, %v2383_v27  ;;  %v5431_v24 = vpack.c.bf16 %v2558_v16, %v2551_v14  ;;  %v2446_v26 = vld [vmem:[#allocation10 + $0x1878] sm:$0xff]  ;;  %v2116_v27 = vld [vmem:[#allocation10 + $0xe28] sm:$0xff] }
 0x477   :  { %v5163_v42 = vpack.c.bf16 %v2067_v29, %v2060_v28  ;;  %v2214_v14 = vld [vmem:[#allocation10 + $0x1138] sm:$0xff]  ;;  %v2221_v16 = vld [vmem:[#allocation10 + $0x1170] sm:$0xff] }
 0x478   :  { %5146 = vmatpush1.bf16.msra.mxu1 %v5145_v40  ;;  %v2059_v40 = vld [vmem:[#allocation10 + $0xc60] sm:$0xff] }
 0x479   :  { %5402 = vmatpush3.bf16.msra.mxu0 %v5401_v43  ;;  %5148 = vmatprep.subr.bf16.mxu1 %v5147_v44  ;;  %v2066_v43 = vld [vmem:[#allocation10 + $0xc98] sm:$0xff]  ;;  %v2397_v44 = vld [vmem:[#allocation10 + $0x16f0] sm:$0xff] }
 0x47a   :  { %5404 = vmatprep.subr.bf16.mxu0 %v5403_v48  ;;  %v2074_v48 = vld [vmem:[#allocation10 + $0xcd8] sm:$0xff]  ;;  %v5165_v56 = vpack.c.bf16 %v2066_v43, %v2059_v40  ;;  %v5421_v52 = vpack.c.bf16 %v2404_v47, %v2397_v44  ;;  %v2129_v43 = vld [vmem:[#allocation10 + $0xe90] sm:$0xff]  ;;  %v2136_v44 = vld [vmem:[#allocation10 + $0xec8] sm:$0xff] }
 0x47b   :  { %v5167_v53 = vpack.c.bf16 %v2081_v49, %v2074_v48  ;;  %v2151_v47 = vld [vmem:[#allocation10 + $0xf40] sm:$0xff]  ;;  %v5185_v48 = vpack.c.bf16 %v2136_v44, %v2129_v43 }
 0x47c   :  { %3653 = vmatmul.mubr.f32.vlgmr.msra.gmra.mrb[16].mxu0 %v5930_v34  ;;  %5150 = vmatpush1.bf16.msra.mxu1 %v5149_v54  ;;  %v2073_v54 = vld [vmem:[#allocation10 + $0xcd0] sm:$0xff]  ;;  %v2255_v44 = vld [vmem:[#allocation10 + $0x1280] sm:$0xff] }
 0x47d   :  { %5406 = vmatpush3.bf16.msra.mxu0 %v5405_v55  ;;  %3722 = vmatprep.mubr.f32.mxu0 %v5935_v11  ;;  %v2080_v55 = vld [vmem:[#allocation10 + $0xd08] sm:$0xff] }
 0x47e   :  { %5152 = vmatprep.subr.bf16.mxu1 %v5151_v59  ;;  %5408 = vmatprep.subr.bf16.mxu0 %v5407_v60  ;;  %v2088_v59 = vld [vmem:[#allocation10 + $0xd48] sm:$0xff]  ;;  %v2095_v60 = vld [vmem:[#allocation10 + $0xd80] sm:$0xff]  ;;  %v5169_v63 = vpack.c.bf16 %v2080_v55, %v2073_v54  ;;  %v2157_v55 = vld [vmem:[#allocation10 + $0xf70] sm:$0xff] }
 0x47f   :  { %v5171_v1 = vpack.c.bf16 %v2095_v60, %v2088_v59  ;;  %v5193_v58 = vpack.c.bf16 %v2164_v57, %v2157_v55  ;;  %v2171_v60 = vld [vmem:[#allocation10 + $0xfe0] sm:$0xff] }
 0x480   :  { %5154 = vmatpush1.bf16.msra.mxu1 %v5153_v4  ;;  %v2087_v4 = vld [vmem:[#allocation10 + $0xd40] sm:$0xff] }
 0x481   :  { %5410 = vmatpush3.bf16.msra.mxu0 %v5409_v5  ;;  %5156 = vmatprep.subr.bf16.mxu1 %v5155_v6  ;;  %v2094_v5 = vld [vmem:[#allocation10 + $0xd78] sm:$0xff]  ;;  %v2425_v6 = vld [vmem:[#allocation10 + $0x17d0] sm:$0xff]  ;;  %v2283_v57 = vld [vmem:[#allocation10 + $0x1360] sm:$0xff] }
 0x482   :  { %5412 = vmatprep.subr.bf16.mxu0 %v5411_v17  ;;  %v2109_v17 = vld [vmem:[#allocation10 + $0xdf0] sm:$0xff]  ;;  %v5173_v18 = vpack.c.bf16 %v2094_v5, %v2087_v4  ;;  %v5429_v19 = vpack.c.bf16 %v2432_v25, %v2425_v6  ;;  %v2192_v4 = vld [vmem:[#allocation10 + $0x1088] sm:$0xff]  ;;  %v2207_v6 = vld [vmem:[#allocation10 + $0x1100] sm:$0xff] }
 0x483   :  { %v5175_v20 = vpack.c.bf16 %v2109_v17, %v2102_v10  ;;  %v2200_v5 = vld [vmem:[#allocation10 + $0x10c8] sm:$0xff]  ;;  %v2199_v10 = vld [vmem:[#allocation10 + $0x10c0] sm:$0xff]  ;;  %v2206_v17 = vld [vmem:[#allocation10 + $0x10f8] sm:$0xff] }
 0x484   :  { %5158 = vmatpush1.bf16.msra.mxu1 %v5157_v21  ;;  %v2101_v21 = vld [vmem:[#allocation10 + $0xdb0] sm:$0xff]  ;;  %v5203_v25 = vpack.c.bf16 %v2207_v6, %v2200_v5  ;;  %v2318_v5 = vld [vmem:[#allocation10 + $0x1478] sm:$0xff] }
 0x485   :  { %5414 = vmatpush3.bf16.msra.mxu0 %v5413_v45  ;;  %5160 = vmatprep.subr.bf16.mxu1 %v5159_v23  ;;  %v2108_v45 = vld [vmem:[#allocation10 + $0xde8] sm:$0xff]  ;;  %v2439_v23 = vld [vmem:[#allocation10 + $0x1840] sm:$0xff]  ;;  %v2326_v6 = vld [vmem:[#allocation10 + $0x14b8] sm:$0xff] }
 0x486   :  { %5416 = vmatprep.subr.bf16.mxu0 %v5415_v22  ;;  %v2123_v22 = vld [vmem:[#allocation10 + $0xe60] sm:$0xff]  ;;  %v5177_v51 = vpack.c.bf16 %v2108_v45, %v2101_v21  ;;  %v5433_v28 = vpack.c.bf16 %v2446_v26, %v2439_v23  ;;  %v2220_v21 = vld [vmem:[#allocation10 + $0x1168] sm:$0xff] }
 0x487   :  { %v5179_v29 = vpack.c.bf16 %v2123_v22, %v2116_v27  ;;  %v2228_v45 = vld [vmem:[#allocation10 + $0x11a8] sm:$0xff]  ;;  %v2235_v23 = vld [vmem:[#allocation10 + $0x11e0] sm:$0xff]  ;;  %v2234_v22 = vld [vmem:[#allocation10 + $0x11d8] sm:$0xff] }
 0x488   :  { %5162 = vmatpush1.bf16.msra.mxu1 %v5161_v37  ;;  %v2130_v37 = vld [vmem:[#allocation10 + $0xe98] sm:$0xff]  ;;  %v5211_v26 = vpack.c.bf16 %v2235_v23, %v2228_v45  ;;  %v2227_v27 = vld [vmem:[#allocation10 + $0x11a0] sm:$0xff] }
 0x489   :  { %5418 = vmatpush3.bf16.msra.mxu0 %v5417_v39  ;;  %5164 = vmatprep.subr.bf16.mxu1 %v5163_v42  ;;  %v2137_v39 = vld [vmem:[#allocation10 + $0xed0] sm:$0xff]  ;;  %v5181_v42 = vpack.c.bf16 %v2122_v31, %v2115_v30  ;;  %v2346_v45 = vld [vmem:[#allocation10 + $0x1558] sm:$0xff] }
 0x48a   :  { %5420 = vmatprep.subr.bf16.mxu0 %v5419_v46  ;;  %v5183_v40 = vpack.c.bf16 %v2137_v39, %v2130_v37  ;;  %v2144_v46 = vld [vmem:[#allocation10 + $0xf08] sm:$0xff]  ;;  %v2241_v31 = vld [vmem:[#allocation10 + $0x1210] sm:$0xff]  ;;  %v2354_v23 = vld [vmem:[#allocation10 + $0x1598] sm:$0xff] }
 0x48b   :  { %v5187_v49 = vpack.c.bf16 %v2151_v47, %v2144_v46  ;;  %v2248_v37 = vld [vmem:[#allocation10 + $0x1248] sm:$0xff]  ;;  %v2262_v46 = vld [vmem:[#allocation10 + $0x12b8] sm:$0xff] }
 0x48c   :  { %5166 = vmatpush1.bf16.msra.mxu1 %v5165_v56  ;;  %v2158_v56 = vld [vmem:[#allocation10 + $0xf78] sm:$0xff]  ;;  %v2256_v39 = vld [vmem:[#allocation10 + $0x1288] sm:$0xff] }
 0x48d   :  { %5422 = vmatpush3.bf16.msra.mxu0 %v5421_v52  ;;  %5168 = vmatprep.subr.bf16.mxu1 %v5167_v53  ;;  %v2165_v52 = vld [vmem:[#allocation10 + $0xfb0] sm:$0xff]  ;;  %v5189_v53 = vpack.c.bf16 %v2150_v50, %v2143_v12  ;;  %v2270_v47 = vld [vmem:[#allocation10 + $0x12f8] sm:$0xff] }
 0x48e   :  { %5424 = vmatprep.subr.bf16.mxu0 %v5423_v9  ;;  %v5191_v54 = vpack.c.bf16 %v2165_v52, %v2158_v56  ;;  %v2172_v9 = vld [vmem:[#allocation10 + $0xfe8] sm:$0xff]  ;;  %v2269_v50 = vld [vmem:[#allocation10 + $0x12f0] sm:$0xff] }
 0x48f   :  { %v2276_v56 = vld [vmem:[#allocation10 + $0x1328] sm:$0xff] }
 0x490   :  { %5170 = vmatpush1.bf16.msra.mxu1 %v5169_v63  ;;  %v2284_v52 = vld [vmem:[#allocation10 + $0x1368] sm:$0xff] }
 0x491   :  { %5426 = vmatpush3.bf16.msra.mxu0 %v5425_v0  ;;  %5172 = vmatprep.subr.bf16.mxu1 %v5171_v1  ;;  %v5199_v0 = vpack.c.bf16 %v2193_v38, %v2186_v61  ;;  %v2185_v1 = vld [vmem:[#allocation10 + $0x1050] sm:$0xff]  ;;  %v2304_v61 = vld [vmem:[#allocation10 + $0x1408] sm:$0xff] }
 0x492   :  { %5428 = vmatprep.subr.bf16.mxu0 %v5427_v62  ;;  %v5201_v62 = vpack.c.bf16 %v2192_v4, %v2185_v1  ;;  %v2312_v38 = vld [vmem:[#allocation10 + $0x1448] sm:$0xff]  ;;  %v2311_v4 = vld [vmem:[#allocation10 + $0x1440] sm:$0xff] }
 0x494   :  { %5174 = vmatpush1.bf16.msra.mxu1 %v5173_v18  ;;  %v5205_v18 = vpack.c.bf16 %v2206_v17, %v2199_v10  ;;  %v2325_v17 = vld [vmem:[#allocation10 + $0x14b0] sm:$0xff] }
 0x495   :  { %5430 = vmatpush3.bf16.msra.mxu0 %v5429_v19  ;;  %5176 = vmatprep.subr.bf16.mxu1 %v5175_v20  ;;  %v5207_v19 = vpack.c.bf16 %v2221_v16, %v2214_v14  ;;  %v2213_v20 = vld [vmem:[#allocation10 + $0x1130] sm:$0xff]  ;;  %v2332_v14 = vld [vmem:[#allocation10 + $0x14e8] sm:$0xff] }
 0x496   :  { %5432 = vmatprep.subr.bf16.mxu0 %v5431_v24  ;;  %v5209_v24 = vpack.c.bf16 %v2220_v21, %v2213_v20  ;;  %v2340_v16 = vld [vmem:[#allocation10 + $0x1528] sm:$0xff]  ;;  %v2339_v21 = vld [vmem:[#allocation10 + $0x1520] sm:$0xff] }
 0x498   :  { %5178 = vmatpush1.bf16.msra.mxu1 %v5177_v51  ;;  %v2242_v51 = vld [vmem:[#allocation10 + $0x1218] sm:$0xff] }
 0x499   :  { %5434 = vmatpush3.bf16.msra.mxu0 %v5433_v28  ;;  %5180 = vmatprep.subr.bf16.mxu1 %v5179_v29  ;;  %v2249_v28 = vld [vmem:[#allocation10 + $0x1250] sm:$0xff]  ;;  %v5213_v29 = vpack.c.bf16 %v2234_v22, %v2227_v27 }
 0x49a   :  { %v5215_v30 = vpack.c.bf16 %v2249_v28, %v2242_v51  ;;  %v2353_v22 = vld [vmem:[#allocation10 + $0x1590] sm:$0xff]  ;;  %v2360_v51 = vld [vmem:[#allocation10 + $0x15c8] sm:$0xff] }
 0x49b   :  { %3300 = vmatmul.mubr.f32.vlgmr.msra.gmra.mrb[6].mxu1 %v5907_v15  ;;  %v2179_v15 = vld [vmem:[#allocation10 + $0x1020] sm:$0xff]  ;;  %v2368_v28 = vld [vmem:[#allocation10 + $0x1608] sm:$0xff] }
 0x49c   :  { %3723 = vmatmul.mubr.f32.vlgmr.msra.gmra.mrb[18].mxu0 %v5944_v13  ;;  %5182 = vmatpush1.bf16.msra.mxu1 %v5181_v42  ;;  %v5195_v59 = vpack.c.bf16 %v2179_v15, %v2172_v9  ;;  %v2263_v42 = vld [vmem:[#allocation10 + $0x12c0] sm:$0xff]  ;;  %v2290_v9 = vld [vmem:[#allocation10 + $0x1398] sm:$0xff] }
 0x49d   :  { %3370 = vmatprep.mubr.f32.mxu1 %v5925_v3  ;;  %5184 = vmatprep.subr.bf16.mxu1 %v5183_v40  ;;  %v2178_v3 = vld [vmem:[#allocation10 + $0x1018] sm:$0xff]  ;;  %v5217_v40 = vpack.c.bf16 %v2248_v37, %v2241_v31  ;;  %v5219_v43 = vpack.c.bf16 %v2263_v42, %v2256_v39  ;;  %v2367_v37 = vld [vmem:[#allocation10 + $0x1600] sm:$0xff] }
 0x49e   :  { %v5197_v63 = vpack.c.bf16 %v2178_v3, %v2171_v60  ;;  %v2298_v15 = vld [vmem:[#allocation10 + $0x13d8] sm:$0xff]  ;;  %v2297_v3 = vld [vmem:[#allocation10 + $0x13d0] sm:$0xff] }
 0x49f   :  { %v2374_v39 = vld [vmem:[#allocation10 + $0x1638] sm:$0xff] }
 0x4a0   :  { %5186 = vmatpush1.bf16.msra.mxu1 %v5185_v48  ;;  %v2277_v48 = vld [vmem:[#allocation10 + $0x1330] sm:$0xff]  ;;  %v2382_v42 = vld [vmem:[#allocation10 + $0x1678] sm:$0xff] }
 0x4a1   :  { %5188 = vmatprep.subr.bf16.mxu1 %v5187_v49  ;;  %v5221_v49 = vpack.c.bf16 %v2262_v46, %v2255_v44  ;;  %v5223_v12 = vpack.c.bf16 %v2277_v48, %v2270_v47  ;;  %v2381_v46 = vld [vmem:[#allocation10 + $0x1670] sm:$0xff]  ;;  %v2388_v47 = vld [vmem:[#allocation10 + $0x16a8] sm:$0xff] }
 0x4a2   :  { %v2396_v48 = vld [vmem:[#allocation10 + $0x16e8] sm:$0xff] }
 0x4a4   :  { %5190 = vmatpush1.bf16.msra.mxu1 %v5189_v53  ;;  %v2291_v53 = vld [vmem:[#allocation10 + $0x13a0] sm:$0xff] }
 0x4a5   :  { %5192 = vmatprep.subr.bf16.mxu1 %v5191_v54  ;;  %v5225_v54 = vpack.c.bf16 %v2276_v56, %v2269_v50  ;;  %v5227_v55 = vpack.c.bf16 %v2291_v53, %v2284_v52  ;;  %v2402_v50 = vld [vmem:[#allocation10 + $0x1718] sm:$0xff]  ;;  %v2417_v52 = vld [vmem:[#allocation10 + $0x1790] sm:$0xff] }
 0x4a6   :  { %v2410_v56 = vld [vmem:[#allocation10 + $0x1758] sm:$0xff] }
 0x4a8   :  { %5194 = vmatpush1.bf16.msra.mxu1 %v5193_v58  ;;  %v2305_v58 = vld [vmem:[#allocation10 + $0x1410] sm:$0xff] }
 0x4a9   :  { %5196 = vmatprep.subr.bf16.mxu1 %v5195_v59  ;;  %v5229_v59 = vpack.c.bf16 %v2290_v9, %v2283_v57  ;;  %v5231_v60 = vpack.c.bf16 %v2305_v58, %v2298_v15  ;;  %v2409_v57 = vld [vmem:[#allocation10 + $0x1750] sm:$0xff]  ;;  %v2416_v9 = vld [vmem:[#allocation10 + $0x1788] sm:$0xff]  ;;  %v2431_v58 = vld [vmem:[#allocation10 + $0x1800] sm:$0xff] }
 0x4aa   :  { %v2424_v15 = vld [vmem:[#allocation10 + $0x17c8] sm:$0xff] }
 0x4ac   :  { %5198 = vmatpush1.bf16.msra.mxu1 %v5197_v63  ;;  %v2319_v63 = vld [vmem:[#allocation10 + $0x1480] sm:$0xff] }
 0x4ad   :  { %5200 = vmatprep.subr.bf16.mxu1 %v5199_v0  ;;  %v5233_v0 = vpack.c.bf16 %v2304_v61, %v2297_v3  ;;  %v5235_v1 = vpack.c.bf16 %v2319_v63, %v2312_v38  ;;  %v5265_v38 = vpack.c.bf16 %v2416_v9, %v2409_v57  ;;  %v5267_v63 = vpack.c.bf16 %v2431_v58, %v2424_v15  ;;  %v2507_v57 = vld [vmem:[#allocation10 + $0x1a60] sm:$0xff]  ;;  %v2514_v9 = vld [vmem:[#allocation10 + $0x1a98] sm:$0xff]  ;;  %v2529_v58 = vld [vmem:[#allocation10 + $0x1b10] sm:$0xff] }
 0x4ae   :  { %v2522_v15 = vld [vmem:[#allocation10 + $0x1ad8] sm:$0xff] }
 0x4b0   :  { %5202 = vmatpush1.bf16.msra.mxu1 %v5201_v62  ;;  %v2333_v62 = vld [vmem:[#allocation10 + $0x14f0] sm:$0xff] }
 0x4b1   :  { %5204 = vmatprep.subr.bf16.mxu1 %v5203_v25  ;;  %v5237_v25 = vpack.c.bf16 %v2318_v5, %v2311_v4  ;;  %v5239_v10 = vpack.c.bf16 %v2333_v62, %v2326_v6  ;;  %v2438_v6 = vld [vmem:[#allocation10 + $0x1838] sm:$0xff]  ;;  %v2445_v62 = vld [vmem:[#allocation10 + $0x1870] sm:$0xff] }
 0x4b4   :  { %5206 = vmatpush1.bf16.msra.mxu1 %v5205_v18  ;;  %v2347_v18 = vld [vmem:[#allocation10 + $0x1560] sm:$0xff] }
 0x4b5   :  { %5208 = vmatprep.subr.bf16.mxu1 %v5207_v19  ;;  %v5241_v19 = vpack.c.bf16 %v2332_v14, %v2325_v17  ;;  %v5243_v20 = vpack.c.bf16 %v2347_v18, %v2340_v16  ;;  %v2437_v16 = vld [vmem:[#allocation10 + $0x1830] sm:$0xff]  ;;  %v2444_v18 = vld [vmem:[#allocation10 + $0x1868] sm:$0xff] }
 0x4b8   :  { %5210 = vmatpush1.bf16.msra.mxu1 %v5209_v24  ;;  %v2361_v24 = vld [vmem:[#allocation10 + $0x15d0] sm:$0xff] }
 0x4b9   :  { %5212 = vmatprep.subr.bf16.mxu1 %v5211_v26  ;;  %v5245_v26 = vpack.c.bf16 %v2346_v45, %v2339_v21  ;;  %v5247_v27 = vpack.c.bf16 %v2361_v24, %v2354_v23  ;;  %v5273_v21 = vpack.c.bf16 %v2444_v18, %v2437_v16  ;;  %v2451_v23 = vld [vmem:[#allocation10 + $0x18a0] sm:$0xff]  ;;  %v2458_v24 = vld [vmem:[#allocation10 + $0x18d8] sm:$0xff] }
 0x4bc   :  { %5214 = vmatpush1.bf16.msra.mxu1 %v5213_v29  ;;  %v2375_v29 = vld [vmem:[#allocation10 + $0x1640] sm:$0xff] }
 0x4bd   :  { %5216 = vmatprep.subr.bf16.mxu1 %v5215_v30  ;;  %v5249_v30 = vpack.c.bf16 %v2360_v51, %v2353_v22  ;;  %v5251_v31 = vpack.c.bf16 %v2375_v29, %v2368_v28  ;;  %v5277_v22 = vpack.c.bf16 %v2458_v24, %v2451_v23  ;;  %v2465_v28 = vld [vmem:[#allocation10 + $0x1910] sm:$0xff]  ;;  %v2472_v29 = vld [vmem:[#allocation10 + $0x1948] sm:$0xff] }
 0x4c0   :  { %5218 = vmatpush1.bf16.msra.mxu1 %v5217_v40  ;;  %v2389_v40 = vld [vmem:[#allocation10 + $0x16b0] sm:$0xff] }
 0x4c1   :  { %5220 = vmatprep.subr.bf16.mxu1 %v5219_v43  ;;  %v5253_v43 = vpack.c.bf16 %v2374_v39, %v2367_v37  ;;  %v5255_v44 = vpack.c.bf16 %v2389_v40, %v2382_v42  ;;  %v5281_v42 = vpack.c.bf16 %v2472_v29, %v2465_v28 }
 0x4c4   :  { %5222 = vmatpush1.bf16.msra.mxu1 %v5221_v49  ;;  %v2403_v49 = vld [vmem:[#allocation10 + $0x1720] sm:$0xff] }
 0x4c5   :  { %5224 = vmatprep.subr.bf16.mxu1 %v5223_v12  ;;  %v5259_v12 = vpack.c.bf16 %v2403_v49, %v2396_v48  ;;  %v2494_v48 = vld [vmem:[#allocation10 + $0x19f8] sm:$0xff]  ;;  %v2501_v49 = vld [vmem:[#allocation10 + $0x1a30] sm:$0xff] }
 0x4c8   :  { %5226 = vmatpush1.bf16.msra.mxu1 %v5225_v54  ;;  %v5963_v54 = vld [vmem:[#allocation12] sm:$0xff] }
 0x4c9   :  { %5228 = vmatprep.subr.bf16.mxu1 %v5227_v55  ;;  %v5263_v55 = vpack.c.bf16 %v2417_v52, %v2410_v56  ;;  %v2568_v3 = vrot.slane %v5963_v54, %v5839_v35  ;;  %v2576_v61 = vrot.slane %v5963_v54, %v5857_v41  ;;  %v5271_v41 = vpack.c.bf16 %v2445_v62, %v2438_v6  ;;  %v2508_v56 = vld [vmem:[#allocation10 + $0x1a68] sm:$0xff]  ;;  %v2515_v52 = vld [vmem:[#allocation10 + $0x1aa0] sm:$0xff]  ;;  %v2550_v6 = vld [vmem:[#allocation10 + $0x1bb8] sm:$0xff] }
 0x4ca   :  { %v2557_v62 = vld [vmem:[#allocation10 + $0x1bf0] sm:$0xff]  ;;  %v2588_v16 = vrot.slane %v5963_v54, %v1057_v8  ;;  %v2580_v8 = vrot.slane %v5963_v54, %v1049_v2 }
 0x4cc   :  { %5230 = vmatpush1.bf16.msra.mxu1 %v5229_v59  ;;  %v2564_v59 = vrot.slane %v5963_v54, %v5834_v33 }
 0x4cd   :  { %5232 = vmatprep.subr.bf16.mxu1 %v5231_v60  ;;  %v2572_v60 = vrot.slane %v5963_v54, %v5854_v36 }
 0x4d0   :  { %5234 = vmatpush1.bf16.msra.mxu1 %v5233_v0  ;;  %v2423_v0 = vld [vmem:[#allocation10 + $0x17c0] sm:$0xff] }
 0x4d1   :  { %5236 = vmatprep.subr.bf16.mxu1 %v5235_v1  ;;  %v2430_v1 = vld [vmem:[#allocation10 + $0x17f8] sm:$0xff] }
 0x4d2   :  { %v5269_v35 = vpack.c.bf16 %v2430_v1, %v2423_v0 }
 0x4d4   :  { %5238 = vmatpush1.bf16.msra.mxu1 %v5237_v25 }
 0x4d5   :  { %5240 = vmatprep.subr.bf16.mxu1 %v5239_v10 }
 0x4d8   :  { %5242 = vmatpush1.bf16.msra.mxu1 %v5241_v19  ;;  %v2452_v19 = vld [vmem:[#allocation10 + $0x18a8] sm:$0xff] }
 0x4d9   :  { %5244 = vmatprep.subr.bf16.mxu1 %v5243_v20  ;;  %v2459_v20 = vld [vmem:[#allocation10 + $0x18e0] sm:$0xff] }
 0x4da   :  { %v5275_v45 = vpack.c.bf16 %v2459_v20, %v2452_v19 }
 0x4db   :  { %3371 = vmatmul.mubr.f32.vlgmr.msra.gmra.mrb[6].mxu1 %v5930_v34  ;;  %v5257_v34 = vpack.c.bf16 %v2388_v47, %v2381_v46  ;;  %v2486_v46 = vld [vmem:[#allocation10 + $0x19b8] sm:$0xff] }
 0x4dc   :  { %5246 = vmatpush1.bf16.msra.mxu1 %v5245_v26  ;;  %3441 = vmatprep.mubr.f32.mxu1 %v5935_v11  ;;  %v2395_v11 = vld [vmem:[#allocation10 + $0x16e0] sm:$0xff]  ;;  %v2466_v26 = vld [vmem:[#allocation10 + $0x1918] sm:$0xff] }
 0x4dd   :  { %5248 = vmatprep.subr.bf16.mxu1 %v5247_v27  ;;  %v5261_v53 = vpack.c.bf16 %v2402_v50, %v2395_v11  ;;  %v2473_v27 = vld [vmem:[#allocation10 + $0x1950] sm:$0xff]  ;;  %v2500_v50 = vld [vmem:[#allocation10 + $0x1a28] sm:$0xff] }
 0x4de   :  { %v5279_v51 = vpack.c.bf16 %v2473_v27, %v2466_v26  ;;  %v2493_v11 = vld [vmem:[#allocation10 + $0x19f0] sm:$0xff] }
 0x4e0   :  { %5250 = vmatpush1.bf16.msra.mxu1 %v5249_v30  ;;  %v2480_v30 = vld [vmem:[#allocation10 + $0x1988] sm:$0xff] }
 0x4e1   :  { %5252 = vmatprep.subr.bf16.mxu1 %v5251_v31  ;;  %v2487_v31 = vld [vmem:[#allocation10 + $0x19c0] sm:$0xff] }
 0x4e4   :  { %5254 = vmatpush1.bf16.msra.mxu1 %v5253_v43  ;;  %v5283_v43 = vpack.c.bf16 %v2487_v31, %v2480_v30 }
 0x4e5   :  { %5256 = vmatprep.subr.bf16.mxu1 %v5255_v44  ;;  %v2479_v44 = vld [vmem:[#allocation10 + $0x1980] sm:$0xff] }
 0x4e8   :  { %5258 = vmatpush1.bf16.msra.mxu1 %v5257_v34  ;;  %v5285_v34 = vpack.c.bf16 %v2486_v46, %v2479_v44 }
 0x4e9   :  { %5260 = vmatprep.subr.bf16.mxu1 %v5259_v12  ;;  %v5287_v12 = vpack.c.bf16 %v2501_v49, %v2494_v48 }
 0x4ec   :  { %5262 = vmatpush1.bf16.msra.mxu1 %v5261_v53  ;;  %v5289_v53 = vpack.c.bf16 %v2500_v50, %v2493_v11 }
 0x4ed   :  { %5264 = vmatprep.subr.bf16.mxu1 %v5263_v55  ;;  %v5291_v55 = vpack.c.bf16 %v2515_v52, %v2508_v56 }
 0x4ee   :  { %v2875_v4 = vpop.f32.mrb[4].mxu1  ;;  %v3159_v5 = vpop.f32.mrb[10].mxu0 }
 0x4ef   :  { %v5443_v33 = vadd.f32 %v2875_v4, %v2564_v59  ;;  %v5445_v25 = vadd.f32 %v3159_v5, %v2572_v60  ;;  %v2877_v10 = vpop.f32.mrb[5].mxu1  ;;  %v3161_v36 = vpop.f32.mrb[11].mxu0  ;;  %v5293_v59 = vpack.c.bf16 %v2514_v9, %v2507_v57  ;;  %v5295_v60 = vpack.c.bf16 %v2529_v58, %v2522_v15  ;;  %v2535_v4 = vld [vmem:[#allocation10 + $0x1b40] sm:$0xff]  ;;  %v2542_v5 = vld [vmem:[#allocation10 + $0x1b78] sm:$0xff] }
 0x4f0   :  { %v5444_v17 = vadd.f32 %v2877_v10, %v2568_v3  ;;  %v5446_v14 = vadd.f32 %v3161_v36, %v2576_v61  ;;  %5266 = vmatpush1.bf16.msra.mxu1 %v5265_v38  ;;  %v2521_v3 = vld [vmem:[#allocation10 + $0x1ad0] sm:$0xff]  ;;  %v2528_v61 = vld [vmem:[#allocation10 + $0x1b08] sm:$0xff]  ;;  %v5301_v10 = vpack.c.bf16 %v2542_v5, %v2535_v4 }
 0x4f1   :  { %5491 = vtanh.f32 %v5443_v33  ;;  %5268 = vmatprep.subr.bf16.mxu1 %v5267_v63  ;;  %v2536_v38 = vld [vmem:[#allocation10 + $0x1b48] sm:$0xff]  ;;  %v2543_v63 = vld [vmem:[#allocation10 + $0x1b80] sm:$0xff]  ;;  %v5297_v0 = vpack.c.bf16 %v2528_v61, %v2521_v3 }
 0x4f2   :  { %5493 = vtanh.f32 %v5445_v25  ;;  %v5299_v1 = vpack.c.bf16 %v2543_v63, %v2536_v38 }
 0x4f3   :  { %5495 = vtanh.f32 %v5444_v17  ;;  %v5303_v17 = vpack.c.bf16 %v2557_v62, %v2550_v6 }
 0x4f4   :  { %5497 = vtanh.f32 %v5446_v14  ;;  %5270 = vmatpush1.bf16.msra.mxu1 %v5269_v35  ;;  %v2549_v14 = vld [vmem:[#allocation10 + $0x1bb0] sm:$0xff]  ;;  %v2556_v35 = vld [vmem:[#allocation10 + $0x1be8] sm:$0xff] }
 0x4f5   :  { %5272 = vmatprep.subr.bf16.mxu1 %v5271_v41  ;;  %v5305_v41 = vpack.c.bf16 %v2556_v35, %v2549_v14 }
 0x4f8   :  { %5274 = vmatpush1.bf16.msra.mxu1 %v5273_v21 }
 0x4f9   :  { %5276 = vmatprep.subr.bf16.mxu1 %v5275_v45 }
 0x4fb   :  { %v5492_v37 = vpop.eup %5491 }
 0x4fc   :  { %v5494_v39 = vpop.eup %5493  ;;  %3735 = vst [vmem:[%s6013_s9] sm:$0xff] %v5492_v37  ;;  %5278 = vmatpush1.bf16.msra.mxu1 %v5277_v22 }
 0x4fd   :  { %v5496_v40 = vpop.eup %5495  ;;  %3737 = vst [vmem:[%s6013_s9 + $0x10] sm:$0xff] %v5494_v39  ;;  %5280 = vmatprep.subr.bf16.mxu1 %v5279_v51 }
 0x4fe   :  { %v5498_v47 = vpop.eup %5497  ;;  %3736 = vst [vmem:[%s6013_s9 + $0x8] sm:$0xff] %v5496_v40 }
 0x4ff   :  { %3738 = vst [vmem:[%s6013_s9 + $0x18] sm:$0xff] %v5498_v47 }
 0x500   :  { %5282 = vmatpush1.bf16.msra.mxu1 %v5281_v42 }
 0x501   :  { %5284 = vmatprep.subr.bf16.mxu1 %v5283_v43 }
 0x504   :  { %5286 = vmatpush1.bf16.msra.mxu1 %v5285_v34 }
 0x505   :  { %5288 = vmatprep.subr.bf16.mxu1 %v5287_v12 }
 0x508   :  { %5290 = vmatpush1.bf16.msra.mxu1 %v5289_v53 }
 0x509   :  { %5292 = vmatprep.subr.bf16.mxu1 %v5291_v55 }
 0x50c   :  { %5294 = vmatpush1.bf16.msra.mxu1 %v5293_v59 }
 0x50d   :  { %5296 = vmatprep.subr.bf16.mxu1 %v5295_v60 }
 0x50f   :  { %v3783_v33 = vpop.f32.mrb[12].mxu0 }
 0x510   :  { %v3784_v25 = vpop.f32.mrb[13].mxu0  ;;  %5298 = vmatpush1.bf16.msra.mxu1 %v5297_v0 }
 0x511   :  { %v3785_v36 = vadd.f32 %v3784_v25, %v3783_v33  ;;  %5300 = vmatprep.subr.bf16.mxu1 %v5299_v1 }
 0x513   :  { %v3515_v20 = vadd.f32 %v3785_v36, %v2588_v16 }
 0x514   :  { %5302 = vmatpush1.bf16.msra.mxu1 %v5301_v10 }
 0x515   :  { %5304 = vmatprep.subr.bf16.mxu1 %v5303_v17 }
 0x518   :  { %5306 = vmatpush1.bf16.msra.mxu1 %v5305_v41 }
 0x51b   :  { %3442 = vmatmul.mubr.f32.vlgmr.msra.gmra.mrb[6].mxu1 %v5944_v13  ;;  %v2584_v13 = vrot.slane %v5963_v54, %v1053_v7 }
 0x52f   :  { %v3818_v18 = vpop.f32.mrb[14].mxu0 }
 0x530   :  { %v3819_v19 = vpop.f32.mrb[15].mxu0 }
 0x531   :  { %v3820_v21 = vadd.f32 %v3819_v19, %v3818_v18 }
 0x533   :  { %v3585_v45 = vadd.f32 %v3820_v21, %v3515_v20 }
 0x54f   :  { %v3853_v23 = vpop.f32.mrb[16].mxu0 }
 0x550   :  { %v3854_v24 = vpop.f32.mrb[17].mxu0 }
 0x551   :  { %v3855_v26 = vadd.f32 %v3854_v24, %v3853_v23 }
 0x553   :  { %v3655_v27 = vadd.f32 %v3855_v26, %v3585_v45 }
 0x56f   :  { %v3888_v22 = vpop.f32.mrb[18].mxu0 }
 0x570   :  { %v3889_v51 = vpop.f32.mrb[19].mxu0 }
 0x571   :  { %v3890_v28 = vadd.f32 %v3889_v51, %v3888_v22 }
 0x573   :  { %v3725_v29 = vadd.f32 %v3890_v28, %v3655_v27 }
 0x575   :  { %5499 = vtanh.f32 %v3725_v29 }
 0x57f   :  { %v5500_v30 = vpop.eup %5499 }
 0x580   :  { %3741 = vst [vmem:[%s6013_s9 + $0x30] sm:$0xff] %v5500_v30 }
 0x5ee   :  { %v3443_v31 = vpop.f32.mrb[6].mxu1 }
 0x5ef   :  { %v5447_v37 = vadd.f32 %v3443_v31, %v2580_v8  ;;  %v3445_v39 = vpop.f32.mrb[7].mxu1 }
 0x5f0   :  { %v5448_v42 = vadd.f32 %v3445_v39, %v2584_v13 }
 0x5f1   :  { %5501 = vtanh.f32 %v5447_v37 }
 0x5f2   :  { %5503 = vtanh.f32 %v5448_v42 }
 0x5fb   :  { %v5502_v40 = vpop.eup %5501 }
 0x5fc   :  { %v5504_v43 = vpop.eup %5503  ;;  %3739 = vst [vmem:[%s6013_s9 + $0x20] sm:$0xff] %v5502_v40 }
 0x5fd   :  { %3740 = vst [vmem:[%s6013_s9 + $0x28] sm:$0xff] %v5504_v43 }
 0x5fe   :  { %3746 = vsyncpa [#allocation3], 1 }
 0x5ff   :  { %3747 = vsyncpa [#allocation5], 1 }
 0x600   :  { %3748 = vsyncpa [#allocation8], 1 }
 0x601   :  { %3749 = vsyncpa [#allocation11], 1 }

</bundles_post_ra>
